<compile_context>
chip_gen: v5e
topology: v5e:2x2
jax: 0.10.0
libtpu: 0.0.40
codegen_flags: <defaults>
</compile_context>

<pallas_src>
import functools
import math

import numpy as np
import jax
import jax.numpy as jnp
from jax.experimental import pallas as pl
from jax.experimental.pallas import tpu as pltpu


# ----------------------------- helpers -----------------------------

def _vmem_limit_bytes():
    """Per-generation VMEM budget: ~70% of physical, capped (v5e/v6e 128 MiB, v7x 64 MiB)."""
    try:
        cap = int(pltpu.get_tpu_info().vmem_capacity_bytes)
    except Exception:
        cap = 128 * 1024 * 1024
    return max(32 * 1024 * 1024, min(100 * 1024 * 1024, int(cap * 0.7)))


_VMEM_LIMIT = _vmem_limit_bytes()


def _cparams(dimension_semantics):
    return pltpu.CompilerParams(dimension_semantics=dimension_semantics,
                                vmem_limit_bytes=_VMEM_LIMIT)


def _pick_tile(dim, align, target):
    """Largest tile <= target that is a multiple of `align` and divides `dim`.
    Falls back to the full dimension (always a legal block shape)."""
    if dim <= target:
        return dim
    t = (target // align) * align
    while t >= align:
        if dim % t == 0:
            return t
        t -= align
    return dim


def _pick_tm(M, target):
    tm = _pick_tile(M, 8, target)
    # keep >= 2 blocks along M where possible so both v7x TensorCores get work
    if tm == M and M >= 16 and M % 16 == 0:
        tm = M // 2
    return tm


# ----------------------------- fused tiled linear -----------------------------

def _linear_kernel(*refs, ln, act, residual, res_scale):
    it = iter(refs)
    x_ref = next(it)
    w_ref = next(it)
    b_ref = next(it)
    g_ref = next(it) if ln else None
    bt_ref = next(it) if ln else None
    r_ref = next(it) if residual else None
    o_ref = next(it)
    acc_ref = next(it)

    k_idx = pl.program_id(2)

    @pl.when(k_idx == 0)
    def _():
        acc_ref[...] = jnp.zeros_like(acc_ref)

    x = x_ref[...]
    if ln:  # fused LayerNorm prologue on the LHS tile (requires tk == K); math in f32
        x = x.astype(jnp.float32)
        mu = jnp.mean(x, axis=-1, keepdims=True)
        var = jnp.mean(jnp.square(x - mu), axis=-1, keepdims=True)
        x = (x - mu) * jax.lax.rsqrt(var + 1e-5)
        x = x * g_ref[...] + bt_ref[...]
        xb = x.astype(jnp.bfloat16)
    else:
        xb = x if x.dtype == jnp.bfloat16 else x.astype(jnp.bfloat16)

    acc_ref[...] += jnp.dot(xb, w_ref[...], preferred_element_type=jnp.float32)

    @pl.when(k_idx == pl.num_programs(2) - 1)
    def _():
        y = acc_ref[...] + b_ref[...]
        if act == "swish":
            y = y * jax.nn.sigmoid(y)
        if residual:
            y = r_ref[...].astype(jnp.float32) + res_scale * y
        o_ref[...] = y.astype(o_ref.dtype)


def linear(x, w, b, *, ln=None, act=None, residual=None, res_scale=1.0,
           out_dtype=jnp.bfloat16, tm=None, tn=None, tk=512):
    """out = [residual + res_scale *] act(LN?(x) @ w + b).  bf16 MXU ops, f32 accumulation."""
    M, K = x.shape
    N = w.shape[1]
    if tn is None:
        tn = _pick_tile(N, 128, 2048)      # full-N weight residency when it fits
    if tm is None:
        tm = _pick_tm(M, 512)
    tk = K if ln is not None else _pick_tile(K, 128, tk)   # LN needs the full feature dim
    k_steps = K // tk

    in_specs = [pl.BlockSpec((tm, tk), lambda i, j, k: (i, k)),
                pl.BlockSpec((tk, tn), lambda i, j, k: (k, j)),
                pl.BlockSpec((1, tn), lambda i, j, k: (0, j))]
    args = [x, w, b.reshape(1, N)]
    if ln is not None:
        g, bt = ln
        in_specs += [pl.BlockSpec((1, tk), lambda i, j, k: (0, k)),
                     pl.BlockSpec((1, tk), lambda i, j, k: (0, k))]
        args += [g.reshape(1, K), bt.reshape(1, K)]
    if residual is not None:
        in_specs.append(pl.BlockSpec((tm, tn), lambda i, j, k: (i, j)))
        args.append(residual)

    kernel = functools.partial(_linear_kernel, ln=ln is not None, act=act,
                               residual=residual is not None, res_scale=res_scale)
    return pl.pallas_call(
        kernel,
        out_shape=jax.ShapeDtypeStruct((M, N), out_dtype),
        grid=(M // tm, N // tn, k_steps),
        in_specs=in_specs,
        out_specs=pl.BlockSpec((tm, tn), lambda i, j, k: (i, j)),
        scratch_shapes=[pltpu.VMEM((tm, tn), jnp.float32)],
        compiler_params=_cparams(("parallel", "parallel", "arbitrary")),
    )(*args)


# ----------------------------- conv pw1 + GLU (LN fused) -----------------------------

def _pw1_glu_kernel(x_ref, wa_ref, wb_ref, ba_ref, bb_ref, g_ref, bt_ref, o_ref):
    x = x_ref[...].astype(jnp.float32)
    mu = jnp.mean(x, axis=-1, keepdims=True)
    var = jnp.mean(jnp.square(x - mu), axis=-1, keepdims=True)
    xn = (x - mu) * jax.lax.rsqrt(var + 1e-5) * g_ref[...] + bt_ref[...]
    xb = xn.astype(jnp.bfloat16)
    a = jnp.dot(xb, wa_ref[...], preferred_element_type=jnp.float32) + ba_ref[...]
    g = jnp.dot(xb, wb_ref[...], preferred_element_type=jnp.float32) + bb_ref[...]
    o_ref[...] = (a * jax.nn.sigmoid(g)).astype(o_ref.dtype)   # GLU(dim=channels)


def pw1_glu(x, wa, wb, ba, bb, gamma, beta, *, tm=None, tn=None):
    M, K = x.shape
    N = wa.shape[1]
    if tm is None:
        tm = _pick_tm(M, 256)
    if tn is None:
        tn = _pick_tile(N, 128, 512)
    return pl.pallas_call(
        _pw1_glu_kernel,
        out_shape=jax.ShapeDtypeStruct((M, N), jnp.bfloat16),
        grid=(M // tm, N // tn),
        in_specs=[pl.BlockSpec((tm, K), lambda i, j: (i, 0)),
                  pl.BlockSpec((K, tn), lambda i, j: (0, j)),
                  pl.BlockSpec((K, tn), lambda i, j: (0, j)),
                  pl.BlockSpec((1, tn), lambda i, j: (0, j)),
                  pl.BlockSpec((1, tn), lambda i, j: (0, j)),
                  pl.BlockSpec((1, K), lambda i, j: (0, 0)),
                  pl.BlockSpec((1, K), lambda i, j: (0, 0))],
        out_specs=pl.BlockSpec((tm, tn), lambda i, j: (i, j)),
        compiler_params=_cparams(("parallel", "parallel")),
    )(x, wa, wb, ba.reshape(1, N), bb.reshape(1, N),
      gamma.reshape(1, K), beta.reshape(1, K))


# ----------------------------- fused relative-position MHSA -----------------------------

def _rel_shift(p):
    """Transformer-XL relative shift of a (T, T) score matrix, fully in-register.

    Equivalent to: pad a zero column, view (T, T+1) as (T+1, T), drop the first row.
    Implemented with log2(T) constant lane rolls + iota masks (no HBM round trip)."""
    # TODO(synk): for long T replace the roll chain with a skewed-write VMEM scratch.
    T = p.shape[0]
    row = jax.lax.broadcasted_iota(jnp.int32, (T, T), 0)
    col = jax.lax.broadcasted_iota(jnp.int32, (T, T), 1)

    # L[i, j] = p[i, (j - i - 1) mod T]  (roll row i right by i+1)
    y = pltpu.roll(p, 1, axis=1)
    bit = 1
    while bit < T:
        y = jnp.where((row & bit) != 0, pltpu.roll(y, bit, axis=1), y)
        bit <<= 1
    upper = pltpu.roll(y, T - 1, axis=0)        # upper[i, j] = p[i+1, (j - i - 2) mod T]
    zero = jnp.zeros_like(p)
    return jnp.where(col <= row, y, zero) + jnp.where(col >= row + 2, upper, zero)


def _rel_mhsa_kernel(qkv_ref, pos_ref, u_ref, vb_ref, o_ref, *, H, dh, scale):
    D = H * dh
    qkv = qkv_ref[0]          # (T, 3D) bf16 — q | k | v sections, heads along lanes
    pos = pos_ref[...]        # (T, D)  bf16
    dims = (((1,), (1,)), ((), ()))   # contract the head dim of both operands
    outs = []
    # TODO(synk): flash-style KV tiling for very long T so the per-head (T, T) score
    # block stays bounded in VMEM (fine for typical speaker-classification lengths).
    for h in range(H):
        # fold the 1/sqrt(d_model) scale into q / u / vb: (T,dh) work instead of (T,T)
        q = qkv[:, h * dh:(h + 1) * dh].astype(jnp.float32) * scale
        k = qkv[:, D + h * dh:D + (h + 1) * dh]
        v = qkv[:, 2 * D + h * dh:2 * D + (h + 1) * dh]
        ph = pos[:, h * dh:(h + 1) * dh]
        u = u_ref[h:h + 1, :].astype(jnp.float32) * scale
        vb = vb_ref[h:h + 1, :].astype(jnp.float32) * scale

        content = jax.lax.dot_general((q + u).astype(jnp.bfloat16), k, dims,
                                      preferred_element_type=jnp.float32)
        pscore = jax.lax.dot_general((q + vb).astype(jnp.bfloat16), ph, dims,
                                     preferred_element_type=jnp.float32)
        s = content + _rel_shift(pscore)
        s = s - jnp.max(s, axis=-1, keepdims=True)
        e = jnp.exp(s)
        p = e * pl.reciprocal(jnp.sum(e, axis=-1, keepdims=True), approx=True)
        outs.append(jnp.dot(p.astype(jnp.bfloat16), v,
                            preferred_element_type=jnp.float32))
    # one lane-dense store of all heads in (T, D) layout (matches concat-heads ordering)
    o_ref[0] = jnp.concatenate(outs, axis=-1).astype(o_ref.dtype)


def rel_mhsa(qkv, pos, u, vb, *, nhead, scale):
    B, T, threeD = qkv.shape
    D = threeD // 3
    dh = D // nhead
    return pl.pallas_call(
        functools.partial(_rel_mhsa_kernel, H=nhead, dh=dh, scale=scale),
        out_shape=jax.ShapeDtypeStruct((B, T, D), jnp.bfloat16),
        grid=(B,),
        in_specs=[pl.BlockSpec((1, T, threeD), lambda b: (b, 0, 0)),
                  pl.BlockSpec((T, D), lambda b: (0, 0)),
                  pl.BlockSpec((nhead, dh), lambda b: (0, 0)),
                  pl.BlockSpec((nhead, dh), lambda b: (0, 0))],
        out_specs=pl.BlockSpec((1, T, D), lambda b: (b, 0, 0)),
        compiler_params=_cparams(("parallel",)),
    )(qkv, pos, u, vb)


# ----------------------------- depthwise conv + BN + Swish -----------------------------

def _dwconv_kernel(x_ref, w_ref, shift_ref, o_ref, halo_ref, *, K, pad):
    T = x_ref.shape[1]
    # zero-haloed scratch: 'same' zero padding done once, each tap is a plain slice + FMA
    halo_ref[...] = jnp.zeros_like(halo_ref)
    halo_ref[pl.ds(pad, T), :] = x_ref[0].astype(jnp.float32)
    acc = jnp.zeros((T, x_ref.shape[2]), jnp.float32)
    for k in range(K):                            # unrolled taps; BN scale pre-folded into w
        acc = acc + halo_ref[pl.ds(k, T), :] * w_ref[k:k + 1, :]
    y = acc + shift_ref[...]                      # folded BatchNorm1d (eval) shift
    o_ref[0] = (y * jax.nn.sigmoid(y)).astype(o_ref.dtype)   # Swish


def dwconv_bn_swish(x, w_scaled, bn_shift, *, tc_target=256):
    """x: (B, T, C) channels-last; w_scaled: (K, C) = conv taps * BN scale."""
    B, T, C = x.shape
    K = w_scaled.shape[0]
    pad = (K - 1) // 2
    tc = _pick_tile(C, 128, tc_target)            # channel tiling keeps taps vreg-resident
    return pl.pallas_call(
        functools.partial(_dwconv_kernel, K=K, pad=pad),
        out_shape=jax.ShapeDtypeStruct((B, T, C), jnp.bfloat16),
        grid=(B, C // tc),
        in_specs=[pl.BlockSpec((1, T, tc), lambda b, j: (b, 0, j)),
                  pl.BlockSpec((K, tc), lambda b, j: (0, j)),
                  pl.BlockSpec((1, tc), lambda b, j: (0, j))],
        out_specs=pl.BlockSpec((1, T, tc), lambda b, j: (b, 0, j)),
        scratch_shapes=[pltpu.VMEM((T + K - 1, tc), jnp.float32)],
        compiler_params=_cparams(("parallel", "parallel")),
    )(x, w_scaled, bn_shift.reshape(1, C))


# ----------------------------- final LN + mean-over-time pool -----------------------------

def _ln_mean_pool_kernel(x_ref, g_ref, b_ref, o_ref):
    x = x_ref[0].astype(jnp.float32)              # (T, D)
    mu = jnp.mean(x, axis=-1, keepdims=True)
    var = jnp.mean(jnp.square(x - mu), axis=-1, keepdims=True)
    y = (x - mu) * jax.lax.rsqrt(var + 1e-5) * g_ref[...] + b_ref[...]
    o_ref[0] = jnp.mean(y, axis=0, keepdims=True)


def ln_mean_pool(x, gamma, beta):
    B, T, D = x.shape
    out = pl.pallas_call(
        _ln_mean_pool_kernel,
        out_shape=jax.ShapeDtypeStruct((B, 1, D), jnp.float32),
        grid=(B,),
        in_specs=[pl.BlockSpec((1, T, D), lambda b: (b, 0, 0)),
                  pl.BlockSpec((1, D), lambda b: (0, 0)),
                  pl.BlockSpec((1, D), lambda b: (0, 0))],
        out_specs=pl.BlockSpec((1, 1, D), lambda b: (b, 0, 0)),
        compiler_params=_cparams(("parallel",)),
    )(x, gamma.reshape(1, D), beta.reshape(1, D))
    return out.reshape(B, D)


# ----------------------------- params / glue (plain JAX) -----------------------------

def sinusoid_pos_encoding(length, d_model):
    position = np.arange(length, dtype=np.float32)[:, None]
    div_term = np.exp(np.arange(0, d_model, 2, dtype=np.float32)
                      * -(math.log(10000.0) / d_model))
    pe = np.zeros((length, d_model), dtype=np.float32)
    pe[:, 0::2] = np.sin(position * div_term)
    pe[:, 1::2] = np.cos(position * div_term)
    return jnp.asarray(pe)


def init_params(key, d_model, nhead, n_spks, ff_expansion=4, conv_expansion=2,
                conv_kernel=31):
    dh = d_model // nhead
    kit = iter(jax.random.split(key, 48))

    def dense(in_dim, out_dim, bias=True):
        s = 1.0 / math.sqrt(in_dim)
        w = jax.random.uniform(next(kit), (in_dim, out_dim), jnp.float32, -s, s)
        b = (jax.random.uniform(next(kit), (out_dim,), jnp.float32, -s, s)
             if bias else jnp.zeros((out_dim,), jnp.float32))
        return w.astype(jnp.bfloat16), b        # weights stored in HBM as bf16

    def ln(dim):
        return jnp.ones((dim,), jnp.float32), jnp.zeros((dim,), jnp.float32)

    def ff_params():
        g, bt = ln(d_model)
        w1, b1 = dense(d_model, d_model * ff_expansion)
        w2, b2 = dense(d_model * ff_expansion, d_model)
        return dict(ln_g=g, ln_b=bt, w1=w1, b1=b1, w2=w2, b2=b2)

    params = {}
    params["prenet_w"], params["prenet_b"] = dense(40, d_model)
    params["ff1"] = ff_params()

    ag, ab = ln(d_model)
    wq, bq = dense(d_model, d_model)
    wk, bk = dense(d_model, d_model)
    wv, bv = dense(d_model, d_model)
    wpos, _ = dense(d_model, d_model, bias=False)
    wo, bo = dense(d_model, d_model)
    u = jax.random.normal(next(kit), (nhead, dh), jnp.float32) * 0.02
    vb = jax.random.normal(next(kit), (nhead, dh), jnp.float32) * 0.02
    params["attn"] = dict(ln_g=ag, ln_b=ab,
                          w_qkv=jnp.concatenate([wq, wk, wv], axis=1),  # fused QKV proj
                          b_qkv=jnp.concatenate([bq, bk, bv], axis=0),
                          wpos=wpos, wo=wo, bo=bo, u=u, vb=vb)

    cg, cb = ln(d_model)
    pw1_w, pw1_b = dense(d_model, d_model * conv_expansion)
    dw_w = jax.random.normal(next(kit), (conv_kernel, d_model), jnp.float32) \
        * (1.0 / math.sqrt(conv_kernel))
    pw2_w, pw2_b = dense(d_model, d_model)
    C = d_model
    params["conv"] = dict(ln_g=cg, ln_b=cb,
                          pw1_wa=pw1_w[:, :C], pw1_wb=pw1_w[:, C:],
                          pw1_ba=pw1_b[:C], pw1_bb=pw1_b[C:],
                          dw_w=dw_w,
                          bn_gamma=jnp.ones((C,), jnp.float32),
                          bn_beta=jnp.zeros((C,), jnp.float32),
                          bn_mean=jnp.zeros((C,), jnp.float32),
                          bn_var=jnp.ones((C,), jnp.float32),
                          pw2_w=pw2_w, pw2_b=pw2_b)

    params["ff2"] = ff_params()
    params["final_ln_g"], params["final_ln_b"] = ln(d_model)
    params["pred_w1"], params["pred_b1"] = dense(d_model, d_model)

    # classifier output padded to a 128-lane multiple at init time (hoisted out of forward)
    w2, b2 = dense(d_model, n_spks)
    n_pad = ((n_spks + 127) // 128) * 128
    params["pred_w2"] = jnp.pad(w2, ((0, 0), (0, n_pad - n_spks)))
    params["pred_b2"] = jnp.pad(b2, (0, n_pad - n_spks))
    return params


def classifier_forward(params, mels, *, nhead, n_spks):
    """mels: (B, T, 40) -> logits (B, n_spks). Inference mode (dropout = identity)."""
    B, T, F = mels.shape
    D = params["prenet_w"].shape[1]
    M = B * T

    # prenet
    x0 = linear(mels.reshape(M, F), params["prenet_w"], params["prenet_b"])

    # half-step feed-forward (LN + swish fused into 1st matmul, residual fused into 2nd)
    def half_ff(x, p):
        h = linear(x, p["w1"], p["b1"], ln=(p["ln_g"], p["ln_b"]), act="swish")
        return linear(h, p["w2"], p["b2"], residual=x, res_scale=0.5)

    x1 = half_ff(x0, params["ff1"])

    # multi-headed self-attention with relative positional encoding (transpose-free)
    pa = params["attn"]
    qkv = linear(x1, pa["w_qkv"], pa["b_qkv"], ln=(pa["ln_g"], pa["ln_b"]))   # (M, 3D) bf16
    pe = sinusoid_pos_encoding(T, D)
    pos = linear(pe, pa["wpos"], jnp.zeros((D,), jnp.float32))                # (T, D) bf16

    # NOTE: 1/sqrt(d_model) matches the sooftware Conformer RelativeMultiHeadAttention.
    ctx = rel_mhsa(qkv.reshape(B, T, 3 * D), pos, pa["u"], pa["vb"],
                   nhead=nhead, scale=1.0 / math.sqrt(D))
    x2 = linear(ctx.reshape(M, D), pa["wo"], pa["bo"], residual=x1)

    # convolution module (LN + pw1 + GLU fused; BN folded into depthwise taps)
    pc = params["conv"]
    h = pw1_glu(x2, pc["pw1_wa"], pc["pw1_wb"], pc["pw1_ba"], pc["pw1_bb"],
                pc["ln_g"], pc["ln_b"])
    bn_scale = pc["bn_gamma"] * jax.lax.rsqrt(pc["bn_var"] + 1e-5)
    dw_w = pc["dw_w"] * bn_scale[None, :]
    bn_shift = pc["bn_beta"] - pc["bn_mean"] * bn_scale
    h = dwconv_bn_swish(h.reshape(B, T, D), dw_w, bn_shift)
    x3 = linear(h.reshape(M, D), pc["pw2_w"], pc["pw2_b"], residual=x2)

    # second half-step feed-forward, then final LN fused with mean-over-time pooling
    x4 = half_ff(x3, params["ff2"])
    stats = ln_mean_pool(x4.reshape(B, T, D), params["final_ln_g"], params["final_ln_b"])

    # prediction head
    h = linear(stats, params["pred_w1"], params["pred_b1"], out_dtype=jnp.float32)
    h = jax.nn.gelu(h, approximate=False)   # exact erf GELU on tiny (B, D): kept as XLA glue
    logits = linear(h, params["pred_w2"], params["pred_b2"], out_dtype=jnp.float32)
    return logits[:, :n_spks]


if __name__ == "__main__":
    D_MODEL, NHEAD, N_SPKS = 32, 4, 24         # scaled-down (orig: 512, 16, 600)
    B, T, FEAT = 2, 8, 40                      # mels: (batch, length, 40)

    key = jax.random.PRNGKey(0)
    pkey, xkey = jax.random.split(key)
    params = init_params(pkey, d_model=D_MODEL, nhead=NHEAD, n_spks=N_SPKS)
    mels = jax.random.normal(xkey, (B, T, FEAT), jnp.float32)

    fwd = jax.jit(functools.partial(classifier_forward, nhead=NHEAD, n_spks=N_SPKS))
    out = fwd(params, mels)
    jax.block_until_ready(out)
    assert out.shape == (B, N_SPKS) and out.dtype == jnp.float32
    print("KERNEL_OK")
</pallas_src>

<mosaic_0001>
module attributes {stable_mosaic.version = 11 : i64} {
  func.func @_linear_kernel(%arg0: i32, %arg1: i32, %arg2: i32, %arg3: memref<8x40xf32, #tpu.memory_space<vmem>>, %arg4: memref<40x32xbf16, #tpu.memory_space<vmem>>, %arg5: memref<1x32xf32, #tpu.memory_space<vmem>>, %arg6: memref<8x32xbf16, #tpu.memory_space<vmem>>, %arg7: memref<8x32xf32, #tpu.memory_space<vmem>>) attributes {dimension_semantics = [#tpu.dimension_semantics<parallel>, #tpu.dimension_semantics<parallel>, #tpu.dimension_semantics<arbitrary>], iteration_bounds = array<i64: 2, 1, 1>, scalar_prefetch = 0 : i64, scratch_operands = 1 : i64, tpu.core_type = #tpu.core_type<tc>, window_params = [{transform_indices = @transform_0, window_bounds = array<i64: 8, 40>}, {transform_indices = @transform_1, window_bounds = array<i64: 40, 32>}, {transform_indices = @transform_2, window_bounds = array<i64: 1, 32>}, {transform_indices = @transform_3, window_bounds = array<i64: 8, 32>}]} {
    %c0_i32 = arith.constant 0 : i32
    %0 = arith.cmpi eq, %arg2, %c0_i32 : i32
    %1 = arith.extui %0 : i1 to i32
    %c0_i32_0 = arith.constant 0 : i32
    %2 = arith.cmpi ne, %1, %c0_i32_0 : i32
    scf.if %2 {
      %cst_10 = arith.constant 0.000000e+00 : f32
      %13 = vector.broadcast %cst_10 : f32 to vector<8x32xf32>
      %c0_11 = arith.constant 0 : index
      %c0_12 = arith.constant 0 : index
      %14 = vector.load %arg7[%c0_11, %c0_12] : memref<8x32xf32, #tpu.memory_space<vmem>>, vector<8x32xf32>
      tpu.vector_store %arg7[%c0_11, %c0_12], %13 {strides = array<i32>} : memref<8x32xf32, #tpu.memory_space<vmem>>, vector<8x32xf32>,
    } else {
    }
    %c0 = arith.constant 0 : index
    %c0_1 = arith.constant 0 : index
    %3 = vector.load %arg3[%c0, %c0_1] : memref<8x40xf32, #tpu.memory_space<vmem>>, vector<8x40xf32>
    %4 = arith.truncf %3 : vector<8x40xf32> to vector<8x40xbf16>
    %c0_2 = arith.constant 0 : index
    %c0_3 = arith.constant 0 : index
    %5 = vector.load %arg7[%c0_2, %c0_3] : memref<8x32xf32, #tpu.memory_space<vmem>>, vector<8x32xf32>
    %c0_4 = arith.constant 0 : index
    %c0_5 = arith.constant 0 : index
    %6 = vector.load %arg4[%c0_4, %c0_5] : memref<40x32xbf16, #tpu.memory_space<vmem>>, vector<40x32xbf16>
    %cst = arith.constant dense<0.000000e+00> : vector<8x32xf32>
    %7 = tpu.matmul %4, %6, %cst {dimension_numbers = #tpu.dot_dimension_numbers<[1], [0], [0], [1], [0, 0, 1, 1], [], []>} : vector<8x40xbf16>, vector<40x32xbf16>, vector<8x32xf32> -> vector<8x32xf32>
    %8 = arith.addf %5, %7 : vector<8x32xf32>
    %c0_6 = arith.constant 0 : index
    %c0_7 = arith.constant 0 : index
    %9 = vector.load %arg7[%c0_6, %c0_7] : memref<8x32xf32, #tpu.memory_space<vmem>>, vector<8x32xf32>
    tpu.vector_store %arg7[%c0_6, %c0_7], %8 {strides = array<i32>} : memref<8x32xf32, #tpu.memory_space<vmem>>, vector<8x32xf32>,
    %c0_i32_8 = arith.constant 0 : i32
    %10 = arith.cmpi eq, %arg2, %c0_i32_8 : i32
    %11 = arith.extui %10 : i1 to i32
    %c0_i32_9 = arith.constant 0 : i32
    %12 = arith.cmpi ne, %11, %c0_i32_9 : i32
    scf.if %12 {
      %c0_10 = arith.constant 0 : index
      %c0_11 = arith.constant 0 : index
      %13 = vector.load %arg7[%c0_10, %c0_11] : memref<8x32xf32, #tpu.memory_space<vmem>>, vector<8x32xf32>
      %c0_12 = arith.constant 0 : index
      %c0_13 = arith.constant 0 : index
      %14 = vector.load %arg5[%c0_12, %c0_13] : memref<1x32xf32, #tpu.memory_space<vmem>>, vector<1x32xf32>
      %15 = vector.broadcast %14 : vector<1x32xf32> to vector<8x32xf32>
      %16 = arith.addf %13, %15 : vector<8x32xf32>
      %17 = arith.truncf %16 : vector<8x32xf32> to vector<8x32xbf16>
      %c0_14 = arith.constant 0 : index
      %c0_15 = arith.constant 0 : index
      %18 = vector.load %arg6[%c0_14, %c0_15] : memref<8x32xbf16, #tpu.memory_space<vmem>>, vector<8x32xbf16>
      tpu.vector_store %arg6[%c0_14, %c0_15], %17 {strides = array<i32>} : memref<8x32xbf16, #tpu.memory_space<vmem>>, vector<8x32xbf16>,
    } else {
    }
    return
  }
  func.func @transform_0(%arg0: i32, %arg1: i32, %arg2: i32) -> (i32, i32) {
    %c0_i32 = arith.constant 0 : i32
    return %arg0, %arg2 : i32, i32
  }
  func.func @transform_1(%arg0: i32, %arg1: i32, %arg2: i32) -> (i32, i32) {
    %c0_i32 = arith.constant 0 : i32
    return %arg2, %arg1 : i32, i32
  }
  func.func @transform_2(%arg0: i32, %arg1: i32, %arg2: i32) -> (i32, i32) {
    %c0_i32 = arith.constant 0 : i32
    %c0_i32_0 = arith.constant 0 : i32
    return %c0_i32, %arg1 : i32, i32
  }
  func.func @transform_3(%arg0: i32, %arg1: i32, %arg2: i32) -> (i32, i32) {
    %c0_i32 = arith.constant 0 : i32
    return %arg0, %arg1 : i32, i32
  }
}

module attributes {stable_mosaic.version = 11 : i64} {
  func.func @_linear_kernel(%arg0: i32, %arg1: i32, %arg2: i32, %arg3: memref<8x32xbf16, #tpu.memory_space<vmem>>, %arg4: memref<32x128xbf16, #tpu.memory_space<vmem>>, %arg5: memref<1x128xf32, #tpu.memory_space<vmem>>, %arg6: memref<1x32xf32, #tpu.memory_space<vmem>>, %arg7: memref<1x32xf32, #tpu.memory_space<vmem>>, %arg8: memref<8x128xbf16, #tpu.memory_space<vmem>>, %arg9: memref<8x128xf32, #tpu.memory_space<vmem>>) attributes {dimension_semantics = [#tpu.dimension_semantics<parallel>, #tpu.dimension_semantics<parallel>, #tpu.dimension_semantics<arbitrary>], iteration_bounds = array<i64: 2, 1, 1>, scalar_prefetch = 0 : i64, scratch_operands = 1 : i64, tpu.core_type = #tpu.core_type<tc>, window_params = [{transform_indices = @transform_0, window_bounds = array<i64: 8, 32>}, {transform_indices = @transform_1, window_bounds = array<i64: 32, 128>}, {transform_indices = @transform_2, window_bounds = array<i64: 1, 128>}, {transform_indices = @transform_3, window_bounds = array<i64: 1, 32>}, {transform_indices = @transform_4, window_bounds = array<i64: 1, 32>}, {transform_indices = @transform_5, window_bounds = array<i64: 8, 128>}]} {
    %c0_i32 = arith.constant 0 : i32
    %0 = arith.cmpi eq, %arg2, %c0_i32 : i32
    %1 = arith.extui %0 : i1 to i32
    %c0_i32_0 = arith.constant 0 : i32
    %2 = arith.cmpi ne, %1, %c0_i32_0 : i32
    scf.if %2 {
      %cst_19 = arith.constant 0.000000e+00 : f32
      %38 = vector.broadcast %cst_19 : f32 to vector<8x128xf32>
      %c0_20 = arith.constant 0 : index
      %c0_21 = arith.constant 0 : index
      %39 = vector.load %arg9[%c0_20, %c0_21] : memref<8x128xf32, #tpu.memory_space<vmem>>, vector<8x128xf32>
      tpu.vector_store %arg9[%c0_20, %c0_21], %38 {strides = array<i32>} : memref<8x128xf32, #tpu.memory_space<vmem>>, vector<8x128xf32>,
    } else {
    }
    %c0 = arith.constant 0 : index
    %c0_1 = arith.constant 0 : index
    %3 = vector.load %arg3[%c0, %c0_1] : memref<8x32xbf16, #tpu.memory_space<vmem>>, vector<8x32xbf16>
    %4 = arith.extf %3 : vector<8x32xbf16> to vector<8x32xf32>
    %cst = arith.constant dense<0.000000e+00> : vector<8xf32>
    %5 = vector.multi_reduction <add>, %4, %cst [1] : vector<8x32xf32> to vector<8xf32>
    %6 = vector.shape_cast %5 : vector<8xf32> to vector<8x1xf32>
    %cst_2 = arith.constant 3.200000e+01 : f32
    %7 = vector.broadcast %cst_2 : f32 to vector<8x1xf32>
    %8 = arith.divf %6, %7 : vector<8x1xf32>
    %9 = vector.broadcast %8 : vector<8x1xf32> to vector<8x32xf32>
    %10 = arith.subf %4, %9 : vector<8x32xf32>
    %11 = arith.mulf %10, %10 : vector<8x32xf32>
    %cst_3 = arith.constant dense<0.000000e+00> : vector<8xf32>
    %12 = vector.multi_reduction <add>, %11, %cst_3 [1] : vector<8x32xf32> to vector<8xf32>
    %13 = vector.shape_cast %12 : vector<8xf32> to vector<8x1xf32>
    %cst_4 = arith.constant 3.200000e+01 : f32
    %14 = vector.broadcast %cst_4 : f32 to vector<8x1xf32>
    %15 = arith.divf %13, %14 : vector<8x1xf32>
    %16 = vector.broadcast %8 : vector<8x1xf32> to vector<8x32xf32>
    %17 = arith.subf %4, %16 : vector<8x32xf32>
    %cst_5 = arith.constant 9.99999974E-6 : f32
    %18 = vector.broadcast %cst_5 : f32 to vector<8x1xf32>
    %19 = arith.addf %15, %18 : vector<8x1xf32>
    %20 = math.rsqrt %19 : vector<8x1xf32>
    %21 = vector.broadcast %20 : vector<8x1xf32> to vector<8x32xf32>
    %22 = arith.mulf %17, %21 : vector<8x32xf32>
    %c0_6 = arith.constant 0 : index
    %c0_7 = arith.constant 0 : index
    %23 = vector.load %arg6[%c0_6, %c0_7] : memref<1x32xf32, #tpu.memory_space<vmem>>, vector<1x32xf32>
    %24 = vector.broadcast %23 : vector<1x32xf32> to vector<8x32xf32>
    %25 = arith.mulf %22, %24 : vector<8x32xf32>
    %c0_8 = arith.constant 0 : index
    %c0_9 = arith.constant 0 : index
    %26 = vector.load %arg7[%c0_8, %c0_9] : memref<1x32xf32, #tpu.memory_space<vmem>>, vector<1x32xf32>
    %27 = vector.broadcast %26 : vector<1x32xf32> to vector<8x32xf32>
    %28 = arith.addf %25, %27 : vector<8x32xf32>
    %29 = arith.truncf %28 : vector<8x32xf32> to vector<8x32xbf16>
    %c0_10 = arith.constant 0 : index
    %c0_11 = arith.constant 0 : index
    %30 = vector.load %arg9[%c0_10, %c0_11] : memref<8x128xf32, #tpu.memory_space<vmem>>, vector<8x128xf32>
    %c0_12 = arith.constant 0 : index
    %c0_13 = arith.constant 0 : index
    %31 = vector.load %arg4[%c0_12, %c0_13] : memref<32x128xbf16, #tpu.memory_space<vmem>>, vector<32x128xbf16>
    %cst_14 = arith.constant dense<0.000000e+00> : vector<8x128xf32>
    %32 = tpu.matmul %29, %31, %cst_14 {dimension_numbers = #tpu.dot_dimension_numbers<[1], [0], [0], [1], [0, 0, 1, 1], [], []>} : vector<8x32xbf16>, vector<32x128xbf16>, vector<8x128xf32> -> vector<8x128xf32>
    %33 = arith.addf %30, %32 : vector<8x128xf32>
    %c0_15 = arith.constant 0 : index
    %c0_16 = arith.constant 0 : index
    %34 = vector.load %arg9[%c0_15, %c0_16] : memref<8x128xf32, #tpu.memory_space<vmem>>, vector<8x128xf32>
    tpu.vector_store %arg9[%c0_15, %c0_16], %33 {strides = array<i32>} : memref<8x128xf32, #tpu.memory_space<vmem>>, vector<8x128xf32>,
    %c0_i32_17 = arith.constant 0 : i32
    %35 = arith.cmpi eq, %arg2, %c0_i32_17 : i32
    %36 = arith.extui %35 : i1 to i32
    %c0_i32_18 = arith.constant 0 : i32
    %37 = arith.cmpi ne, %36, %c0_i32_18 : i32
    scf.if %37 {
      %c0_19 = arith.constant 0 : index
      %c0_20 = arith.constant 0 : index
      %38 = vector.load %arg9[%c0_19, %c0_20] : memref<8x128xf32, #tpu.memory_space<vmem>>, vector<8x128xf32>
      %c0_21 = arith.constant 0 : index
      %c0_22 = arith.constant 0 : index
      %39 = vector.load %arg5[%c0_21, %c0_22] : memref<1x128xf32, #tpu.memory_space<vmem>>, vector<1x128xf32>
      %40 = vector.broadcast %39 : vector<1x128xf32> to vector<8x128xf32>
      %41 = arith.addf %38, %40 : vector<8x128xf32>
      %42 = arith.negf %41 : vector<8x128xf32>
      %43 = math.exp %42 : vector<8x128xf32>
      %cst_23 = arith.constant 1.000000e+00 : f32
      %44 = vector.broadcast %cst_23 : f32 to vector<8x128xf32>
      %45 = arith.addf %44, %43 : vector<8x128xf32>
      %46 = arith.divf %44, %45 : vector<8x128xf32>
      %47 = arith.mulf %41, %46 : vector<8x128xf32>
      %48 = arith.truncf %47 : vector<8x128xf32> to vector<8x128xbf16>
      %c0_24 = arith.constant 0 : index
      %c0_25 = arith.constant 0 : index
      %49 = vector.load %arg8[%c0_24, %c0_25] : memref<8x128xbf16, #tpu.memory_space<vmem>>, vector<8x128xbf16>
      tpu.vector_store %arg8[%c0_24, %c0_25], %48 {strides = array<i32>} : memref<8x128xbf16, #tpu.memory_space<vmem>>, vector<8x128xbf16>,
    } else {
    }
    return
  }
  func.func @transform_0(%arg0: i32, %arg1: i32, %arg2: i32) -> (i32, i32) {
    %c0_i32 = arith.constant 0 : i32
    return %arg0, %arg2 : i32, i32
  }
  func.func @transform_1(%arg0: i32, %arg1: i32, %arg2: i32) -> (i32, i32) {
    %c0_i32 = arith.constant 0 : i32
    return %arg2, %arg1 : i32, i32
  }
  func.func @transform_2(%arg0: i32, %arg1: i32, %arg2: i32) -> (i32, i32) {
    %c0_i32 = arith.constant 0 : i32
    %c0_i32_0 = arith.constant 0 : i32
    return %c0_i32, %arg1 : i32, i32
  }
  func.func @transform_3(%arg0: i32, %arg1: i32, %arg2: i32) -> (i32, i32) {
    %c0_i32 = arith.constant 0 : i32
    %c0_i32_0 = arith.constant 0 : i32
    return %c0_i32, %arg2 : i32, i32
  }
  func.func @transform_4(%arg0: i32, %arg1: i32, %arg2: i32) -> (i32, i32) {
    %c0_i32 = arith.constant 0 : i32
    %c0_i32_0 = arith.constant 0 : i32
    return %c0_i32, %arg2 : i32, i32
  }
  func.func @transform_5(%arg0: i32, %arg1: i32, %arg2: i32) -> (i32, i32) {
    %c0_i32 = arith.constant 0 : i32
    return %arg0, %arg1 : i32, i32
  }
}

module attributes {stable_mosaic.version = 11 : i64} {
  func.func @_linear_kernel(%arg0: i32, %arg1: i32, %arg2: i32, %arg3: memref<8x128xbf16, #tpu.memory_space<vmem>>, %arg4: memref<128x32xbf16, #tpu.memory_space<vmem>>, %arg5: memref<1x32xf32, #tpu.memory_space<vmem>>, %arg6: memref<8x32xbf16, #tpu.memory_space<vmem>>, %arg7: memref<8x32xbf16, #tpu.memory_space<vmem>>, %arg8: memref<8x32xf32, #tpu.memory_space<vmem>>) attributes {dimension_semantics = [#tpu.dimension_semantics<parallel>, #tpu.dimension_semantics<parallel>, #tpu.dimension_semantics<arbitrary>], iteration_bounds = array<i64: 2, 1, 1>, scalar_prefetch = 0 : i64, scratch_operands = 1 : i64, tpu.core_type = #tpu.core_type<tc>, window_params = [{transform_indices = @transform_0, window_bounds = array<i64: 8, 128>}, {transform_indices = @transform_1, window_bounds = array<i64: 128, 32>}, {transform_indices = @transform_2, window_bounds = array<i64: 1, 32>}, {transform_indices = @transform_3, window_bounds = array<i64: 8, 32>}, {transform_indices = @transform_4, window_bounds = array<i64: 8, 32>}]} {
    %c0_i32 = arith.constant 0 : i32
    %0 = arith.cmpi eq, %arg2, %c0_i32 : i32
    %1 = arith.extui %0 : i1 to i32
    %c0_i32_0 = arith.constant 0 : i32
    %2 = arith.cmpi ne, %1, %c0_i32_0 : i32
    scf.if %2 {
      %cst_10 = arith.constant 0.000000e+00 : f32
      %12 = vector.broadcast %cst_10 : f32 to vector<8x32xf32>
      %c0_11 = arith.constant 0 : index
      %c0_12 = arith.constant 0 : index
      %13 = vector.load %arg8[%c0_11, %c0_12] : memref<8x32xf32, #tpu.memory_space<vmem>>, vector<8x32xf32>
      tpu.vector_store %arg8[%c0_11, %c0_12], %12 {strides = array<i32>} : memref<8x32xf32, #tpu.memory_space<vmem>>, vector<8x32xf32>,
    } else {
    }
    %c0 = arith.constant 0 : index
    %c0_1 = arith.constant 0 : index
    %3 = vector.load %arg3[%c0, %c0_1] : memref<8x128xbf16, #tpu.memory_space<vmem>>, vector<8x128xbf16>
    %c0_2 = arith.constant 0 : index
    %c0_3 = arith.constant 0 : index
    %4 = vector.load %arg8[%c0_2, %c0_3] : memref<8x32xf32, #tpu.memory_space<vmem>>, vector<8x32xf32>
    %c0_4 = arith.constant 0 : index
    %c0_5 = arith.constant 0 : index
    %5 = vector.load %arg4[%c0_4, %c0_5] : memref<128x32xbf16, #tpu.memory_space<vmem>>, vector<128x32xbf16>
    %cst = arith.constant dense<0.000000e+00> : vector<8x32xf32>
    %6 = tpu.matmul %3, %5, %cst {dimension_numbers = #tpu.dot_dimension_numbers<[1], [0], [0], [1], [0, 0, 1, 1], [], []>} : vector<8x128xbf16>, vector<128x32xbf16>, vector<8x32xf32> -> vector<8x32xf32>
    %7 = arith.addf %4, %6 : vector<8x32xf32>
    %c0_6 = arith.constant 0 : index
    %c0_7 = arith.constant 0 : index
    %8 = vector.load %arg8[%c0_6, %c0_7] : memref<8x32xf32, #tpu.memory_space<vmem>>, vector<8x32xf32>
    tpu.vector_store %arg8[%c0_6, %c0_7], %7 {strides = array<i32>} : memref<8x32xf32, #tpu.memory_space<vmem>>, vector<8x32xf32>,
    %c0_i32_8 = arith.constant 0 : i32
    %9 = arith.cmpi eq, %arg2, %c0_i32_8 : i32
    %10 = arith.extui %9 : i1 to i32
    %c0_i32_9 = arith.constant 0 : i32
    %11 = arith.cmpi ne, %10, %c0_i32_9 : i32
    scf.if %11 {
      %c0_10 = arith.constant 0 : index
      %c0_11 = arith.constant 0 : index
      %12 = vector.load %arg8[%c0_10, %c0_11] : memref<8x32xf32, #tpu.memory_space<vmem>>, vector<8x32xf32>
      %c0_12 = arith.constant 0 : index
      %c0_13 = arith.constant 0 : index
      %13 = vector.load %arg5[%c0_12, %c0_13] : memref<1x32xf32, #tpu.memory_space<vmem>>, vector<1x32xf32>
      %14 = vector.broadcast %13 : vector<1x32xf32> to vector<8x32xf32>
      %15 = arith.addf %12, %14 : vector<8x32xf32>
      %c0_14 = arith.constant 0 : index
      %c0_15 = arith.constant 0 : index
      %16 = vector.load %arg6[%c0_14, %c0_15] : memref<8x32xbf16, #tpu.memory_space<vmem>>, vector<8x32xbf16>
      %17 = arith.extf %16 : vector<8x32xbf16> to vector<8x32xf32>
      %cst_16 = arith.constant 5.000000e-01 : f32
      %18 = vector.broadcast %cst_16 : f32 to vector<8x32xf32>
      %19 = arith.mulf %18, %15 : vector<8x32xf32>
      %20 = arith.addf %17, %19 : vector<8x32xf32>
      %21 = arith.truncf %20 : vector<8x32xf32> to vector<8x32xbf16>
      %c0_17 = arith.constant 0 : index
      %c0_18 = arith.constant 0 : index
      %22 = vector.load %arg7[%c0_17, %c0_18] : memref<8x32xbf16, #tpu.memory_space<vmem>>, vector<8x32xbf16>
      tpu.vector_store %arg7[%c0_17, %c0_18], %21 {strides = array<i32>} : memref<8x32xbf16, #tpu.memory_space<vmem>>, vector<8x32xbf16>,
    } else {
    }
    return
  }
  func.func @transform_0(%arg0: i32, %arg1: i32, %arg2: i32) -> (i32, i32) {
    %c0_i32 = arith.constant 0 : i32
    return %arg0, %arg2 : i32, i32
  }
  func.func @transform_1(%arg0: i32, %arg1: i32, %arg2: i32) -> (i32, i32) {
    %c0_i32 = arith.constant 0 : i32
    return %arg2, %arg1 : i32, i32
  }
  func.func @transform_2(%arg0: i32, %arg1: i32, %arg2: i32) -> (i32, i32) {
    %c0_i32 = arith.constant 0 : i32
    %c0_i32_0 = arith.constant 0 : i32
    return %c0_i32, %arg1 : i32, i32
  }
  func.func @transform_3(%arg0: i32, %arg1: i32, %arg2: i32) -> (i32, i32) {
    %c0_i32 = arith.constant 0 : i32
    return %arg0, %arg1 : i32, i32
  }
  func.func @transform_4(%arg0: i32, %arg1: i32, %arg2: i32) -> (i32, i32) {
    %c0_i32 = arith.constant 0 : i32
    return %arg0, %arg1 : i32, i32
  }
}

module attributes {stable_mosaic.version = 11 : i64} {
  func.func @_linear_kernel(%arg0: i32, %arg1: i32, %arg2: i32, %arg3: memref<8x32xbf16, #tpu.memory_space<vmem>>, %arg4: memref<32x96xbf16, #tpu.memory_space<vmem>>, %arg5: memref<1x96xf32, #tpu.memory_space<vmem>>, %arg6: memref<1x32xf32, #tpu.memory_space<vmem>>, %arg7: memref<1x32xf32, #tpu.memory_space<vmem>>, %arg8: memref<8x96xbf16, #tpu.memory_space<vmem>>, %arg9: memref<8x96xf32, #tpu.memory_space<vmem>>) attributes {dimension_semantics = [#tpu.dimension_semantics<parallel>, #tpu.dimension_semantics<parallel>, #tpu.dimension_semantics<arbitrary>], iteration_bounds = array<i64: 2, 1, 1>, scalar_prefetch = 0 : i64, scratch_operands = 1 : i64, tpu.core_type = #tpu.core_type<tc>, window_params = [{transform_indices = @transform_0, window_bounds = array<i64: 8, 32>}, {transform_indices = @transform_1, window_bounds = array<i64: 32, 96>}, {transform_indices = @transform_2, window_bounds = array<i64: 1, 96>}, {transform_indices = @transform_3, window_bounds = array<i64: 1, 32>}, {transform_indices = @transform_4, window_bounds = array<i64: 1, 32>}, {transform_indices = @transform_5, window_bounds = array<i64: 8, 96>}]} {
    %c0_i32 = arith.constant 0 : i32
    %0 = arith.cmpi eq, %arg2, %c0_i32 : i32
    %1 = arith.extui %0 : i1 to i32
    %c0_i32_0 = arith.constant 0 : i32
    %2 = arith.cmpi ne, %1, %c0_i32_0 : i32
    scf.if %2 {
      %cst_19 = arith.constant 0.000000e+00 : f32
      %38 = vector.broadcast %cst_19 : f32 to vector<8x96xf32>
      %c0_20 = arith.constant 0 : index
      %c0_21 = arith.constant 0 : index
      %39 = vector.load %arg9[%c0_20, %c0_21] : memref<8x96xf32, #tpu.memory_space<vmem>>, vector<8x96xf32>
      tpu.vector_store %arg9[%c0_20, %c0_21], %38 {strides = array<i32>} : memref<8x96xf32, #tpu.memory_space<vmem>>, vector<8x96xf32>,
    } else {
    }
    %c0 = arith.constant 0 : index
    %c0_1 = arith.constant 0 : index
    %3 = vector.load %arg3[%c0, %c0_1] : memref<8x32xbf16, #tpu.memory_space<vmem>>, vector<8x32xbf16>
    %4 = arith.extf %3 : vector<8x32xbf16> to vector<8x32xf32>
    %cst = arith.constant dense<0.000000e+00> : vector<8xf32>
    %5 = vector.multi_reduction <add>, %4, %cst [1] : vector<8x32xf32> to vector<8xf32>
    %6 = vector.shape_cast %5 : vector<8xf32> to vector<8x1xf32>
    %cst_2 = arith.constant 3.200000e+01 : f32
    %7 = vector.broadcast %cst_2 : f32 to vector<8x1xf32>
    %8 = arith.divf %6, %7 : vector<8x1xf32>
    %9 = vector.broadcast %8 : vector<8x1xf32> to vector<8x32xf32>
    %10 = arith.subf %4, %9 : vector<8x32xf32>
    %11 = arith.mulf %10, %10 : vector<8x32xf32>
    %cst_3 = arith.constant dense<0.000000e+00> : vector<8xf32>
    %12 = vector.multi_reduction <add>, %11, %cst_3 [1] : vector<8x32xf32> to vector<8xf32>
    %13 = vector.shape_cast %12 : vector<8xf32> to vector<8x1xf32>
    %cst_4 = arith.constant 3.200000e+01 : f32
    %14 = vector.broadcast %cst_4 : f32 to vector<8x1xf32>
    %15 = arith.divf %13, %14 : vector<8x1xf32>
    %16 = vector.broadcast %8 : vector<8x1xf32> to vector<8x32xf32>
    %17 = arith.subf %4, %16 : vector<8x32xf32>
    %cst_5 = arith.constant 9.99999974E-6 : f32
    %18 = vector.broadcast %cst_5 : f32 to vector<8x1xf32>
    %19 = arith.addf %15, %18 : vector<8x1xf32>
    %20 = math.rsqrt %19 : vector<8x1xf32>
    %21 = vector.broadcast %20 : vector<8x1xf32> to vector<8x32xf32>
    %22 = arith.mulf %17, %21 : vector<8x32xf32>
    %c0_6 = arith.constant 0 : index
    %c0_7 = arith.constant 0 : index
    %23 = vector.load %arg6[%c0_6, %c0_7] : memref<1x32xf32, #tpu.memory_space<vmem>>, vector<1x32xf32>
    %24 = vector.broadcast %23 : vector<1x32xf32> to vector<8x32xf32>
    %25 = arith.mulf %22, %24 : vector<8x32xf32>
    %c0_8 = arith.constant 0 : index
    %c0_9 = arith.constant 0 : index
    %26 = vector.load %arg7[%c0_8, %c0_9] : memref<1x32xf32, #tpu.memory_space<vmem>>, vector<1x32xf32>
    %27 = vector.broadcast %26 : vector<1x32xf32> to vector<8x32xf32>
    %28 = arith.addf %25, %27 : vector<8x32xf32>
    %29 = arith.truncf %28 : vector<8x32xf32> to vector<8x32xbf16>
    %c0_10 = arith.constant 0 : index
    %c0_11 = arith.constant 0 : index
    %30 = vector.load %arg9[%c0_10, %c0_11] : memref<8x96xf32, #tpu.memory_space<vmem>>, vector<8x96xf32>
    %c0_12 = arith.constant 0 : index
    %c0_13 = arith.constant 0 : index
    %31 = vector.load %arg4[%c0_12, %c0_13] : memref<32x96xbf16, #tpu.memory_space<vmem>>, vector<32x96xbf16>
    %cst_14 = arith.constant dense<0.000000e+00> : vector<8x96xf32>
    %32 = tpu.matmul %29, %31, %cst_14 {dimension_numbers = #tpu.dot_dimension_numbers<[1], [0], [0], [1], [0, 0, 1, 1], [], []>} : vector<8x32xbf16>, vector<32x96xbf16>, vector<8x96xf32> -> vector<8x96xf32>
    %33 = arith.addf %30, %32 : vector<8x96xf32>
    %c0_15 = arith.constant 0 : index
    %c0_16 = arith.constant 0 : index
    %34 = vector.load %arg9[%c0_15, %c0_16] : memref<8x96xf32, #tpu.memory_space<vmem>>, vector<8x96xf32>
    tpu.vector_store %arg9[%c0_15, %c0_16], %33 {strides = array<i32>} : memref<8x96xf32, #tpu.memory_space<vmem>>, vector<8x96xf32>,
    %c0_i32_17 = arith.constant 0 : i32
    %35 = arith.cmpi eq, %arg2, %c0_i32_17 : i32
    %36 = arith.extui %35 : i1 to i32
    %c0_i32_18 = arith.constant 0 : i32
    %37 = arith.cmpi ne, %36, %c0_i32_18 : i32
    scf.if %37 {
      %c0_19 = arith.constant 0 : index
      %c0_20 = arith.constant 0 : index
      %38 = vector.load %arg9[%c0_19, %c0_20] : memref<8x96xf32, #tpu.memory_space<vmem>>, vector<8x96xf32>
      %c0_21 = arith.constant 0 : index
      %c0_22 = arith.constant 0 : index
      %39 = vector.load %arg5[%c0_21, %c0_22] : memref<1x96xf32, #tpu.memory_space<vmem>>, vector<1x96xf32>
      %40 = vector.broadcast %39 : vector<1x96xf32> to vector<8x96xf32>
      %41 = arith.addf %38, %40 : vector<8x96xf32>
      %42 = arith.truncf %41 : vector<8x96xf32> to vector<8x96xbf16>
      %c0_23 = arith.constant 0 : index
      %c0_24 = arith.constant 0 : index
      %43 = vector.load %arg8[%c0_23, %c0_24] : memref<8x96xbf16, #tpu.memory_space<vmem>>, vector<8x96xbf16>
      tpu.vector_store %arg8[%c0_23, %c0_24], %42 {strides = array<i32>} : memref<8x96xbf16, #tpu.memory_space<vmem>>, vector<8x96xbf16>,
    } else {
    }
    return
  }
  func.func @transform_0(%arg0: i32, %arg1: i32, %arg2: i32) -> (i32, i32) {
    %c0_i32 = arith.constant 0 : i32
    return %arg0, %arg2 : i32, i32
  }
  func.func @transform_1(%arg0: i32, %arg1: i32, %arg2: i32) -> (i32, i32) {
    %c0_i32 = arith.constant 0 : i32
    return %arg2, %arg1 : i32, i32
  }
  func.func @transform_2(%arg0: i32, %arg1: i32, %arg2: i32) -> (i32, i32) {
    %c0_i32 = arith.constant 0 : i32
    %c0_i32_0 = arith.constant 0 : i32
    return %c0_i32, %arg1 : i32, i32
  }
  func.func @transform_3(%arg0: i32, %arg1: i32, %arg2: i32) -> (i32, i32) {
    %c0_i32 = arith.constant 0 : i32
    %c0_i32_0 = arith.constant 0 : i32
    return %c0_i32, %arg2 : i32, i32
  }
  func.func @transform_4(%arg0: i32, %arg1: i32, %arg2: i32) -> (i32, i32) {
    %c0_i32 = arith.constant 0 : i32
    %c0_i32_0 = arith.constant 0 : i32
    return %c0_i32, %arg2 : i32, i32
  }
  func.func @transform_5(%arg0: i32, %arg1: i32, %arg2: i32) -> (i32, i32) {
    %c0_i32 = arith.constant 0 : i32
    return %arg0, %arg1 : i32, i32
  }
}

module attributes {stable_mosaic.version = 11 : i64} {
  func.func @_linear_kernel(%arg0: i32, %arg1: i32, %arg2: i32, %arg3: memref<8x32xf32, #tpu.memory_space<vmem>>, %arg4: memref<32x32xbf16, #tpu.memory_space<vmem>>, %arg5: memref<1x32xf32, #tpu.memory_space<vmem>>, %arg6: memref<8x32xbf16, #tpu.memory_space<vmem>>, %arg7: memref<8x32xf32, #tpu.memory_space<vmem>>) attributes {dimension_semantics = [#tpu.dimension_semantics<parallel>, #tpu.dimension_semantics<parallel>, #tpu.dimension_semantics<arbitrary>], iteration_bounds = array<i64: 1, 1, 1>, scalar_prefetch = 0 : i64, scratch_operands = 1 : i64, tpu.core_type = #tpu.core_type<tc>, window_params = [{transform_indices = @transform_0, window_bounds = array<i64: 8, 32>}, {transform_indices = @transform_1, window_bounds = array<i64: 32, 32>}, {transform_indices = @transform_2, window_bounds = array<i64: 1, 32>}, {transform_indices = @transform_3, window_bounds = array<i64: 8, 32>}]} {
    %c0_i32 = arith.constant 0 : i32
    %0 = arith.cmpi eq, %arg2, %c0_i32 : i32
    %1 = arith.extui %0 : i1 to i32
    %c0_i32_0 = arith.constant 0 : i32
    %2 = arith.cmpi ne, %1, %c0_i32_0 : i32
    scf.if %2 {
      %cst_10 = arith.constant 0.000000e+00 : f32
      %13 = vector.broadcast %cst_10 : f32 to vector<8x32xf32>
      %c0_11 = arith.constant 0 : index
      %c0_12 = arith.constant 0 : index
      %14 = vector.load %arg7[%c0_11, %c0_12] : memref<8x32xf32, #tpu.memory_space<vmem>>, vector<8x32xf32>
      tpu.vector_store %arg7[%c0_11, %c0_12], %13 {strides = array<i32>} : memref<8x32xf32, #tpu.memory_space<vmem>>, vector<8x32xf32>,
    } else {
    }
    %c0 = arith.constant 0 : index
    %c0_1 = arith.constant 0 : index
    %3 = vector.load %arg3[%c0, %c0_1] : memref<8x32xf32, #tpu.memory_space<vmem>>, vector<8x32xf32>
    %4 = arith.truncf %3 : vector<8x32xf32> to vector<8x32xbf16>
    %c0_2 = arith.constant 0 : index
    %c0_3 = arith.constant 0 : index
    %5 = vector.load %arg7[%c0_2, %c0_3] : memref<8x32xf32, #tpu.memory_space<vmem>>, vector<8x32xf32>
    %c0_4 = arith.constant 0 : index
    %c0_5 = arith.constant 0 : index
    %6 = vector.load %arg4[%c0_4, %c0_5] : memref<32x32xbf16, #tpu.memory_space<vmem>>, vector<32x32xbf16>
    %cst = arith.constant dense<0.000000e+00> : vector<8x32xf32>
    %7 = tpu.matmul %4, %6, %cst {dimension_numbers = #tpu.dot_dimension_numbers<[1], [0], [0], [1], [0, 0, 1, 1], [], []>} : vector<8x32xbf16>, vector<32x32xbf16>, vector<8x32xf32> -> vector<8x32xf32>
    %8 = arith.addf %5, %7 : vector<8x32xf32>
    %c0_6 = arith.constant 0 : index
    %c0_7 = arith.constant 0 : index
    %9 = vector.load %arg7[%c0_6, %c0_7] : memref<8x32xf32, #tpu.memory_space<vmem>>, vector<8x32xf32>
    tpu.vector_store %arg7[%c0_6, %c0_7], %8 {strides = array<i32>} : memref<8x32xf32, #tpu.memory_space<vmem>>, vector<8x32xf32>,
    %c0_i32_8 = arith.constant 0 : i32
    %10 = arith.cmpi eq, %arg2, %c0_i32_8 : i32
    %11 = arith.extui %10 : i1 to i32
    %c0_i32_9 = arith.constant 0 : i32
    %12 = arith.cmpi ne, %11, %c0_i32_9 : i32
    scf.if %12 {
      %c0_10 = arith.constant 0 : index
      %c0_11 = arith.constant 0 : index
      %13 = vector.load %arg7[%c0_10, %c0_11] : memref<8x32xf32, #tpu.memory_space<vmem>>, vector<8x32xf32>
      %c0_12 = arith.constant 0 : index
      %c0_13 = arith.constant 0 : index
      %14 = vector.load %arg5[%c0_12, %c0_13] : memref<1x32xf32, #tpu.memory_space<vmem>>, vector<1x32xf32>
      %15 = vector.broadcast %14 : vector<1x32xf32> to vector<8x32xf32>
      %16 = arith.addf %13, %15 : vector<8x32xf32>
      %17 = arith.truncf %16 : vector<8x32xf32> to vector<8x32xbf16>
      %c0_14 = arith.constant 0 : index
      %c0_15 = arith.constant 0 : index
      %18 = vector.load %arg6[%c0_14, %c0_15] : memref<8x32xbf16, #tpu.memory_space<vmem>>, vector<8x32xbf16>
      tpu.vector_store %arg6[%c0_14, %c0_15], %17 {strides = array<i32>} : memref<8x32xbf16, #tpu.memory_space<vmem>>, vector<8x32xbf16>,
    } else {
    }
    return
  }
  func.func @transform_0(%arg0: i32, %arg1: i32, %arg2: i32) -> (i32, i32) {
    %c0_i32 = arith.constant 0 : i32
    return %arg0, %arg2 : i32, i32
  }
  func.func @transform_1(%arg0: i32, %arg1: i32, %arg2: i32) -> (i32, i32) {
    %c0_i32 = arith.constant 0 : i32
    return %arg2, %arg1 : i32, i32
  }
  func.func @transform_2(%arg0: i32, %arg1: i32, %arg2: i32) -> (i32, i32) {
    %c0_i32 = arith.constant 0 : i32
    %c0_i32_0 = arith.constant 0 : i32
    return %c0_i32, %arg1 : i32, i32
  }
  func.func @transform_3(%arg0: i32, %arg1: i32, %arg2: i32) -> (i32, i32) {
    %c0_i32 = arith.constant 0 : i32
    return %arg0, %arg1 : i32, i32
  }
}

module attributes {stable_mosaic.version = 11 : i64} {
  func.func @_linear_kernel(%arg0: i32, %arg1: i32, %arg2: i32, %arg3: memref<8x32xbf16, #tpu.memory_space<vmem>>, %arg4: memref<32x32xbf16, #tpu.memory_space<vmem>>, %arg5: memref<1x32xf32, #tpu.memory_space<vmem>>, %arg6: memref<8x32xbf16, #tpu.memory_space<vmem>>, %arg7: memref<8x32xbf16, #tpu.memory_space<vmem>>, %arg8: memref<8x32xf32, #tpu.memory_space<vmem>>) attributes {dimension_semantics = [#tpu.dimension_semantics<parallel>, #tpu.dimension_semantics<parallel>, #tpu.dimension_semantics<arbitrary>], iteration_bounds = array<i64: 2, 1, 1>, scalar_prefetch = 0 : i64, scratch_operands = 1 : i64, tpu.core_type = #tpu.core_type<tc>, window_params = [{transform_indices = @transform_0, window_bounds = array<i64: 8, 32>}, {transform_indices = @transform_1, window_bounds = array<i64: 32, 32>}, {transform_indices = @transform_2, window_bounds = array<i64: 1, 32>}, {transform_indices = @transform_3, window_bounds = array<i64: 8, 32>}, {transform_indices = @transform_4, window_bounds = array<i64: 8, 32>}]} {
    %c0_i32 = arith.constant 0 : i32
    %0 = arith.cmpi eq, %arg2, %c0_i32 : i32
    %1 = arith.extui %0 : i1 to i32
    %c0_i32_0 = arith.constant 0 : i32
    %2 = arith.cmpi ne, %1, %c0_i32_0 : i32
    scf.if %2 {
      %cst_10 = arith.constant 0.000000e+00 : f32
      %12 = vector.broadcast %cst_10 : f32 to vector<8x32xf32>
      %c0_11 = arith.constant 0 : index
      %c0_12 = arith.constant 0 : index
      %13 = vector.load %arg8[%c0_11, %c0_12] : memref<8x32xf32, #tpu.memory_space<vmem>>, vector<8x32xf32>
      tpu.vector_store %arg8[%c0_11, %c0_12], %12 {strides = array<i32>} : memref<8x32xf32, #tpu.memory_space<vmem>>, vector<8x32xf32>,
    } else {
    }
    %c0 = arith.constant 0 : index
    %c0_1 = arith.constant 0 : index
    %3 = vector.load %arg3[%c0, %c0_1] : memref<8x32xbf16, #tpu.memory_space<vmem>>, vector<8x32xbf16>
    %c0_2 = arith.constant 0 : index
    %c0_3 = arith.constant 0 : index
    %4 = vector.load %arg8[%c0_2, %c0_3] : memref<8x32xf32, #tpu.memory_space<vmem>>, vector<8x32xf32>
    %c0_4 = arith.constant 0 : index
    %c0_5 = arith.constant 0 : index
    %5 = vector.load %arg4[%c0_4, %c0_5] : memref<32x32xbf16, #tpu.memory_space<vmem>>, vector<32x32xbf16>
    %cst = arith.constant dense<0.000000e+00> : vector<8x32xf32>
    %6 = tpu.matmul %3, %5, %cst {dimension_numbers = #tpu.dot_dimension_numbers<[1], [0], [0], [1], [0, 0, 1, 1], [], []>} : vector<8x32xbf16>, vector<32x32xbf16>, vector<8x32xf32> -> vector<8x32xf32>
    %7 = arith.addf %4, %6 : vector<8x32xf32>
    %c0_6 = arith.constant 0 : index
    %c0_7 = arith.constant 0 : index
    %8 = vector.load %arg8[%c0_6, %c0_7] : memref<8x32xf32, #tpu.memory_space<vmem>>, vector<8x32xf32>
    tpu.vector_store %arg8[%c0_6, %c0_7], %7 {strides = array<i32>} : memref<8x32xf32, #tpu.memory_space<vmem>>, vector<8x32xf32>,
    %c0_i32_8 = arith.constant 0 : i32
    %9 = arith.cmpi eq, %arg2, %c0_i32_8 : i32
    %10 = arith.extui %9 : i1 to i32
    %c0_i32_9 = arith.constant 0 : i32
    %11 = arith.cmpi ne, %10, %c0_i32_9 : i32
    scf.if %11 {
      %c0_10 = arith.constant 0 : index
      %c0_11 = arith.constant 0 : index
      %12 = vector.load %arg8[%c0_10, %c0_11] : memref<8x32xf32, #tpu.memory_space<vmem>>, vector<8x32xf32>
      %c0_12 = arith.constant 0 : index
      %c0_13 = arith.constant 0 : index
      %13 = vector.load %arg5[%c0_12, %c0_13] : memref<1x32xf32, #tpu.memory_space<vmem>>, vector<1x32xf32>
      %14 = vector.broadcast %13 : vector<1x32xf32> to vector<8x32xf32>
      %15 = arith.addf %12, %14 : vector<8x32xf32>
      %c0_14 = arith.constant 0 : index
      %c0_15 = arith.constant 0 : index
      %16 = vector.load %arg6[%c0_14, %c0_15] : memref<8x32xbf16, #tpu.memory_space<vmem>>, vector<8x32xbf16>
      %17 = arith.extf %16 : vector<8x32xbf16> to vector<8x32xf32>
      %cst_16 = arith.constant 1.000000e+00 : f32
      %18 = vector.broadcast %cst_16 : f32 to vector<8x32xf32>
      %19 = arith.mulf %18, %15 : vector<8x32xf32>
      %20 = arith.addf %17, %19 : vector<8x32xf32>
      %21 = arith.truncf %20 : vector<8x32xf32> to vector<8x32xbf16>
      %c0_17 = arith.constant 0 : index
      %c0_18 = arith.constant 0 : index
      %22 = vector.load %arg7[%c0_17, %c0_18] : memref<8x32xbf16, #tpu.memory_space<vmem>>, vector<8x32xbf16>
      tpu.vector_store %arg7[%c0_17, %c0_18], %21 {strides = array<i32>} : memref<8x32xbf16, #tpu.memory_space<vmem>>, vector<8x32xbf16>,
    } else {
    }
    return
  }
  func.func @transform_0(%arg0: i32, %arg1: i32, %arg2: i32) -> (i32, i32) {
    %c0_i32 = arith.constant 0 : i32
    return %arg0, %arg2 : i32, i32
  }
  func.func @transform_1(%arg0: i32, %arg1: i32, %arg2: i32) -> (i32, i32) {
    %c0_i32 = arith.constant 0 : i32
    return %arg2, %arg1 : i32, i32
  }
  func.func @transform_2(%arg0: i32, %arg1: i32, %arg2: i32) -> (i32, i32) {
    %c0_i32 = arith.constant 0 : i32
    %c0_i32_0 = arith.constant 0 : i32
    return %c0_i32, %arg1 : i32, i32
  }
  func.func @transform_3(%arg0: i32, %arg1: i32, %arg2: i32) -> (i32, i32) {
    %c0_i32 = arith.constant 0 : i32
    return %arg0, %arg1 : i32, i32
  }
  func.func @transform_4(%arg0: i32, %arg1: i32, %arg2: i32) -> (i32, i32) {
    %c0_i32 = arith.constant 0 : i32
    return %arg0, %arg1 : i32, i32
  }
}

module attributes {stable_mosaic.version = 11 : i64} {
  func.func @_rel_mhsa_kernel(%arg0: i32, %arg1: memref<1x8x96xbf16, #tpu.memory_space<vmem>>, %arg2: memref<8x32xbf16, #tpu.memory_space<vmem>>, %arg3: memref<4x8xf32, #tpu.memory_space<vmem>>, %arg4: memref<4x8xf32, #tpu.memory_space<vmem>>, %arg5: memref<1x8x32xbf16, #tpu.memory_space<vmem>>) attributes {dimension_semantics = [#tpu.dimension_semantics<parallel>], iteration_bounds = array<i64: 2>, scalar_prefetch = 0 : i64, scratch_operands = 0 : i64, tpu.core_type = #tpu.core_type<tc>, window_params = [{transform_indices = @transform_0, window_bounds = array<i64: 1, 8, 96>}, {pipeline_mode = #tpu.pipeline_mode<synchronous>, transform_indices = @transform_1, window_bounds = array<i64: 8, 32>}, {pipeline_mode = #tpu.pipeline_mode<synchronous>, transform_indices = @transform_2, window_bounds = array<i64: 4, 8>}, {pipeline_mode = #tpu.pipeline_mode<synchronous>, transform_indices = @transform_3, window_bounds = array<i64: 4, 8>}, {transform_indices = @transform_4, window_bounds = array<i64: 1, 8, 32>}]} {
    %c0 = arith.constant 0 : index
    %c0_0 = arith.constant 0 : index
    %c0_1 = arith.constant 0 : index
    %0 = vector.load %arg1[%c0, %c0_0, %c0_1] : memref<1x8x96xbf16, #tpu.memory_space<vmem>>, vector<1x8x96xbf16>
    %1 = vector.shape_cast %0 : vector<1x8x96xbf16> to vector<8x96xbf16>
    %c0_2 = arith.constant 0 : index
    %c0_3 = arith.constant 0 : index
    %2 = vector.load %arg2[%c0_2, %c0_3] : memref<8x32xbf16, #tpu.memory_space<vmem>>, vector<8x32xbf16>
    %3 = vector.extract_strided_slice %1 {offsets = [0, 0], sizes = [8, 8], strides = [1, 1]} : vector<8x96xbf16> to vector<8x8xbf16>
    %4 = arith.extf %3 : vector<8x8xbf16> to vector<8x8xf32>
    %cst = arith.constant 0.176776692 : f32
    %5 = vector.broadcast %cst : f32 to vector<8x8xf32>
    %6 = arith.mulf %4, %5 : vector<8x8xf32>
    %7 = vector.extract_strided_slice %1 {offsets = [0, 32], sizes = [8, 8], strides = [1, 1]} : vector<8x96xbf16> to vector<8x8xbf16>
    %8 = vector.extract_strided_slice %1 {offsets = [0, 64], sizes = [8, 8], strides = [1, 1]} : vector<8x96xbf16> to vector<8x8xbf16>
    %9 = vector.extract_strided_slice %2 {offsets = [0, 0], sizes = [8, 8], strides = [1, 1]} : vector<8x32xbf16> to vector<8x8xbf16>
    %c0_4 = arith.constant 0 : index
    %c0_5 = arith.constant 0 : index
    %10 = vector.load %arg3[%c0_4, %c0_5] : memref<4x8xf32, #tpu.memory_space<vmem>>, vector<1x8xf32>
    %cst_6 = arith.constant 0.176776692 : f32
    %11 = vector.broadcast %cst_6 : f32 to vector<1x8xf32>
    %12 = arith.mulf %10, %11 : vector<1x8xf32>
    %c0_7 = arith.constant 0 : index
    %c0_8 = arith.constant 0 : index
    %13 = vector.load %arg4[%c0_7, %c0_8] : memref<4x8xf32, #tpu.memory_space<vmem>>, vector<1x8xf32>
    %cst_9 = arith.constant 0.176776692 : f32
    %14 = vector.broadcast %cst_9 : f32 to vector<1x8xf32>
    %15 = arith.mulf %13, %14 : vector<1x8xf32>
    %16 = vector.broadcast %12 : vector<1x8xf32> to vector<8x8xf32>
    %17 = arith.addf %6, %16 : vector<8x8xf32>
    %18 = arith.truncf %17 : vector<8x8xf32> to vector<8x8xbf16>
    %cst_10 = arith.constant dense<0.000000e+00> : vector<8x8xf32>
    %19 = tpu.matmul %18, %7, %cst_10 {dimension_numbers = #tpu.dot_dimension_numbers<[1], [1], [0], [0], [0, 0, 1, 0], [], []>} : vector<8x8xbf16>, vector<8x8xbf16>, vector<8x8xf32> -> vector<8x8xf32>
    %20 = vector.broadcast %15 : vector<1x8xf32> to vector<8x8xf32>
    %21 = arith.addf %6, %20 : vector<8x8xf32>
    %22 = arith.truncf %21 : vector<8x8xf32> to vector<8x8xbf16>
    %cst_11 = arith.constant dense<0.000000e+00> : vector<8x8xf32>
    %23 = tpu.matmul %22, %9, %cst_11 {dimension_numbers = #tpu.dot_dimension_numbers<[1], [1], [0], [0], [0, 0, 1, 0], [], []>} : vector<8x8xbf16>, vector<8x8xbf16>, vector<8x8xf32> -> vector<8x8xf32>
    %24 = tpu.iota {dimensions = array<i32: 0>} : vector<8x8xi32>
    %25 = tpu.iota {dimensions = array<i32: 1>} : vector<8x8xi32>
    %c1_i32 = arith.constant 1 : i32
    %26 = tpu.dynamic_rotate %23 by %c1_i32 dim 1 : vector<8x8xf32>, i32 -> vector<8x8xf32>
    %c1_i32_12 = arith.constant 1 : i32
    %27 = vector.broadcast %c1_i32_12 : i32 to vector<8x8xi32>
    %28 = arith.andi %24, %27 : vector<8x8xi32>
    %c0_i32 = arith.constant 0 : i32
    %29 = vector.broadcast %c0_i32 : i32 to vector<8x8xi32>
    %30 = arith.cmpi ne, %28, %29 : vector<8x8xi32>
    %c1_i32_13 = arith.constant 1 : i32
    %31 = tpu.dynamic_rotate %26 by %c1_i32_13 dim 1 : vector<8x8xf32>, i32 -> vector<8x8xf32>
    %32 = arith.select %30, %31, %26 : vector<8x8xi1>, vector<8x8xf32>
    %c2_i32 = arith.constant 2 : i32
    %33 = vector.broadcast %c2_i32 : i32 to vector<8x8xi32>
    %34 = arith.andi %24, %33 : vector<8x8xi32>
    %c0_i32_14 = arith.constant 0 : i32
    %35 = vector.broadcast %c0_i32_14 : i32 to vector<8x8xi32>
    %36 = arith.cmpi ne, %34, %35 : vector<8x8xi32>
    %c2_i32_15 = arith.constant 2 : i32
    %37 = tpu.dynamic_rotate %32 by %c2_i32_15 dim 1 : vector<8x8xf32>, i32 -> vector<8x8xf32>
    %38 = arith.select %36, %37, %32 : vector<8x8xi1>, vector<8x8xf32>
    %c4_i32 = arith.constant 4 : i32
    %39 = vector.broadcast %c4_i32 : i32 to vector<8x8xi32>
    %40 = arith.andi %24, %39 : vector<8x8xi32>
    %c0_i32_16 = arith.constant 0 : i32
    %41 = vector.broadcast %c0_i32_16 : i32 to vector<8x8xi32>
    %42 = arith.cmpi ne, %40, %41 : vector<8x8xi32>
    %c4_i32_17 = arith.constant 4 : i32
    %43 = tpu.dynamic_rotate %38 by %c4_i32_17 dim 1 : vector<8x8xf32>, i32 -> vector<8x8xf32>
    %44 = arith.select %42, %43, %38 : vector<8x8xi1>, vector<8x8xf32>
    %c7_i32 = arith.constant 7 : i32
    %45 = tpu.dynamic_rotate %44 by %c7_i32 dim 0 : vector<8x8xf32>, i32 -> vector<8x8xf32>
    %cst_18 = arith.constant 0.000000e+00 : f32
    %46 = vector.broadcast %cst_18 : f32 to vector<8x8xf32>
    %47 = arith.cmpi sle, %25, %24 : vector<8x8xi32>
    %48 = arith.select %47, %44, %46 : vector<8x8xi1>, vector<8x8xf32>
    %c2_i32_19 = arith.constant 2 : i32
    %49 = vector.broadcast %c2_i32_19 : i32 to vector<8x8xi32>
    %50 = arith.addi %24, %49 : vector<8x8xi32>
    %51 = arith.cmpi sge, %25, %50 : vector<8x8xi32>
    %52 = arith.select %51, %45, %46 : vector<8x8xi1>, vector<8x8xf32>
    %53 = arith.addf %48, %52 : vector<8x8xf32>
    %54 = arith.addf %19, %53 : vector<8x8xf32>
    %cst_20 = arith.constant dense<0xFF800000> : vector<8xf32>
    %55 = vector.multi_reduction <maximumf>, %54, %cst_20 [1] : vector<8x8xf32> to vector<8xf32>
    %56 = vector.shape_cast %55 : vector<8xf32> to vector<8x1xf32>
    %57 = vector.broadcast %56 : vector<8x1xf32> to vector<8x8xf32>
    %58 = arith.subf %54, %57 : vector<8x8xf32>
    %59 = math.exp %58 : vector<8x8xf32>
    %cst_21 = arith.constant dense<0.000000e+00> : vector<8xf32>
    %60 = vector.multi_reduction <add>, %59, %cst_21 [1] : vector<8x8xf32> to vector<8xf32>
    %61 = vector.shape_cast %60 : vector<8xf32> to vector<8x1xf32>
    %62 = tpu.reciprocal %61 {approx = true} : vector<8x1xf32> -> vector<8x1xf32>
    %63 = vector.broadcast %62 : vector<8x1xf32> to vector<8x8xf32>
    %64 = arith.mulf %59, %63 : vector<8x8xf32>
    %65 = arith.truncf %64 : vector<8x8xf32> to vector<8x8xbf16>
    %cst_22 = arith.constant dense<0.000000e+00> : vector<8x8xf32>
    %66 = tpu.matmul %65, %8, %cst_22 {dimension_numbers = #tpu.dot_dimension_numbers<[1], [0], [0], [1], [0, 0, 1, 1], [], []>} : vector<8x8xbf16>, vector<8x8xbf16>, vector<8x8xf32> -> vector<8x8xf32>
    %67 = vector.extract_strided_slice %1 {offsets = [0, 8], sizes = [8, 8], strides = [1, 1]} : vector<8x96xbf16> to vector<8x8xbf16>
    %68 = arith.extf %67 : vector<8x8xbf16> to vector<8x8xf32>
    %cst_23 = arith.constant 0.176776692 : f32
    %69 = vector.broadcast %cst_23 : f32 to vector<8x8xf32>
    %70 = arith.mulf %68, %69 : vector<8x8xf32>
    %71 = vector.extract_strided_slice %1 {offsets = [0, 40], sizes = [8, 8], strides = [1, 1]} : vector<8x96xbf16> to vector<8x8xbf16>
    %72 = vector.extract_strided_slice %1 {offsets = [0, 72], sizes = [8, 8], strides = [1, 1]} : vector<8x96xbf16> to vector<8x8xbf16>
    %73 = vector.extract_strided_slice %2 {offsets = [0, 8], sizes = [8, 8], strides = [1, 1]} : vector<8x32xbf16> to vector<8x8xbf16>
    %c1 = arith.constant 1 : index
    %c0_24 = arith.constant 0 : index
    %74 = vector.load %arg3[%c1, %c0_24] : memref<4x8xf32, #tpu.memory_space<vmem>>, vector<1x8xf32>
    %cst_25 = arith.constant 0.176776692 : f32
    %75 = vector.broadcast %cst_25 : f32 to vector<1x8xf32>
    %76 = arith.mulf %74, %75 : vector<1x8xf32>
    %c1_26 = arith.constant 1 : index
    %c0_27 = arith.constant 0 : index
    %77 = vector.load %arg4[%c1_26, %c0_27] : memref<4x8xf32, #tpu.memory_space<vmem>>, vector<1x8xf32>
    %cst_28 = arith.constant 0.176776692 : f32
    %78 = vector.broadcast %cst_28 : f32 to vector<1x8xf32>
    %79 = arith.mulf %77, %78 : vector<1x8xf32>
    %80 = vector.broadcast %76 : vector<1x8xf32> to vector<8x8xf32>
    %81 = arith.addf %70, %80 : vector<8x8xf32>
    %82 = arith.truncf %81 : vector<8x8xf32> to vector<8x8xbf16>
    %cst_29 = arith.constant dense<0.000000e+00> : vector<8x8xf32>
    %83 = tpu.matmul %82, %71, %cst_29 {dimension_numbers = #tpu.dot_dimension_numbers<[1], [1], [0], [0], [0, 0, 1, 0], [], []>} : vector<8x8xbf16>, vector<8x8xbf16>, vector<8x8xf32> -> vector<8x8xf32>
    %84 = vector.broadcast %79 : vector<1x8xf32> to vector<8x8xf32>
    %85 = arith.addf %70, %84 : vector<8x8xf32>
    %86 = arith.truncf %85 : vector<8x8xf32> to vector<8x8xbf16>
    %cst_30 = arith.constant dense<0.000000e+00> : vector<8x8xf32>
    %87 = tpu.matmul %86, %73, %cst_30 {dimension_numbers = #tpu.dot_dimension_numbers<[1], [1], [0], [0], [0, 0, 1, 0], [], []>} : vector<8x8xbf16>, vector<8x8xbf16>, vector<8x8xf32> -> vector<8x8xf32>
    %88 = tpu.iota {dimensions = array<i32: 0>} : vector<8x8xi32>
    %89 = tpu.iota {dimensions = array<i32: 1>} : vector<8x8xi32>
    %c1_i32_31 = arith.constant 1 : i32
    %90 = tpu.dynamic_rotate %87 by %c1_i32_31 dim 1 : vector<8x8xf32>, i32 -> vector<8x8xf32>
    %c1_i32_32 = arith.constant 1 : i32
    %91 = vector.broadcast %c1_i32_32 : i32 to vector<8x8xi32>
    %92 = arith.andi %88, %91 : vector<8x8xi32>
    %c0_i32_33 = arith.constant 0 : i32
    %93 = vector.broadcast %c0_i32_33 : i32 to vector<8x8xi32>
    %94 = arith.cmpi ne, %92, %93 : vector<8x8xi32>
    %c1_i32_34 = arith.constant 1 : i32
    %95 = tpu.dynamic_rotate %90 by %c1_i32_34 dim 1 : vector<8x8xf32>, i32 -> vector<8x8xf32>
    %96 = arith.select %94, %95, %90 : vector<8x8xi1>, vector<8x8xf32>
    %c2_i32_35 = arith.constant 2 : i32
    %97 = vector.broadcast %c2_i32_35 : i32 to vector<8x8xi32>
    %98 = arith.andi %88, %97 : vector<8x8xi32>
    %c0_i32_36 = arith.constant 0 : i32
    %99 = vector.broadcast %c0_i32_36 : i32 to vector<8x8xi32>
    %100 = arith.cmpi ne, %98, %99 : vector<8x8xi32>
    %c2_i32_37 = arith.constant 2 : i32
    %101 = tpu.dynamic_rotate %96 by %c2_i32_37 dim 1 : vector<8x8xf32>, i32 -> vector<8x8xf32>
    %102 = arith.select %100, %101, %96 : vector<8x8xi1>, vector<8x8xf32>
    %c4_i32_38 = arith.constant 4 : i32
    %103 = vector.broadcast %c4_i32_38 : i32 to vector<8x8xi32>
    %104 = arith.andi %88, %103 : vector<8x8xi32>
    %c0_i32_39 = arith.constant 0 : i32
    %105 = vector.broadcast %c0_i32_39 : i32 to vector<8x8xi32>
    %106 = arith.cmpi ne, %104, %105 : vector<8x8xi32>
    %c4_i32_40 = arith.constant 4 : i32
    %107 = tpu.dynamic_rotate %102 by %c4_i32_40 dim 1 : vector<8x8xf32>, i32 -> vector<8x8xf32>
    %108 = arith.select %106, %107, %102 : vector<8x8xi1>, vector<8x8xf32>
    %c7_i32_41 = arith.constant 7 : i32
    %109 = tpu.dynamic_rotate %108 by %c7_i32_41 dim 0 : vector<8x8xf32>, i32 -> vector<8x8xf32>
    %cst_42 = arith.constant 0.000000e+00 : f32
    %110 = vector.broadcast %cst_42 : f32 to vector<8x8xf32>
    %111 = arith.cmpi sle, %89, %88 : vector<8x8xi32>
    %112 = arith.select %111, %108, %110 : vector<8x8xi1>, vector<8x8xf32>
    %c2_i32_43 = arith.constant 2 : i32
    %113 = vector.broadcast %c2_i32_43 : i32 to vector<8x8xi32>
    %114 = arith.addi %88, %113 : vector<8x8xi32>
    %115 = arith.cmpi sge, %89, %114 : vector<8x8xi32>
    %116 = arith.select %115, %109, %110 : vector<8x8xi1>, vector<8x8xf32>
    %117 = arith.addf %112, %116 : vector<8x8xf32>
    %118 = arith.addf %83, %117 : vector<8x8xf32>
    %cst_44 = arith.constant dense<0xFF800000> : vector<8xf32>
    %119 = vector.multi_reduction <maximumf>, %118, %cst_44 [1] : vector<8x8xf32> to vector<8xf32>
    %120 = vector.shape_cast %119 : vector<8xf32> to vector<8x1xf32>
    %121 = vector.broadcast %120 : vector<8x1xf32> to vector<8x8xf32>
    %122 = arith.subf %118, %121 : vector<8x8xf32>
    %123 = math.exp %122 : vector<8x8xf32>
    %cst_45 = arith.constant dense<0.000000e+00> : vector<8xf32>
    %124 = vector.multi_reduction <add>, %123, %cst_45 [1] : vector<8x8xf32> to vector<8xf32>
    %125 = vector.shape_cast %124 : vector<8xf32> to vector<8x1xf32>
    %126 = tpu.reciprocal %125 {approx = true} : vector<8x1xf32> -> vector<8x1xf32>
    %127 = vector.broadcast %126 : vector<8x1xf32> to vector<8x8xf32>
    %128 = arith.mulf %123, %127 : vector<8x8xf32>
    %129 = arith.truncf %128 : vector<8x8xf32> to vector<8x8xbf16>
    %cst_46 = arith.constant dense<0.000000e+00> : vector<8x8xf32>
    %130 = tpu.matmul %129, %72, %cst_46 {dimension_numbers = #tpu.dot_dimension_numbers<[1], [0], [0], [1], [0, 0, 1, 1], [], []>} : vector<8x8xbf16>, vector<8x8xbf16>, vector<8x8xf32> -> vector<8x8xf32>
    %131 = vector.extract_strided_slice %1 {offsets = [0, 16], sizes = [8, 8], strides = [1, 1]} : vector<8x96xbf16> to vector<8x8xbf16>
    %132 = arith.extf %131 : vector<8x8xbf16> to vector<8x8xf32>
    %cst_47 = arith.constant 0.176776692 : f32
    %133 = vector.broadcast %cst_47 : f32 to vector<8x8xf32>
    %134 = arith.mulf %132, %133 : vector<8x8xf32>
    %135 = vector.extract_strided_slice %1 {offsets = [0, 48], sizes = [8, 8], strides = [1, 1]} : vector<8x96xbf16> to vector<8x8xbf16>
    %136 = vector.extract_strided_slice %1 {offsets = [0, 80], sizes = [8, 8], strides = [1, 1]} : vector<8x96xbf16> to vector<8x8xbf16>
    %137 = vector.extract_strided_slice %2 {offsets = [0, 16], sizes = [8, 8], strides = [1, 1]} : vector<8x32xbf16> to vector<8x8xbf16>
    %c2 = arith.constant 2 : index
    %c0_48 = arith.constant 0 : index
    %138 = vector.load %arg3[%c2, %c0_48] : memref<4x8xf32, #tpu.memory_space<vmem>>, vector<1x8xf32>
    %cst_49 = arith.constant 0.176776692 : f32
    %139 = vector.broadcast %cst_49 : f32 to vector<1x8xf32>
    %140 = arith.mulf %138, %139 : vector<1x8xf32>
    %c2_50 = arith.constant 2 : index
    %c0_51 = arith.constant 0 : index
    %141 = vector.load %arg4[%c2_50, %c0_51] : memref<4x8xf32, #tpu.memory_space<vmem>>, vector<1x8xf32>
    %cst_52 = arith.constant 0.176776692 : f32
    %142 = vector.broadcast %cst_52 : f32 to vector<1x8xf32>
    %143 = arith.mulf %141, %142 : vector<1x8xf32>
    %144 = vector.broadcast %140 : vector<1x8xf32> to vector<8x8xf32>
    %145 = arith.addf %134, %144 : vector<8x8xf32>
    %146 = arith.truncf %145 : vector<8x8xf32> to vector<8x8xbf16>
    %cst_53 = arith.constant dense<0.000000e+00> : vector<8x8xf32>
    %147 = tpu.matmul %146, %135, %cst_53 {dimension_numbers = #tpu.dot_dimension_numbers<[1], [1], [0], [0], [0, 0, 1, 0], [], []>} : vector<8x8xbf16>, vector<8x8xbf16>, vector<8x8xf32> -> vector<8x8xf32>
    %148 = vector.broadcast %143 : vector<1x8xf32> to vector<8x8xf32>
    %149 = arith.addf %134, %148 : vector<8x8xf32>
    %150 = arith.truncf %149 : vector<8x8xf32> to vector<8x8xbf16>
    %cst_54 = arith.constant dense<0.000000e+00> : vector<8x8xf32>
    %151 = tpu.matmul %150, %137, %cst_54 {dimension_numbers = #tpu.dot_dimension_numbers<[1], [1], [0], [0], [0, 0, 1, 0], [], []>} : vector<8x8xbf16>, vector<8x8xbf16>, vector<8x8xf32> -> vector<8x8xf32>
    %152 = tpu.iota {dimensions = array<i32: 0>} : vector<8x8xi32>
    %153 = tpu.iota {dimensions = array<i32: 1>} : vector<8x8xi32>
    %c1_i32_55 = arith.constant 1 : i32
    %154 = tpu.dynamic_rotate %151 by %c1_i32_55 dim 1 : vector<8x8xf32>, i32 -> vector<8x8xf32>
    %c1_i32_56 = arith.constant 1 : i32
    %155 = vector.broadcast %c1_i32_56 : i32 to vector<8x8xi32>
    %156 = arith.andi %152, %155 : vector<8x8xi32>
    %c0_i32_57 = arith.constant 0 : i32
    %157 = vector.broadcast %c0_i32_57 : i32 to vector<8x8xi32>
    %158 = arith.cmpi ne, %156, %157 : vector<8x8xi32>
    %c1_i32_58 = arith.constant 1 : i32
    %159 = tpu.dynamic_rotate %154 by %c1_i32_58 dim 1 : vector<8x8xf32>, i32 -> vector<8x8xf32>
    %160 = arith.select %158, %159, %154 : vector<8x8xi1>, vector<8x8xf32>
    %c2_i32_59 = arith.constant 2 : i32
    %161 = vector.broadcast %c2_i32_59 : i32 to vector<8x8xi32>
    %162 = arith.andi %152, %161 : vector<8x8xi32>
    %c0_i32_60 = arith.constant 0 : i32
    %163 = vector.broadcast %c0_i32_60 : i32 to vector<8x8xi32>
    %164 = arith.cmpi ne, %162, %163 : vector<8x8xi32>
    %c2_i32_61 = arith.constant 2 : i32
    %165 = tpu.dynamic_rotate %160 by %c2_i32_61 dim 1 : vector<8x8xf32>, i32 -> vector<8x8xf32>
    %166 = arith.select %164, %165, %160 : vector<8x8xi1>, vector<8x8xf32>
    %c4_i32_62 = arith.constant 4 : i32
    %167 = vector.broadcast %c4_i32_62 : i32 to vector<8x8xi32>
    %168 = arith.andi %152, %167 : vector<8x8xi32>
    %c0_i32_63 = arith.constant 0 : i32
    %169 = vector.broadcast %c0_i32_63 : i32 to vector<8x8xi32>
    %170 = arith.cmpi ne, %168, %169 : vector<8x8xi32>
    %c4_i32_64 = arith.constant 4 : i32
    %171 = tpu.dynamic_rotate %166 by %c4_i32_64 dim 1 : vector<8x8xf32>, i32 -> vector<8x8xf32>
    %172 = arith.select %170, %171, %166 : vector<8x8xi1>, vector<8x8xf32>
    %c7_i32_65 = arith.constant 7 : i32
    %173 = tpu.dynamic_rotate %172 by %c7_i32_65 dim 0 : vector<8x8xf32>, i32 -> vector<8x8xf32>
    %cst_66 = arith.constant 0.000000e+00 : f32
    %174 = vector.broadcast %cst_66 : f32 to vector<8x8xf32>
    %175 = arith.cmpi sle, %153, %152 : vector<8x8xi32>
    %176 = arith.select %175, %172, %174 : vector<8x8xi1>, vector<8x8xf32>
    %c2_i32_67 = arith.constant 2 : i32
    %177 = vector.broadcast %c2_i32_67 : i32 to vector<8x8xi32>
    %178 = arith.addi %152, %177 : vector<8x8xi32>
    %179 = arith.cmpi sge, %153, %178 : vector<8x8xi32>
    %180 = arith.select %179, %173, %174 : vector<8x8xi1>, vector<8x8xf32>
    %181 = arith.addf %176, %180 : vector<8x8xf32>
    %182 = arith.addf %147, %181 : vector<8x8xf32>
    %cst_68 = arith.constant dense<0xFF800000> : vector<8xf32>
    %183 = vector.multi_reduction <maximumf>, %182, %cst_68 [1] : vector<8x8xf32> to vector<8xf32>
    %184 = vector.shape_cast %183 : vector<8xf32> to vector<8x1xf32>
    %185 = vector.broadcast %184 : vector<8x1xf32> to vector<8x8xf32>
    %186 = arith.subf %182, %185 : vector<8x8xf32>
    %187 = math.exp %186 : vector<8x8xf32>
    %cst_69 = arith.constant dense<0.000000e+00> : vector<8xf32>
    %188 = vector.multi_reduction <add>, %187, %cst_69 [1] : vector<8x8xf32> to vector<8xf32>
    %189 = vector.shape_cast %188 : vector<8xf32> to vector<8x1xf32>
    %190 = tpu.reciprocal %189 {approx = true} : vector<8x1xf32> -> vector<8x1xf32>
    %191 = vector.broadcast %190 : vector<8x1xf32> to vector<8x8xf32>
    %192 = arith.mulf %187, %191 : vector<8x8xf32>
    %193 = arith.truncf %192 : vector<8x8xf32> to vector<8x8xbf16>
    %cst_70 = arith.constant dense<0.000000e+00> : vector<8x8xf32>
    %194 = tpu.matmul %193, %136, %cst_70 {dimension_numbers = #tpu.dot_dimension_numbers<[1], [0], [0], [1], [0, 0, 1, 1], [], []>} : vector<8x8xbf16>, vector<8x8xbf16>, vector<8x8xf32> -> vector<8x8xf32>
    %195 = vector.extract_strided_slice %1 {offsets = [0, 24], sizes = [8, 8], strides = [1, 1]} : vector<8x96xbf16> to vector<8x8xbf16>
    %196 = arith.extf %195 : vector<8x8xbf16> to vector<8x8xf32>
    %cst_71 = arith.constant 0.176776692 : f32
    %197 = vector.broadcast %cst_71 : f32 to vector<8x8xf32>
    %198 = arith.mulf %196, %197 : vector<8x8xf32>
    %199 = vector.extract_strided_slice %1 {offsets = [0, 56], sizes = [8, 8], strides = [1, 1]} : vector<8x96xbf16> to vector<8x8xbf16>
    %200 = vector.extract_strided_slice %1 {offsets = [0, 88], sizes = [8, 8], strides = [1, 1]} : vector<8x96xbf16> to vector<8x8xbf16>
    %201 = vector.extract_strided_slice %2 {offsets = [0, 24], sizes = [8, 8], strides = [1, 1]} : vector<8x32xbf16> to vector<8x8xbf16>
    %c3 = arith.constant 3 : index
    %c0_72 = arith.constant 0 : index
    %202 = vector.load %arg3[%c3, %c0_72] : memref<4x8xf32, #tpu.memory_space<vmem>>, vector<1x8xf32>
    %cst_73 = arith.constant 0.176776692 : f32
    %203 = vector.broadcast %cst_73 : f32 to vector<1x8xf32>
    %204 = arith.mulf %202, %203 : vector<1x8xf32>
    %c3_74 = arith.constant 3 : index
    %c0_75 = arith.constant 0 : index
    %205 = vector.load %arg4[%c3_74, %c0_75] : memref<4x8xf32, #tpu.memory_space<vmem>>, vector<1x8xf32>
    %cst_76 = arith.constant 0.176776692 : f32
    %206 = vector.broadcast %cst_76 : f32 to vector<1x8xf32>
    %207 = arith.mulf %205, %206 : vector<1x8xf32>
    %208 = vector.broadcast %204 : vector<1x8xf32> to vector<8x8xf32>
    %209 = arith.addf %198, %208 : vector<8x8xf32>
    %210 = arith.truncf %209 : vector<8x8xf32> to vector<8x8xbf16>
    %cst_77 = arith.constant dense<0.000000e+00> : vector<8x8xf32>
    %211 = tpu.matmul %210, %199, %cst_77 {dimension_numbers = #tpu.dot_dimension_numbers<[1], [1], [0], [0], [0, 0, 1, 0], [], []>} : vector<8x8xbf16>, vector<8x8xbf16>, vector<8x8xf32> -> vector<8x8xf32>
    %212 = vector.broadcast %207 : vector<1x8xf32> to vector<8x8xf32>
    %213 = arith.addf %198, %212 : vector<8x8xf32>
    %214 = arith.truncf %213 : vector<8x8xf32> to vector<8x8xbf16>
    %cst_78 = arith.constant dense<0.000000e+00> : vector<8x8xf32>
    %215 = tpu.matmul %214, %201, %cst_78 {dimension_numbers = #tpu.dot_dimension_numbers<[1], [1], [0], [0], [0, 0, 1, 0], [], []>} : vector<8x8xbf16>, vector<8x8xbf16>, vector<8x8xf32> -> vector<8x8xf32>
    %216 = tpu.iota {dimensions = array<i32: 0>} : vector<8x8xi32>
    %217 = tpu.iota {dimensions = array<i32: 1>} : vector<8x8xi32>
    %c1_i32_79 = arith.constant 1 : i32
    %218 = tpu.dynamic_rotate %215 by %c1_i32_79 dim 1 : vector<8x8xf32>, i32 -> vector<8x8xf32>
    %c1_i32_80 = arith.constant 1 : i32
    %219 = vector.broadcast %c1_i32_80 : i32 to vector<8x8xi32>
    %220 = arith.andi %216, %219 : vector<8x8xi32>
    %c0_i32_81 = arith.constant 0 : i32
    %221 = vector.broadcast %c0_i32_81 : i32 to vector<8x8xi32>
    %222 = arith.cmpi ne, %220, %221 : vector<8x8xi32>
    %c1_i32_82 = arith.constant 1 : i32
    %223 = tpu.dynamic_rotate %218 by %c1_i32_82 dim 1 : vector<8x8xf32>, i32 -> vector<8x8xf32>
    %224 = arith.select %222, %223, %218 : vector<8x8xi1>, vector<8x8xf32>
    %c2_i32_83 = arith.constant 2 : i32
    %225 = vector.broadcast %c2_i32_83 : i32 to vector<8x8xi32>
    %226 = arith.andi %216, %225 : vector<8x8xi32>
    %c0_i32_84 = arith.constant 0 : i32
    %227 = vector.broadcast %c0_i32_84 : i32 to vector<8x8xi32>
    %228 = arith.cmpi ne, %226, %227 : vector<8x8xi32>
    %c2_i32_85 = arith.constant 2 : i32
    %229 = tpu.dynamic_rotate %224 by %c2_i32_85 dim 1 : vector<8x8xf32>, i32 -> vector<8x8xf32>
    %230 = arith.select %228, %229, %224 : vector<8x8xi1>, vector<8x8xf32>
    %c4_i32_86 = arith.constant 4 : i32
    %231 = vector.broadcast %c4_i32_86 : i32 to vector<8x8xi32>
    %232 = arith.andi %216, %231 : vector<8x8xi32>
    %c0_i32_87 = arith.constant 0 : i32
    %233 = vector.broadcast %c0_i32_87 : i32 to vector<8x8xi32>
    %234 = arith.cmpi ne, %232, %233 : vector<8x8xi32>
    %c4_i32_88 = arith.constant 4 : i32
    %235 = tpu.dynamic_rotate %230 by %c4_i32_88 dim 1 : vector<8x8xf32>, i32 -> vector<8x8xf32>
    %236 = arith.select %234, %235, %230 : vector<8x8xi1>, vector<8x8xf32>
    %c7_i32_89 = arith.constant 7 : i32
    %237 = tpu.dynamic_rotate %236 by %c7_i32_89 dim 0 : vector<8x8xf32>, i32 -> vector<8x8xf32>
    %cst_90 = arith.constant 0.000000e+00 : f32
    %238 = vector.broadcast %cst_90 : f32 to vector<8x8xf32>
    %239 = arith.cmpi sle, %217, %216 : vector<8x8xi32>
    %240 = arith.select %239, %236, %238 : vector<8x8xi1>, vector<8x8xf32>
    %c2_i32_91 = arith.constant 2 : i32
    %241 = vector.broadcast %c2_i32_91 : i32 to vector<8x8xi32>
    %242 = arith.addi %216, %241 : vector<8x8xi32>
    %243 = arith.cmpi sge, %217, %242 : vector<8x8xi32>
    %244 = arith.select %243, %237, %238 : vector<8x8xi1>, vector<8x8xf32>
    %245 = arith.addf %240, %244 : vector<8x8xf32>
    %246 = arith.addf %211, %245 : vector<8x8xf32>
    %cst_92 = arith.constant dense<0xFF800000> : vector<8xf32>
    %247 = vector.multi_reduction <maximumf>, %246, %cst_92 [1] : vector<8x8xf32> to vector<8xf32>
    %248 = vector.shape_cast %247 : vector<8xf32> to vector<8x1xf32>
    %249 = vector.broadcast %248 : vector<8x1xf32> to vector<8x8xf32>
    %250 = arith.subf %246, %249 : vector<8x8xf32>
    %251 = math.exp %250 : vector<8x8xf32>
    %cst_93 = arith.constant dense<0.000000e+00> : vector<8xf32>
    %252 = vector.multi_reduction <add>, %251, %cst_93 [1] : vector<8x8xf32> to vector<8xf32>
    %253 = vector.shape_cast %252 : vector<8xf32> to vector<8x1xf32>
    %254 = tpu.reciprocal %253 {approx = true} : vector<8x1xf32> -> vector<8x1xf32>
    %255 = vector.broadcast %254 : vector<8x1xf32> to vector<8x8xf32>
    %256 = arith.mulf %251, %255 : vector<8x8xf32>
    %257 = arith.truncf %256 : vector<8x8xf32> to vector<8x8xbf16>
    %cst_94 = arith.constant dense<0.000000e+00> : vector<8x8xf32>
    %258 = tpu.matmul %257, %200, %cst_94 {dimension_numbers = #tpu.dot_dimension_numbers<[1], [0], [0], [1], [0, 0, 1, 1], [], []>} : vector<8x8xbf16>, vector<8x8xbf16>, vector<8x8xf32> -> vector<8x8xf32>
    %259 = tpu.concatenate %66, %130, %194, %258 in 1 : vector<8x8xf32>, vector<8x8xf32>, vector<8x8xf32>, vector<8x8xf32> -> vector<8x32xf32>
    %260 = arith.truncf %259 : vector<8x32xf32> to vector<8x32xbf16>
    %c0_95 = arith.constant 0 : index
    %c0_96 = arith.constant 0 : index
    %c0_97 = arith.constant 0 : index
    %261 = vector.load %arg5[%c0_95, %c0_96, %c0_97] : memref<1x8x32xbf16, #tpu.memory_space<vmem>>, vector<1x8x32xbf16>
    %262 = vector.shape_cast %261 : vector<1x8x32xbf16> to vector<8x32xbf16>
    %263 = vector.shape_cast %260 : vector<8x32xbf16> to vector<1x8x32xbf16>
    tpu.vector_store %arg5[%c0_95, %c0_96, %c0_97], %263 {strides = array<i32>} : memref<1x8x32xbf16, #tpu.memory_space<vmem>>, vector<1x8x32xbf16>,
    return
  }
  func.func @transform_0(%arg0: i32) -> (i32, i32, i32) {
    %c0_i32 = arith.constant 0 : i32
    %c0_i32_0 = arith.constant 0 : i32
    %c0_i32_1 = arith.constant 0 : i32
    return %arg0, %c0_i32, %c0_i32_0 : i32, i32, i32
  }
  func.func @transform_1(%arg0: i32) -> (i32, i32) {
    %c0_i32 = arith.constant 0 : i32
    %c0_i32_0 = arith.constant 0 : i32
    %c0_i32_1 = arith.constant 0 : i32
    return %c0_i32, %c0_i32_0 : i32, i32
  }
  func.func @transform_2(%arg0: i32) -> (i32, i32) {
    %c0_i32 = arith.constant 0 : i32
    %c0_i32_0 = arith.constant 0 : i32
    %c0_i32_1 = arith.constant 0 : i32
    return %c0_i32, %c0_i32_0 : i32, i32
  }
  func.func @transform_3(%arg0: i32) -> (i32, i32) {
    %c0_i32 = arith.constant 0 : i32
    %c0_i32_0 = arith.constant 0 : i32
    %c0_i32_1 = arith.constant 0 : i32
    return %c0_i32, %c0_i32_0 : i32, i32
  }
  func.func @transform_4(%arg0: i32) -> (i32, i32, i32) {
    %c0_i32 = arith.constant 0 : i32
    %c0_i32_0 = arith.constant 0 : i32
    %c0_i32_1 = arith.constant 0 : i32
    return %arg0, %c0_i32, %c0_i32_0 : i32, i32, i32
  }
}

module attributes {stable_mosaic.version = 11 : i64} {
  func.func @_pw1_glu_kernel(%arg0: i32, %arg1: i32, %arg2: memref<8x32xbf16, #tpu.memory_space<vmem>>, %arg3: memref<32x32xbf16, #tpu.memory_space<vmem>>, %arg4: memref<32x32xbf16, #tpu.memory_space<vmem>>, %arg5: memref<1x32xf32, #tpu.memory_space<vmem>>, %arg6: memref<1x32xf32, #tpu.memory_space<vmem>>, %arg7: memref<1x32xf32, #tpu.memory_space<vmem>>, %arg8: memref<1x32xf32, #tpu.memory_space<vmem>>, %arg9: memref<8x32xbf16, #tpu.memory_space<vmem>>) attributes {dimension_semantics = [#tpu.dimension_semantics<parallel>, #tpu.dimension_semantics<parallel>], iteration_bounds = array<i64: 2, 1>, scalar_prefetch = 0 : i64, scratch_operands = 0 : i64, tpu.core_type = #tpu.core_type<tc>, window_params = [{transform_indices = @transform_0, window_bounds = array<i64: 8, 32>}, {transform_indices = @transform_1, window_bounds = array<i64: 32, 32>}, {transform_indices = @transform_2, window_bounds = array<i64: 32, 32>}, {transform_indices = @transform_3, window_bounds = array<i64: 1, 32>}, {transform_indices = @transform_4, window_bounds = array<i64: 1, 32>}, {pipeline_mode = #tpu.pipeline_mode<synchronous>, transform_indices = @transform_5, window_bounds = array<i64: 1, 32>}, {pipeline_mode = #tpu.pipeline_mode<synchronous>, transform_indices = @transform_6, window_bounds = array<i64: 1, 32>}, {transform_indices = @transform_7, window_bounds = array<i64: 8, 32>}]} {
    %c0 = arith.constant 0 : index
    %c0_0 = arith.constant 0 : index
    %0 = vector.load %arg2[%c0, %c0_0] : memref<8x32xbf16, #tpu.memory_space<vmem>>, vector<8x32xbf16>
    %1 = arith.extf %0 : vector<8x32xbf16> to vector<8x32xf32>
    %cst = arith.constant dense<0.000000e+00> : vector<8xf32>
    %2 = vector.multi_reduction <add>, %1, %cst [1] : vector<8x32xf32> to vector<8xf32>
    %3 = vector.shape_cast %2 : vector<8xf32> to vector<8x1xf32>
    %cst_1 = arith.constant 3.200000e+01 : f32
    %4 = vector.broadcast %cst_1 : f32 to vector<8x1xf32>
    %5 = arith.divf %3, %4 : vector<8x1xf32>
    %6 = vector.broadcast %5 : vector<8x1xf32> to vector<8x32xf32>
    %7 = arith.subf %1, %6 : vector<8x32xf32>
    %8 = arith.mulf %7, %7 : vector<8x32xf32>
    %cst_2 = arith.constant dense<0.000000e+00> : vector<8xf32>
    %9 = vector.multi_reduction <add>, %8, %cst_2 [1] : vector<8x32xf32> to vector<8xf32>
    %10 = vector.shape_cast %9 : vector<8xf32> to vector<8x1xf32>
    %cst_3 = arith.constant 3.200000e+01 : f32
    %11 = vector.broadcast %cst_3 : f32 to vector<8x1xf32>
    %12 = arith.divf %10, %11 : vector<8x1xf32>
    %13 = vector.broadcast %5 : vector<8x1xf32> to vector<8x32xf32>
    %14 = arith.subf %1, %13 : vector<8x32xf32>
    %cst_4 = arith.constant 9.99999974E-6 : f32
    %15 = vector.broadcast %cst_4 : f32 to vector<8x1xf32>
    %16 = arith.addf %12, %15 : vector<8x1xf32>
    %17 = math.rsqrt %16 : vector<8x1xf32>
    %18 = vector.broadcast %17 : vector<8x1xf32> to vector<8x32xf32>
    %19 = arith.mulf %14, %18 : vector<8x32xf32>
    %c0_5 = arith.constant 0 : index
    %c0_6 = arith.constant 0 : index
    %20 = vector.load %arg7[%c0_5, %c0_6] : memref<1x32xf32, #tpu.memory_space<vmem>>, vector<1x32xf32>
    %21 = vector.broadcast %20 : vector<1x32xf32> to vector<8x32xf32>
    %22 = arith.mulf %19, %21 : vector<8x32xf32>
    %c0_7 = arith.constant 0 : index
    %c0_8 = arith.constant 0 : index
    %23 = vector.load %arg8[%c0_7, %c0_8] : memref<1x32xf32, #tpu.memory_space<vmem>>, vector<1x32xf32>
    %24 = vector.broadcast %23 : vector<1x32xf32> to vector<8x32xf32>
    %25 = arith.addf %22, %24 : vector<8x32xf32>
    %26 = arith.truncf %25 : vector<8x32xf32> to vector<8x32xbf16>
    %c0_9 = arith.constant 0 : index
    %c0_10 = arith.constant 0 : index
    %27 = vector.load %arg3[%c0_9, %c0_10] : memref<32x32xbf16, #tpu.memory_space<vmem>>, vector<32x32xbf16>
    %cst_11 = arith.constant dense<0.000000e+00> : vector<8x32xf32>
    %28 = tpu.matmul %26, %27, %cst_11 {dimension_numbers = #tpu.dot_dimension_numbers<[1], [0], [0], [1], [0, 0, 1, 1], [], []>} : vector<8x32xbf16>, vector<32x32xbf16>, vector<8x32xf32> -> vector<8x32xf32>
    %c0_12 = arith.constant 0 : index
    %c0_13 = arith.constant 0 : index
    %29 = vector.load %arg5[%c0_12, %c0_13] : memref<1x32xf32, #tpu.memory_space<vmem>>, vector<1x32xf32>
    %30 = vector.broadcast %29 : vector<1x32xf32> to vector<8x32xf32>
    %31 = arith.addf %28, %30 : vector<8x32xf32>
    %c0_14 = arith.constant 0 : index
    %c0_15 = arith.constant 0 : index
    %32 = vector.load %arg4[%c0_14, %c0_15] : memref<32x32xbf16, #tpu.memory_space<vmem>>, vector<32x32xbf16>
    %cst_16 = arith.constant dense<0.000000e+00> : vector<8x32xf32>
    %33 = tpu.matmul %26, %32, %cst_16 {dimension_numbers = #tpu.dot_dimension_numbers<[1], [0], [0], [1], [0, 0, 1, 1], [], []>} : vector<8x32xbf16>, vector<32x32xbf16>, vector<8x32xf32> -> vector<8x32xf32>
    %c0_17 = arith.constant 0 : index
    %c0_18 = arith.constant 0 : index
    %34 = vector.load %arg6[%c0_17, %c0_18] : memref<1x32xf32, #tpu.memory_space<vmem>>, vector<1x32xf32>
    %35 = vector.broadcast %34 : vector<1x32xf32> to vector<8x32xf32>
    %36 = arith.addf %33, %35 : vector<8x32xf32>
    %37 = arith.negf %36 : vector<8x32xf32>
    %38 = math.exp %37 : vector<8x32xf32>
    %cst_19 = arith.constant 1.000000e+00 : f32
    %39 = vector.broadcast %cst_19 : f32 to vector<8x32xf32>
    %40 = arith.addf %39, %38 : vector<8x32xf32>
    %41 = arith.divf %39, %40 : vector<8x32xf32>
    %42 = arith.mulf %31, %41 : vector<8x32xf32>
    %43 = arith.truncf %42 : vector<8x32xf32> to vector<8x32xbf16>
    %c0_20 = arith.constant 0 : index
    %c0_21 = arith.constant 0 : index
    %44 = vector.load %arg9[%c0_20, %c0_21] : memref<8x32xbf16, #tpu.memory_space<vmem>>, vector<8x32xbf16>
    tpu.vector_store %arg9[%c0_20, %c0_21], %43 {strides = array<i32>} : memref<8x32xbf16, #tpu.memory_space<vmem>>, vector<8x32xbf16>,
    return
  }
  func.func @transform_0(%arg0: i32, %arg1: i32) -> (i32, i32) {
    %c0_i32 = arith.constant 0 : i32
    %c0_i32_0 = arith.constant 0 : i32
    return %arg0, %c0_i32 : i32, i32
  }
  func.func @transform_1(%arg0: i32, %arg1: i32) -> (i32, i32) {
    %c0_i32 = arith.constant 0 : i32
    %c0_i32_0 = arith.constant 0 : i32
    return %c0_i32, %arg1 : i32, i32
  }
  func.func @transform_2(%arg0: i32, %arg1: i32) -> (i32, i32) {
    %c0_i32 = arith.constant 0 : i32
    %c0_i32_0 = arith.constant 0 : i32
    return %c0_i32, %arg1 : i32, i32
  }
  func.func @transform_3(%arg0: i32, %arg1: i32) -> (i32, i32) {
    %c0_i32 = arith.constant 0 : i32
    %c0_i32_0 = arith.constant 0 : i32
    return %c0_i32, %arg1 : i32, i32
  }
  func.func @transform_4(%arg0: i32, %arg1: i32) -> (i32, i32) {
    %c0_i32 = arith.constant 0 : i32
    %c0_i32_0 = arith.constant 0 : i32
    return %c0_i32, %arg1 : i32, i32
  }
  func.func @transform_5(%arg0: i32, %arg1: i32) -> (i32, i32) {
    %c0_i32 = arith.constant 0 : i32
    %c0_i32_0 = arith.constant 0 : i32
    %c0_i32_1 = arith.constant 0 : i32
    return %c0_i32, %c0_i32_0 : i32, i32
  }
  func.func @transform_6(%arg0: i32, %arg1: i32) -> (i32, i32) {
    %c0_i32 = arith.constant 0 : i32
    %c0_i32_0 = arith.constant 0 : i32
    %c0_i32_1 = arith.constant 0 : i32
    return %c0_i32, %c0_i32_0 : i32, i32
  }
  func.func @transform_7(%arg0: i32, %arg1: i32) -> (i32, i32) {
    %c0_i32 = arith.constant 0 : i32
    return %arg0, %arg1 : i32, i32
  }
}

module attributes {stable_mosaic.version = 11 : i64} {
  func.func @_linear_kernel(%arg0: i32, %arg1: i32, %arg2: i32, %arg3: memref<8x32xbf16, #tpu.memory_space<vmem>>, %arg4: memref<32x32xbf16, #tpu.memory_space<vmem>>, %arg5: memref<1x32xf32, #tpu.memory_space<vmem>>, %arg6: memref<8x32xbf16, #tpu.memory_space<vmem>>, %arg7: memref<8x32xbf16, #tpu.memory_space<vmem>>, %arg8: memref<8x32xf32, #tpu.memory_space<vmem>>) attributes {dimension_semantics = [#tpu.dimension_semantics<parallel>, #tpu.dimension_semantics<parallel>, #tpu.dimension_semantics<arbitrary>], iteration_bounds = array<i64: 2, 1, 1>, scalar_prefetch = 0 : i64, scratch_operands = 1 : i64, tpu.core_type = #tpu.core_type<tc>, window_params = [{transform_indices = @transform_0, window_bounds = array<i64: 8, 32>}, {transform_indices = @transform_1, window_bounds = array<i64: 32, 32>}, {transform_indices = @transform_2, window_bounds = array<i64: 1, 32>}, {transform_indices = @transform_3, window_bounds = array<i64: 8, 32>}, {transform_indices = @transform_4, window_bounds = array<i64: 8, 32>}]} {
    %c0_i32 = arith.constant 0 : i32
    %0 = arith.cmpi eq, %arg2, %c0_i32 : i32
    %1 = arith.extui %0 : i1 to i32
    %c0_i32_0 = arith.constant 0 : i32
    %2 = arith.cmpi ne, %1, %c0_i32_0 : i32
    scf.if %2 {
      %cst_10 = arith.constant 0.000000e+00 : f32
      %12 = vector.broadcast %cst_10 : f32 to vector<8x32xf32>
      %c0_11 = arith.constant 0 : index
      %c0_12 = arith.constant 0 : index
      %13 = vector.load %arg8[%c0_11, %c0_12] : memref<8x32xf32, #tpu.memory_space<vmem>>, vector<8x32xf32>
      tpu.vector_store %arg8[%c0_11, %c0_12], %12 {strides = array<i32>} : memref<8x32xf32, #tpu.memory_space<vmem>>, vector<8x32xf32>,
    } else {
    }
    %c0 = arith.constant 0 : index
    %c0_1 = arith.constant 0 : index
    %3 = vector.load %arg3[%c0, %c0_1] : memref<8x32xbf16, #tpu.memory_space<vmem>>, vector<8x32xbf16>
    %c0_2 = arith.constant 0 : index
    %c0_3 = arith.constant 0 : index
    %4 = vector.load %arg8[%c0_2, %c0_3] : memref<8x32xf32, #tpu.memory_space<vmem>>, vector<8x32xf32>
    %c0_4 = arith.constant 0 : index
    %c0_5 = arith.constant 0 : index
    %5 = vector.load %arg4[%c0_4, %c0_5] : memref<32x32xbf16, #tpu.memory_space<vmem>>, vector<32x32xbf16>
    %cst = arith.constant dense<0.000000e+00> : vector<8x32xf32>
    %6 = tpu.matmul %3, %5, %cst {dimension_numbers = #tpu.dot_dimension_numbers<[1], [0], [0], [1], [0, 0, 1, 1], [], []>} : vector<8x32xbf16>, vector<32x32xbf16>, vector<8x32xf32> -> vector<8x32xf32>
    %7 = arith.addf %4, %6 : vector<8x32xf32>
    %c0_6 = arith.constant 0 : index
    %c0_7 = arith.constant 0 : index
    %8 = vector.load %arg8[%c0_6, %c0_7] : memref<8x32xf32, #tpu.memory_space<vmem>>, vector<8x32xf32>
    tpu.vector_store %arg8[%c0_6, %c0_7], %7 {strides = array<i32>} : memref<8x32xf32, #tpu.memory_space<vmem>>, vector<8x32xf32>,
    %c0_i32_8 = arith.constant 0 : i32
    %9 = arith.cmpi eq, %arg2, %c0_i32_8 : i32
    %10 = arith.extui %9 : i1 to i32
    %c0_i32_9 = arith.constant 0 : i32
    %11 = arith.cmpi ne, %10, %c0_i32_9 : i32
    scf.if %11 {
      %c0_10 = arith.constant 0 : index
      %c0_11 = arith.constant 0 : index
      %12 = vector.load %arg8[%c0_10, %c0_11] : memref<8x32xf32, #tpu.memory_space<vmem>>, vector<8x32xf32>
      %c0_12 = arith.constant 0 : index
      %c0_13 = arith.constant 0 : index
      %13 = vector.load %arg5[%c0_12, %c0_13] : memref<1x32xf32, #tpu.memory_space<vmem>>, vector<1x32xf32>
      %14 = vector.broadcast %13 : vector<1x32xf32> to vector<8x32xf32>
      %15 = arith.addf %12, %14 : vector<8x32xf32>
      %c0_14 = arith.constant 0 : index
      %c0_15 = arith.constant 0 : index
      %16 = vector.load %arg6[%c0_14, %c0_15] : memref<8x32xbf16, #tpu.memory_space<vmem>>, vector<8x32xbf16>
      %17 = arith.extf %16 : vector<8x32xbf16> to vector<8x32xf32>
      %cst_16 = arith.constant 1.000000e+00 : f32
      %18 = vector.broadcast %cst_16 : f32 to vector<8x32xf32>
      %19 = arith.mulf %18, %15 : vector<8x32xf32>
      %20 = arith.addf %17, %19 : vector<8x32xf32>
      %21 = arith.truncf %20 : vector<8x32xf32> to vector<8x32xbf16>
      %c0_17 = arith.constant 0 : index
      %c0_18 = arith.constant 0 : index
      %22 = vector.load %arg7[%c0_17, %c0_18] : memref<8x32xbf16, #tpu.memory_space<vmem>>, vector<8x32xbf16>
      tpu.vector_store %arg7[%c0_17, %c0_18], %21 {strides = array<i32>} : memref<8x32xbf16, #tpu.memory_space<vmem>>, vector<8x32xbf16>,
    } else {
    }
    return
  }
  func.func @transform_0(%arg0: i32, %arg1: i32, %arg2: i32) -> (i32, i32) {
    %c0_i32 = arith.constant 0 : i32
    return %arg0, %arg2 : i32, i32
  }
  func.func @transform_1(%arg0: i32, %arg1: i32, %arg2: i32) -> (i32, i32) {
    %c0_i32 = arith.constant 0 : i32
    return %arg2, %arg1 : i32, i32
  }
  func.func @transform_2(%arg0: i32, %arg1: i32, %arg2: i32) -> (i32, i32) {
    %c0_i32 = arith.constant 0 : i32
    %c0_i32_0 = arith.constant 0 : i32
    return %c0_i32, %arg1 : i32, i32
  }
  func.func @transform_3(%arg0: i32, %arg1: i32, %arg2: i32) -> (i32, i32) {
    %c0_i32 = arith.constant 0 : i32
    return %arg0, %arg1 : i32, i32
  }
  func.func @transform_4(%arg0: i32, %arg1: i32, %arg2: i32) -> (i32, i32) {
    %c0_i32 = arith.constant 0 : i32
    return %arg0, %arg1 : i32, i32
  }
}

module attributes {stable_mosaic.version = 11 : i64} {
  func.func @_dwconv_kernel(%arg0: i32, %arg1: i32, %arg2: memref<1x8x32xbf16, #tpu.memory_space<vmem>>, %arg3: memref<31x32xf32, #tpu.memory_space<vmem>>, %arg4: memref<1x32xf32, #tpu.memory_space<vmem>>, %arg5: memref<1x8x32xbf16, #tpu.memory_space<vmem>>, %arg6: memref<38x32xf32, #tpu.memory_space<vmem>>) attributes {dimension_semantics = [#tpu.dimension_semantics<parallel>, #tpu.dimension_semantics<parallel>], iteration_bounds = array<i64: 2, 1>, scalar_prefetch = 0 : i64, scratch_operands = 1 : i64, tpu.core_type = #tpu.core_type<tc>, window_params = [{transform_indices = @transform_0, window_bounds = array<i64: 1, 8, 32>}, {transform_indices = @transform_1, window_bounds = array<i64: 31, 32>}, {transform_indices = @transform_2, window_bounds = array<i64: 1, 32>}, {transform_indices = @transform_3, window_bounds = array<i64: 1, 8, 32>}]} {
    %cst = arith.constant 0.000000e+00 : f32
    %0 = vector.broadcast %cst : f32 to vector<38x32xf32>
    %c0 = arith.constant 0 : index
    %c0_0 = arith.constant 0 : index
    %1 = vector.load %arg6[%c0, %c0_0] : memref<38x32xf32, #tpu.memory_space<vmem>>, vector<38x32xf32>
    tpu.vector_store %arg6[%c0, %c0_0], %0 {strides = array<i32>} : memref<38x32xf32, #tpu.memory_space<vmem>>, vector<38x32xf32>,
    %c0_1 = arith.constant 0 : index
    %c0_2 = arith.constant 0 : index
    %c0_3 = arith.constant 0 : index
    %2 = vector.load %arg2[%c0_1, %c0_2, %c0_3] : memref<1x8x32xbf16, #tpu.memory_space<vmem>>, vector<1x8x32xbf16>
    %3 = vector.shape_cast %2 : vector<1x8x32xbf16> to vector<8x32xbf16>
    %4 = arith.extf %3 : vector<8x32xbf16> to vector<8x32xf32>
    %c15 = arith.constant 15 : index
    %c0_4 = arith.constant 0 : index
    %5 = vector.load %arg6[%c15, %c0_4] : memref<38x32xf32, #tpu.memory_space<vmem>>, vector<8x32xf32>
    tpu.vector_store %arg6[%c15, %c0_4], %4 {strides = array<i32>} : memref<38x32xf32, #tpu.memory_space<vmem>>, vector<8x32xf32>,
    %cst_5 = arith.constant 0.000000e+00 : f32
    %6 = vector.broadcast %cst_5 : f32 to vector<8x32xf32>
    %c0_6 = arith.constant 0 : index
    %c0_7 = arith.constant 0 : index
    %7 = vector.load %arg6[%c0_6, %c0_7] : memref<38x32xf32, #tpu.memory_space<vmem>>, vector<8x32xf32>
    %c0_8 = arith.constant 0 : index
    %c0_9 = arith.constant 0 : index
    %8 = vector.load %arg3[%c0_8, %c0_9] : memref<31x32xf32, #tpu.memory_space<vmem>>, vector<1x32xf32>
    %9 = vector.broadcast %8 : vector<1x32xf32> to vector<8x32xf32>
    %10 = arith.mulf %7, %9 : vector<8x32xf32>
    %11 = arith.addf %6, %10 : vector<8x32xf32>
    %c1 = arith.constant 1 : index
    %c0_10 = arith.constant 0 : index
    %12 = vector.load %arg6[%c1, %c0_10] : memref<38x32xf32, #tpu.memory_space<vmem>>, vector<8x32xf32>
    %c1_11 = arith.constant 1 : index
    %c0_12 = arith.constant 0 : index
    %13 = vector.load %arg3[%c1_11, %c0_12] : memref<31x32xf32, #tpu.memory_space<vmem>>, vector<1x32xf32>
    %14 = vector.broadcast %13 : vector<1x32xf32> to vector<8x32xf32>
    %15 = arith.mulf %12, %14 : vector<8x32xf32>
    %16 = arith.addf %11, %15 : vector<8x32xf32>
    %c2 = arith.constant 2 : index
    %c0_13 = arith.constant 0 : index
    %17 = vector.load %arg6[%c2, %c0_13] : memref<38x32xf32, #tpu.memory_space<vmem>>, vector<8x32xf32>
    %c2_14 = arith.constant 2 : index
    %c0_15 = arith.constant 0 : index
    %18 = vector.load %arg3[%c2_14, %c0_15] : memref<31x32xf32, #tpu.memory_space<vmem>>, vector<1x32xf32>
    %19 = vector.broadcast %18 : vector<1x32xf32> to vector<8x32xf32>
    %20 = arith.mulf %17, %19 : vector<8x32xf32>
    %21 = arith.addf %16, %20 : vector<8x32xf32>
    %c3 = arith.constant 3 : index
    %c0_16 = arith.constant 0 : index
    %22 = vector.load %arg6[%c3, %c0_16] : memref<38x32xf32, #tpu.memory_space<vmem>>, vector<8x32xf32>
    %c3_17 = arith.constant 3 : index
    %c0_18 = arith.constant 0 : index
    %23 = vector.load %arg3[%c3_17, %c0_18] : memref<31x32xf32, #tpu.memory_space<vmem>>, vector<1x32xf32>
    %24 = vector.broadcast %23 : vector<1x32xf32> to vector<8x32xf32>
    %25 = arith.mulf %22, %24 : vector<8x32xf32>
    %26 = arith.addf %21, %25 : vector<8x32xf32>
    %c4 = arith.constant 4 : index
    %c0_19 = arith.constant 0 : index
    %27 = vector.load %arg6[%c4, %c0_19] : memref<38x32xf32, #tpu.memory_space<vmem>>, vector<8x32xf32>
    %c4_20 = arith.constant 4 : index
    %c0_21 = arith.constant 0 : index
    %28 = vector.load %arg3[%c4_20, %c0_21] : memref<31x32xf32, #tpu.memory_space<vmem>>, vector<1x32xf32>
    %29 = vector.broadcast %28 : vector<1x32xf32> to vector<8x32xf32>
    %30 = arith.mulf %27, %29 : vector<8x32xf32>
    %31 = arith.addf %26, %30 : vector<8x32xf32>
    %c5 = arith.constant 5 : index
    %c0_22 = arith.constant 0 : index
    %32 = vector.load %arg6[%c5, %c0_22] : memref<38x32xf32, #tpu.memory_space<vmem>>, vector<8x32xf32>
    %c5_23 = arith.constant 5 : index
    %c0_24 = arith.constant 0 : index
    %33 = vector.load %arg3[%c5_23, %c0_24] : memref<31x32xf32, #tpu.memory_space<vmem>>, vector<1x32xf32>
    %34 = vector.broadcast %33 : vector<1x32xf32> to vector<8x32xf32>
    %35 = arith.mulf %32, %34 : vector<8x32xf32>
    %36 = arith.addf %31, %35 : vector<8x32xf32>
    %c6 = arith.constant 6 : index
    %c0_25 = arith.constant 0 : index
    %37 = vector.load %arg6[%c6, %c0_25] : memref<38x32xf32, #tpu.memory_space<vmem>>, vector<8x32xf32>
    %c6_26 = arith.constant 6 : index
    %c0_27 = arith.constant 0 : index
    %38 = vector.load %arg3[%c6_26, %c0_27] : memref<31x32xf32, #tpu.memory_space<vmem>>, vector<1x32xf32>
    %39 = vector.broadcast %38 : vector<1x32xf32> to vector<8x32xf32>
    %40 = arith.mulf %37, %39 : vector<8x32xf32>
    %41 = arith.addf %36, %40 : vector<8x32xf32>
    %c7 = arith.constant 7 : index
    %c0_28 = arith.constant 0 : index
    %42 = vector.load %arg6[%c7, %c0_28] : memref<38x32xf32, #tpu.memory_space<vmem>>, vector<8x32xf32>
    %c7_29 = arith.constant 7 : index
    %c0_30 = arith.constant 0 : index
    %43 = vector.load %arg3[%c7_29, %c0_30] : memref<31x32xf32, #tpu.memory_space<vmem>>, vector<1x32xf32>
    %44 = vector.broadcast %43 : vector<1x32xf32> to vector<8x32xf32>
    %45 = arith.mulf %42, %44 : vector<8x32xf32>
    %46 = arith.addf %41, %45 : vector<8x32xf32>
    %c8 = arith.constant 8 : index
    %c0_31 = arith.constant 0 : index
    %47 = vector.load %arg6[%c8, %c0_31] : memref<38x32xf32, #tpu.memory_space<vmem>>, vector<8x32xf32>
    %c8_32 = arith.constant 8 : index
    %c0_33 = arith.constant 0 : index
    %48 = vector.load %arg3[%c8_32, %c0_33] : memref<31x32xf32, #tpu.memory_space<vmem>>, vector<1x32xf32>
    %49 = vector.broadcast %48 : vector<1x32xf32> to vector<8x32xf32>
    %50 = arith.mulf %47, %49 : vector<8x32xf32>
    %51 = arith.addf %46, %50 : vector<8x32xf32>
    %c9 = arith.constant 9 : index
    %c0_34 = arith.constant 0 : index
    %52 = vector.load %arg6[%c9, %c0_34] : memref<38x32xf32, #tpu.memory_space<vmem>>, vector<8x32xf32>
    %c9_35 = arith.constant 9 : index
    %c0_36 = arith.constant 0 : index
    %53 = vector.load %arg3[%c9_35, %c0_36] : memref<31x32xf32, #tpu.memory_space<vmem>>, vector<1x32xf32>
    %54 = vector.broadcast %53 : vector<1x32xf32> to vector<8x32xf32>
    %55 = arith.mulf %52, %54 : vector<8x32xf32>
    %56 = arith.addf %51, %55 : vector<8x32xf32>
    %c10 = arith.constant 10 : index
    %c0_37 = arith.constant 0 : index
    %57 = vector.load %arg6[%c10, %c0_37] : memref<38x32xf32, #tpu.memory_space<vmem>>, vector<8x32xf32>
    %c10_38 = arith.constant 10 : index
    %c0_39 = arith.constant 0 : index
    %58 = vector.load %arg3[%c10_38, %c0_39] : memref<31x32xf32, #tpu.memory_space<vmem>>, vector<1x32xf32>
    %59 = vector.broadcast %58 : vector<1x32xf32> to vector<8x32xf32>
    %60 = arith.mulf %57, %59 : vector<8x32xf32>
    %61 = arith.addf %56, %60 : vector<8x32xf32>
    %c11 = arith.constant 11 : index
    %c0_40 = arith.constant 0 : index
    %62 = vector.load %arg6[%c11, %c0_40] : memref<38x32xf32, #tpu.memory_space<vmem>>, vector<8x32xf32>
    %c11_41 = arith.constant 11 : index
    %c0_42 = arith.constant 0 : index
    %63 = vector.load %arg3[%c11_41, %c0_42] : memref<31x32xf32, #tpu.memory_space<vmem>>, vector<1x32xf32>
    %64 = vector.broadcast %63 : vector<1x32xf32> to vector<8x32xf32>
    %65 = arith.mulf %62, %64 : vector<8x32xf32>
    %66 = arith.addf %61, %65 : vector<8x32xf32>
    %c12 = arith.constant 12 : index
    %c0_43 = arith.constant 0 : index
    %67 = vector.load %arg6[%c12, %c0_43] : memref<38x32xf32, #tpu.memory_space<vmem>>, vector<8x32xf32>
    %c12_44 = arith.constant 12 : index
    %c0_45 = arith.constant 0 : index
    %68 = vector.load %arg3[%c12_44, %c0_45] : memref<31x32xf32, #tpu.memory_space<vmem>>, vector<1x32xf32>
    %69 = vector.broadcast %68 : vector<1x32xf32> to vector<8x32xf32>
    %70 = arith.mulf %67, %69 : vector<8x32xf32>
    %71 = arith.addf %66, %70 : vector<8x32xf32>
    %c13 = arith.constant 13 : index
    %c0_46 = arith.constant 0 : index
    %72 = vector.load %arg6[%c13, %c0_46] : memref<38x32xf32, #tpu.memory_space<vmem>>, vector<8x32xf32>
    %c13_47 = arith.constant 13 : index
    %c0_48 = arith.constant 0 : index
    %73 = vector.load %arg3[%c13_47, %c0_48] : memref<31x32xf32, #tpu.memory_space<vmem>>, vector<1x32xf32>
    %74 = vector.broadcast %73 : vector<1x32xf32> to vector<8x32xf32>
    %75 = arith.mulf %72, %74 : vector<8x32xf32>
    %76 = arith.addf %71, %75 : vector<8x32xf32>
    %c14 = arith.constant 14 : index
    %c0_49 = arith.constant 0 : index
    %77 = vector.load %arg6[%c14, %c0_49] : memref<38x32xf32, #tpu.memory_space<vmem>>, vector<8x32xf32>
    %c14_50 = arith.constant 14 : index
    %c0_51 = arith.constant 0 : index
    %78 = vector.load %arg3[%c14_50, %c0_51] : memref<31x32xf32, #tpu.memory_space<vmem>>, vector<1x32xf32>
    %79 = vector.broadcast %78 : vector<1x32xf32> to vector<8x32xf32>
    %80 = arith.mulf %77, %79 : vector<8x32xf32>
    %81 = arith.addf %76, %80 : vector<8x32xf32>
    %c15_52 = arith.constant 15 : index
    %c0_53 = arith.constant 0 : index
    %82 = vector.load %arg6[%c15_52, %c0_53] : memref<38x32xf32, #tpu.memory_space<vmem>>, vector<8x32xf32>
    %c15_54 = arith.constant 15 : index
    %c0_55 = arith.constant 0 : index
    %83 = vector.load %arg3[%c15_54, %c0_55] : memref<31x32xf32, #tpu.memory_space<vmem>>, vector<1x32xf32>
    %84 = vector.broadcast %83 : vector<1x32xf32> to vector<8x32xf32>
    %85 = arith.mulf %82, %84 : vector<8x32xf32>
    %86 = arith.addf %81, %85 : vector<8x32xf32>
    %c16 = arith.constant 16 : index
    %c0_56 = arith.constant 0 : index
    %87 = vector.load %arg6[%c16, %c0_56] : memref<38x32xf32, #tpu.memory_space<vmem>>, vector<8x32xf32>
    %c16_57 = arith.constant 16 : index
    %c0_58 = arith.constant 0 : index
    %88 = vector.load %arg3[%c16_57, %c0_58] : memref<31x32xf32, #tpu.memory_space<vmem>>, vector<1x32xf32>
    %89 = vector.broadcast %88 : vector<1x32xf32> to vector<8x32xf32>
    %90 = arith.mulf %87, %89 : vector<8x32xf32>
    %91 = arith.addf %86, %90 : vector<8x32xf32>
    %c17 = arith.constant 17 : index
    %c0_59 = arith.constant 0 : index
    %92 = vector.load %arg6[%c17, %c0_59] : memref<38x32xf32, #tpu.memory_space<vmem>>, vector<8x32xf32>
    %c17_60 = arith.constant 17 : index
    %c0_61 = arith.constant 0 : index
    %93 = vector.load %arg3[%c17_60, %c0_61] : memref<31x32xf32, #tpu.memory_space<vmem>>, vector<1x32xf32>
    %94 = vector.broadcast %93 : vector<1x32xf32> to vector<8x32xf32>
    %95 = arith.mulf %92, %94 : vector<8x32xf32>
    %96 = arith.addf %91, %95 : vector<8x32xf32>
    %c18 = arith.constant 18 : index
    %c0_62 = arith.constant 0 : index
    %97 = vector.load %arg6[%c18, %c0_62] : memref<38x32xf32, #tpu.memory_space<vmem>>, vector<8x32xf32>
    %c18_63 = arith.constant 18 : index
    %c0_64 = arith.constant 0 : index
    %98 = vector.load %arg3[%c18_63, %c0_64] : memref<31x32xf32, #tpu.memory_space<vmem>>, vector<1x32xf32>
    %99 = vector.broadcast %98 : vector<1x32xf32> to vector<8x32xf32>
    %100 = arith.mulf %97, %99 : vector<8x32xf32>
    %101 = arith.addf %96, %100 : vector<8x32xf32>
    %c19 = arith.constant 19 : index
    %c0_65 = arith.constant 0 : index
    %102 = vector.load %arg6[%c19, %c0_65] : memref<38x32xf32, #tpu.memory_space<vmem>>, vector<8x32xf32>
    %c19_66 = arith.constant 19 : index
    %c0_67 = arith.constant 0 : index
    %103 = vector.load %arg3[%c19_66, %c0_67] : memref<31x32xf32, #tpu.memory_space<vmem>>, vector<1x32xf32>
    %104 = vector.broadcast %103 : vector<1x32xf32> to vector<8x32xf32>
    %105 = arith.mulf %102, %104 : vector<8x32xf32>
    %106 = arith.addf %101, %105 : vector<8x32xf32>
    %c20 = arith.constant 20 : index
    %c0_68 = arith.constant 0 : index
    %107 = vector.load %arg6[%c20, %c0_68] : memref<38x32xf32, #tpu.memory_space<vmem>>, vector<8x32xf32>
    %c20_69 = arith.constant 20 : index
    %c0_70 = arith.constant 0 : index
    %108 = vector.load %arg3[%c20_69, %c0_70] : memref<31x32xf32, #tpu.memory_space<vmem>>, vector<1x32xf32>
    %109 = vector.broadcast %108 : vector<1x32xf32> to vector<8x32xf32>
    %110 = arith.mulf %107, %109 : vector<8x32xf32>
    %111 = arith.addf %106, %110 : vector<8x32xf32>
    %c21 = arith.constant 21 : index
    %c0_71 = arith.constant 0 : index
    %112 = vector.load %arg6[%c21, %c0_71] : memref<38x32xf32, #tpu.memory_space<vmem>>, vector<8x32xf32>
    %c21_72 = arith.constant 21 : index
    %c0_73 = arith.constant 0 : index
    %113 = vector.load %arg3[%c21_72, %c0_73] : memref<31x32xf32, #tpu.memory_space<vmem>>, vector<1x32xf32>
    %114 = vector.broadcast %113 : vector<1x32xf32> to vector<8x32xf32>
    %115 = arith.mulf %112, %114 : vector<8x32xf32>
    %116 = arith.addf %111, %115 : vector<8x32xf32>
    %c22 = arith.constant 22 : index
    %c0_74 = arith.constant 0 : index
    %117 = vector.load %arg6[%c22, %c0_74] : memref<38x32xf32, #tpu.memory_space<vmem>>, vector<8x32xf32>
    %c22_75 = arith.constant 22 : index
    %c0_76 = arith.constant 0 : index
    %118 = vector.load %arg3[%c22_75, %c0_76] : memref<31x32xf32, #tpu.memory_space<vmem>>, vector<1x32xf32>
    %119 = vector.broadcast %118 : vector<1x32xf32> to vector<8x32xf32>
    %120 = arith.mulf %117, %119 : vector<8x32xf32>
    %121 = arith.addf %116, %120 : vector<8x32xf32>
    %c23 = arith.constant 23 : index
    %c0_77 = arith.constant 0 : index
    %122 = vector.load %arg6[%c23, %c0_77] : memref<38x32xf32, #tpu.memory_space<vmem>>, vector<8x32xf32>
    %c23_78 = arith.constant 23 : index
    %c0_79 = arith.constant 0 : index
    %123 = vector.load %arg3[%c23_78, %c0_79] : memref<31x32xf32, #tpu.memory_space<vmem>>, vector<1x32xf32>
    %124 = vector.broadcast %123 : vector<1x32xf32> to vector<8x32xf32>
    %125 = arith.mulf %122, %124 : vector<8x32xf32>
    %126 = arith.addf %121, %125 : vector<8x32xf32>
    %c24 = arith.constant 24 : index
    %c0_80 = arith.constant 0 : index
    %127 = vector.load %arg6[%c24, %c0_80] : memref<38x32xf32, #tpu.memory_space<vmem>>, vector<8x32xf32>
    %c24_81 = arith.constant 24 : index
    %c0_82 = arith.constant 0 : index
    %128 = vector.load %arg3[%c24_81, %c0_82] : memref<31x32xf32, #tpu.memory_space<vmem>>, vector<1x32xf32>
    %129 = vector.broadcast %128 : vector<1x32xf32> to vector<8x32xf32>
    %130 = arith.mulf %127, %129 : vector<8x32xf32>
    %131 = arith.addf %126, %130 : vector<8x32xf32>
    %c25 = arith.constant 25 : index
    %c0_83 = arith.constant 0 : index
    %132 = vector.load %arg6[%c25, %c0_83] : memref<38x32xf32, #tpu.memory_space<vmem>>, vector<8x32xf32>
    %c25_84 = arith.constant 25 : index
    %c0_85 = arith.constant 0 : index
    %133 = vector.load %arg3[%c25_84, %c0_85] : memref<31x32xf32, #tpu.memory_space<vmem>>, vector<1x32xf32>
    %134 = vector.broadcast %133 : vector<1x32xf32> to vector<8x32xf32>
    %135 = arith.mulf %132, %134 : vector<8x32xf32>
    %136 = arith.addf %131, %135 : vector<8x32xf32>
    %c26 = arith.constant 26 : index
    %c0_86 = arith.constant 0 : index
    %137 = vector.load %arg6[%c26, %c0_86] : memref<38x32xf32, #tpu.memory_space<vmem>>, vector<8x32xf32>
    %c26_87 = arith.constant 26 : index
    %c0_88 = arith.constant 0 : index
    %138 = vector.load %arg3[%c26_87, %c0_88] : memref<31x32xf32, #tpu.memory_space<vmem>>, vector<1x32xf32>
    %139 = vector.broadcast %138 : vector<1x32xf32> to vector<8x32xf32>
    %140 = arith.mulf %137, %139 : vector<8x32xf32>
    %141 = arith.addf %136, %140 : vector<8x32xf32>
    %c27 = arith.constant 27 : index
    %c0_89 = arith.constant 0 : index
    %142 = vector.load %arg6[%c27, %c0_89] : memref<38x32xf32, #tpu.memory_space<vmem>>, vector<8x32xf32>
    %c27_90 = arith.constant 27 : index
    %c0_91 = arith.constant 0 : index
    %143 = vector.load %arg3[%c27_90, %c0_91] : memref<31x32xf32, #tpu.memory_space<vmem>>, vector<1x32xf32>
    %144 = vector.broadcast %143 : vector<1x32xf32> to vector<8x32xf32>
    %145 = arith.mulf %142, %144 : vector<8x32xf32>
    %146 = arith.addf %141, %145 : vector<8x32xf32>
    %c28 = arith.constant 28 : index
    %c0_92 = arith.constant 0 : index
    %147 = vector.load %arg6[%c28, %c0_92] : memref<38x32xf32, #tpu.memory_space<vmem>>, vector<8x32xf32>
    %c28_93 = arith.constant 28 : index
    %c0_94 = arith.constant 0 : index
    %148 = vector.load %arg3[%c28_93, %c0_94] : memref<31x32xf32, #tpu.memory_space<vmem>>, vector<1x32xf32>
    %149 = vector.broadcast %148 : vector<1x32xf32> to vector<8x32xf32>
    %150 = arith.mulf %147, %149 : vector<8x32xf32>
    %151 = arith.addf %146, %150 : vector<8x32xf32>
    %c29 = arith.constant 29 : index
    %c0_95 = arith.constant 0 : index
    %152 = vector.load %arg6[%c29, %c0_95] : memref<38x32xf32, #tpu.memory_space<vmem>>, vector<8x32xf32>
    %c29_96 = arith.constant 29 : index
    %c0_97 = arith.constant 0 : index
    %153 = vector.load %arg3[%c29_96, %c0_97] : memref<31x32xf32, #tpu.memory_space<vmem>>, vector<1x32xf32>
    %154 = vector.broadcast %153 : vector<1x32xf32> to vector<8x32xf32>
    %155 = arith.mulf %152, %154 : vector<8x32xf32>
    %156 = arith.addf %151, %155 : vector<8x32xf32>
    %c30 = arith.constant 30 : index
    %c0_98 = arith.constant 0 : index
    %157 = vector.load %arg6[%c30, %c0_98] : memref<38x32xf32, #tpu.memory_space<vmem>>, vector<8x32xf32>
    %c30_99 = arith.constant 30 : index
    %c0_100 = arith.constant 0 : index
    %158 = vector.load %arg3[%c30_99, %c0_100] : memref<31x32xf32, #tpu.memory_space<vmem>>, vector<1x32xf32>
    %159 = vector.broadcast %158 : vector<1x32xf32> to vector<8x32xf32>
    %160 = arith.mulf %157, %159 : vector<8x32xf32>
    %161 = arith.addf %156, %160 : vector<8x32xf32>
    %c0_101 = arith.constant 0 : index
    %c0_102 = arith.constant 0 : index
    %162 = vector.load %arg4[%c0_101, %c0_102] : memref<1x32xf32, #tpu.memory_space<vmem>>, vector<1x32xf32>
    %163 = vector.broadcast %162 : vector<1x32xf32> to vector<8x32xf32>
    %164 = arith.addf %161, %163 : vector<8x32xf32>
    %165 = arith.negf %164 : vector<8x32xf32>
    %166 = math.exp %165 : vector<8x32xf32>
    %cst_103 = arith.constant 1.000000e+00 : f32
    %167 = vector.broadcast %cst_103 : f32 to vector<8x32xf32>
    %168 = arith.addf %167, %166 : vector<8x32xf32>
    %169 = arith.divf %167, %168 : vector<8x32xf32>
    %170 = arith.mulf %164, %169 : vector<8x32xf32>
    %171 = arith.truncf %170 : vector<8x32xf32> to vector<8x32xbf16>
    %c0_104 = arith.constant 0 : index
    %c0_105 = arith.constant 0 : index
    %c0_106 = arith.constant 0 : index
    %172 = vector.load %arg5[%c0_104, %c0_105, %c0_106] : memref<1x8x32xbf16, #tpu.memory_space<vmem>>, vector<1x8x32xbf16>
    %173 = vector.shape_cast %172 : vector<1x8x32xbf16> to vector<8x32xbf16>
    %174 = vector.shape_cast %171 : vector<8x32xbf16> to vector<1x8x32xbf16>
    tpu.vector_store %arg5[%c0_104, %c0_105, %c0_106], %174 {strides = array<i32>} : memref<1x8x32xbf16, #tpu.memory_space<vmem>>, vector<1x8x32xbf16>,
    return
  }
  func.func @transform_0(%arg0: i32, %arg1: i32) -> (i32, i32, i32) {
    %c0_i32 = arith.constant 0 : i32
    %c0_i32_0 = arith.constant 0 : i32
    return %arg0, %c0_i32, %arg1 : i32, i32, i32
  }
  func.func @transform_1(%arg0: i32, %arg1: i32) -> (i32, i32) {
    %c0_i32 = arith.constant 0 : i32
    %c0_i32_0 = arith.constant 0 : i32
    return %c0_i32, %arg1 : i32, i32
  }
  func.func @transform_2(%arg0: i32, %arg1: i32) -> (i32, i32) {
    %c0_i32 = arith.constant 0 : i32
    %c0_i32_0 = arith.constant 0 : i32
    return %c0_i32, %arg1 : i32, i32
  }
  func.func @transform_3(%arg0: i32, %arg1: i32) -> (i32, i32, i32) {
    %c0_i32 = arith.constant 0 : i32
    %c0_i32_0 = arith.constant 0 : i32
    return %arg0, %c0_i32, %arg1 : i32, i32, i32
  }
}

module attributes {stable_mosaic.version = 11 : i64} {
  func.func @_linear_kernel(%arg0: i32, %arg1: i32, %arg2: i32, %arg3: memref<8x32xbf16, #tpu.memory_space<vmem>>, %arg4: memref<32x128xbf16, #tpu.memory_space<vmem>>, %arg5: memref<1x128xf32, #tpu.memory_space<vmem>>, %arg6: memref<1x32xf32, #tpu.memory_space<vmem>>, %arg7: memref<1x32xf32, #tpu.memory_space<vmem>>, %arg8: memref<8x128xbf16, #tpu.memory_space<vmem>>, %arg9: memref<8x128xf32, #tpu.memory_space<vmem>>) attributes {dimension_semantics = [#tpu.dimension_semantics<parallel>, #tpu.dimension_semantics<parallel>, #tpu.dimension_semantics<arbitrary>], iteration_bounds = array<i64: 2, 1, 1>, scalar_prefetch = 0 : i64, scratch_operands = 1 : i64, tpu.core_type = #tpu.core_type<tc>, window_params = [{transform_indices = @transform_0, window_bounds = array<i64: 8, 32>}, {transform_indices = @transform_1, window_bounds = array<i64: 32, 128>}, {transform_indices = @transform_2, window_bounds = array<i64: 1, 128>}, {transform_indices = @transform_3, window_bounds = array<i64: 1, 32>}, {transform_indices = @transform_4, window_bounds = array<i64: 1, 32>}, {transform_indices = @transform_5, window_bounds = array<i64: 8, 128>}]} {
    %c0_i32 = arith.constant 0 : i32
    %0 = arith.cmpi eq, %arg2, %c0_i32 : i32
    %1 = arith.extui %0 : i1 to i32
    %c0_i32_0 = arith.constant 0 : i32
    %2 = arith.cmpi ne, %1, %c0_i32_0 : i32
    scf.if %2 {
      %cst_19 = arith.constant 0.000000e+00 : f32
      %38 = vector.broadcast %cst_19 : f32 to vector<8x128xf32>
      %c0_20 = arith.constant 0 : index
      %c0_21 = arith.constant 0 : index
      %39 = vector.load %arg9[%c0_20, %c0_21] : memref<8x128xf32, #tpu.memory_space<vmem>>, vector<8x128xf32>
      tpu.vector_store %arg9[%c0_20, %c0_21], %38 {strides = array<i32>} : memref<8x128xf32, #tpu.memory_space<vmem>>, vector<8x128xf32>,
    } else {
    }
    %c0 = arith.constant 0 : index
    %c0_1 = arith.constant 0 : index
    %3 = vector.load %arg3[%c0, %c0_1] : memref<8x32xbf16, #tpu.memory_space<vmem>>, vector<8x32xbf16>
    %4 = arith.extf %3 : vector<8x32xbf16> to vector<8x32xf32>
    %cst = arith.constant dense<0.000000e+00> : vector<8xf32>
    %5 = vector.multi_reduction <add>, %4, %cst [1] : vector<8x32xf32> to vector<8xf32>
    %6 = vector.shape_cast %5 : vector<8xf32> to vector<8x1xf32>
    %cst_2 = arith.constant 3.200000e+01 : f32
    %7 = vector.broadcast %cst_2 : f32 to vector<8x1xf32>
    %8 = arith.divf %6, %7 : vector<8x1xf32>
    %9 = vector.broadcast %8 : vector<8x1xf32> to vector<8x32xf32>
    %10 = arith.subf %4, %9 : vector<8x32xf32>
    %11 = arith.mulf %10, %10 : vector<8x32xf32>
    %cst_3 = arith.constant dense<0.000000e+00> : vector<8xf32>
    %12 = vector.multi_reduction <add>, %11, %cst_3 [1] : vector<8x32xf32> to vector<8xf32>
    %13 = vector.shape_cast %12 : vector<8xf32> to vector<8x1xf32>
    %cst_4 = arith.constant 3.200000e+01 : f32
    %14 = vector.broadcast %cst_4 : f32 to vector<8x1xf32>
    %15 = arith.divf %13, %14 : vector<8x1xf32>
    %16 = vector.broadcast %8 : vector<8x1xf32> to vector<8x32xf32>
    %17 = arith.subf %4, %16 : vector<8x32xf32>
    %cst_5 = arith.constant 9.99999974E-6 : f32
    %18 = vector.broadcast %cst_5 : f32 to vector<8x1xf32>
    %19 = arith.addf %15, %18 : vector<8x1xf32>
    %20 = math.rsqrt %19 : vector<8x1xf32>
    %21 = vector.broadcast %20 : vector<8x1xf32> to vector<8x32xf32>
    %22 = arith.mulf %17, %21 : vector<8x32xf32>
    %c0_6 = arith.constant 0 : index
    %c0_7 = arith.constant 0 : index
    %23 = vector.load %arg6[%c0_6, %c0_7] : memref<1x32xf32, #tpu.memory_space<vmem>>, vector<1x32xf32>
    %24 = vector.broadcast %23 : vector<1x32xf32> to vector<8x32xf32>
    %25 = arith.mulf %22, %24 : vector<8x32xf32>
    %c0_8 = arith.constant 0 : index
    %c0_9 = arith.constant 0 : index
    %26 = vector.load %arg7[%c0_8, %c0_9] : memref<1x32xf32, #tpu.memory_space<vmem>>, vector<1x32xf32>
    %27 = vector.broadcast %26 : vector<1x32xf32> to vector<8x32xf32>
    %28 = arith.addf %25, %27 : vector<8x32xf32>
    %29 = arith.truncf %28 : vector<8x32xf32> to vector<8x32xbf16>
    %c0_10 = arith.constant 0 : index
    %c0_11 = arith.constant 0 : index
    %30 = vector.load %arg9[%c0_10, %c0_11] : memref<8x128xf32, #tpu.memory_space<vmem>>, vector<8x128xf32>
    %c0_12 = arith.constant 0 : index
    %c0_13 = arith.constant 0 : index
    %31 = vector.load %arg4[%c0_12, %c0_13] : memref<32x128xbf16, #tpu.memory_space<vmem>>, vector<32x128xbf16>
    %cst_14 = arith.constant dense<0.000000e+00> : vector<8x128xf32>
    %32 = tpu.matmul %29, %31, %cst_14 {dimension_numbers = #tpu.dot_dimension_numbers<[1], [0], [0], [1], [0, 0, 1, 1], [], []>} : vector<8x32xbf16>, vector<32x128xbf16>, vector<8x128xf32> -> vector<8x128xf32>
    %33 = arith.addf %30, %32 : vector<8x128xf32>
    %c0_15 = arith.constant 0 : index
    %c0_16 = arith.constant 0 : index
    %34 = vector.load %arg9[%c0_15, %c0_16] : memref<8x128xf32, #tpu.memory_space<vmem>>, vector<8x128xf32>
    tpu.vector_store %arg9[%c0_15, %c0_16], %33 {strides = array<i32>} : memref<8x128xf32, #tpu.memory_space<vmem>>, vector<8x128xf32>,
    %c0_i32_17 = arith.constant 0 : i32
    %35 = arith.cmpi eq, %arg2, %c0_i32_17 : i32
    %36 = arith.extui %35 : i1 to i32
    %c0_i32_18 = arith.constant 0 : i32
    %37 = arith.cmpi ne, %36, %c0_i32_18 : i32
    scf.if %37 {
      %c0_19 = arith.constant 0 : index
      %c0_20 = arith.constant 0 : index
      %38 = vector.load %arg9[%c0_19, %c0_20] : memref<8x128xf32, #tpu.memory_space<vmem>>, vector<8x128xf32>
      %c0_21 = arith.constant 0 : index
      %c0_22 = arith.constant 0 : index
      %39 = vector.load %arg5[%c0_21, %c0_22] : memref<1x128xf32, #tpu.memory_space<vmem>>, vector<1x128xf32>
      %40 = vector.broadcast %39 : vector<1x128xf32> to vector<8x128xf32>
      %41 = arith.addf %38, %40 : vector<8x128xf32>
      %42 = arith.negf %41 : vector<8x128xf32>
      %43 = math.exp %42 : vector<8x128xf32>
      %cst_23 = arith.constant 1.000000e+00 : f32
      %44 = vector.broadcast %cst_23 : f32 to vector<8x128xf32>
      %45 = arith.addf %44, %43 : vector<8x128xf32>
      %46 = arith.divf %44, %45 : vector<8x128xf32>
      %47 = arith.mulf %41, %46 : vector<8x128xf32>
      %48 = arith.truncf %47 : vector<8x128xf32> to vector<8x128xbf16>
      %c0_24 = arith.constant 0 : index
      %c0_25 = arith.constant 0 : index
      %49 = vector.load %arg8[%c0_24, %c0_25] : memref<8x128xbf16, #tpu.memory_space<vmem>>, vector<8x128xbf16>
      tpu.vector_store %arg8[%c0_24, %c0_25], %48 {strides = array<i32>} : memref<8x128xbf16, #tpu.memory_space<vmem>>, vector<8x128xbf16>,
    } else {
    }
    return
  }
  func.func @transform_0(%arg0: i32, %arg1: i32, %arg2: i32) -> (i32, i32) {
    %c0_i32 = arith.constant 0 : i32
    return %arg0, %arg2 : i32, i32
  }
  func.func @transform_1(%arg0: i32, %arg1: i32, %arg2: i32) -> (i32, i32) {
    %c0_i32 = arith.constant 0 : i32
    return %arg2, %arg1 : i32, i32
  }
  func.func @transform_2(%arg0: i32, %arg1: i32, %arg2: i32) -> (i32, i32) {
    %c0_i32 = arith.constant 0 : i32
    %c0_i32_0 = arith.constant 0 : i32
    return %c0_i32, %arg1 : i32, i32
  }
  func.func @transform_3(%arg0: i32, %arg1: i32, %arg2: i32) -> (i32, i32) {
    %c0_i32 = arith.constant 0 : i32
    %c0_i32_0 = arith.constant 0 : i32
    return %c0_i32, %arg2 : i32, i32
  }
  func.func @transform_4(%arg0: i32, %arg1: i32, %arg2: i32) -> (i32, i32) {
    %c0_i32 = arith.constant 0 : i32
    %c0_i32_0 = arith.constant 0 : i32
    return %c0_i32, %arg2 : i32, i32
  }
  func.func @transform_5(%arg0: i32, %arg1: i32, %arg2: i32) -> (i32, i32) {
    %c0_i32 = arith.constant 0 : i32
    return %arg0, %arg1 : i32, i32
  }
}

module attributes {stable_mosaic.version = 11 : i64} {
  func.func @_linear_kernel(%arg0: i32, %arg1: i32, %arg2: i32, %arg3: memref<8x128xbf16, #tpu.memory_space<vmem>>, %arg4: memref<128x32xbf16, #tpu.memory_space<vmem>>, %arg5: memref<1x32xf32, #tpu.memory_space<vmem>>, %arg6: memref<8x32xbf16, #tpu.memory_space<vmem>>, %arg7: memref<8x32xbf16, #tpu.memory_space<vmem>>, %arg8: memref<8x32xf32, #tpu.memory_space<vmem>>) attributes {dimension_semantics = [#tpu.dimension_semantics<parallel>, #tpu.dimension_semantics<parallel>, #tpu.dimension_semantics<arbitrary>], iteration_bounds = array<i64: 2, 1, 1>, scalar_prefetch = 0 : i64, scratch_operands = 1 : i64, tpu.core_type = #tpu.core_type<tc>, window_params = [{transform_indices = @transform_0, window_bounds = array<i64: 8, 128>}, {transform_indices = @transform_1, window_bounds = array<i64: 128, 32>}, {transform_indices = @transform_2, window_bounds = array<i64: 1, 32>}, {transform_indices = @transform_3, window_bounds = array<i64: 8, 32>}, {transform_indices = @transform_4, window_bounds = array<i64: 8, 32>}]} {
    %c0_i32 = arith.constant 0 : i32
    %0 = arith.cmpi eq, %arg2, %c0_i32 : i32
    %1 = arith.extui %0 : i1 to i32
    %c0_i32_0 = arith.constant 0 : i32
    %2 = arith.cmpi ne, %1, %c0_i32_0 : i32
    scf.if %2 {
      %cst_10 = arith.constant 0.000000e+00 : f32
      %12 = vector.broadcast %cst_10 : f32 to vector<8x32xf32>
      %c0_11 = arith.constant 0 : index
      %c0_12 = arith.constant 0 : index
      %13 = vector.load %arg8[%c0_11, %c0_12] : memref<8x32xf32, #tpu.memory_space<vmem>>, vector<8x32xf32>
      tpu.vector_store %arg8[%c0_11, %c0_12], %12 {strides = array<i32>} : memref<8x32xf32, #tpu.memory_space<vmem>>, vector<8x32xf32>,
    } else {
    }
    %c0 = arith.constant 0 : index
    %c0_1 = arith.constant 0 : index
    %3 = vector.load %arg3[%c0, %c0_1] : memref<8x128xbf16, #tpu.memory_space<vmem>>, vector<8x128xbf16>
    %c0_2 = arith.constant 0 : index
    %c0_3 = arith.constant 0 : index
    %4 = vector.load %arg8[%c0_2, %c0_3] : memref<8x32xf32, #tpu.memory_space<vmem>>, vector<8x32xf32>
    %c0_4 = arith.constant 0 : index
    %c0_5 = arith.constant 0 : index
    %5 = vector.load %arg4[%c0_4, %c0_5] : memref<128x32xbf16, #tpu.memory_space<vmem>>, vector<128x32xbf16>
    %cst = arith.constant dense<0.000000e+00> : vector<8x32xf32>
    %6 = tpu.matmul %3, %5, %cst {dimension_numbers = #tpu.dot_dimension_numbers<[1], [0], [0], [1], [0, 0, 1, 1], [], []>} : vector<8x128xbf16>, vector<128x32xbf16>, vector<8x32xf32> -> vector<8x32xf32>
    %7 = arith.addf %4, %6 : vector<8x32xf32>
    %c0_6 = arith.constant 0 : index
    %c0_7 = arith.constant 0 : index
    %8 = vector.load %arg8[%c0_6, %c0_7] : memref<8x32xf32, #tpu.memory_space<vmem>>, vector<8x32xf32>
    tpu.vector_store %arg8[%c0_6, %c0_7], %7 {strides = array<i32>} : memref<8x32xf32, #tpu.memory_space<vmem>>, vector<8x32xf32>,
    %c0_i32_8 = arith.constant 0 : i32
    %9 = arith.cmpi eq, %arg2, %c0_i32_8 : i32
    %10 = arith.extui %9 : i1 to i32
    %c0_i32_9 = arith.constant 0 : i32
    %11 = arith.cmpi ne, %10, %c0_i32_9 : i32
    scf.if %11 {
      %c0_10 = arith.constant 0 : index
      %c0_11 = arith.constant 0 : index
      %12 = vector.load %arg8[%c0_10, %c0_11] : memref<8x32xf32, #tpu.memory_space<vmem>>, vector<8x32xf32>
      %c0_12 = arith.constant 0 : index
      %c0_13 = arith.constant 0 : index
      %13 = vector.load %arg5[%c0_12, %c0_13] : memref<1x32xf32, #tpu.memory_space<vmem>>, vector<1x32xf32>
      %14 = vector.broadcast %13 : vector<1x32xf32> to vector<8x32xf32>
      %15 = arith.addf %12, %14 : vector<8x32xf32>
      %c0_14 = arith.constant 0 : index
      %c0_15 = arith.constant 0 : index
      %16 = vector.load %arg6[%c0_14, %c0_15] : memref<8x32xbf16, #tpu.memory_space<vmem>>, vector<8x32xbf16>
      %17 = arith.extf %16 : vector<8x32xbf16> to vector<8x32xf32>
      %cst_16 = arith.constant 5.000000e-01 : f32
      %18 = vector.broadcast %cst_16 : f32 to vector<8x32xf32>
      %19 = arith.mulf %18, %15 : vector<8x32xf32>
      %20 = arith.addf %17, %19 : vector<8x32xf32>
      %21 = arith.truncf %20 : vector<8x32xf32> to vector<8x32xbf16>
      %c0_17 = arith.constant 0 : index
      %c0_18 = arith.constant 0 : index
      %22 = vector.load %arg7[%c0_17, %c0_18] : memref<8x32xbf16, #tpu.memory_space<vmem>>, vector<8x32xbf16>
      tpu.vector_store %arg7[%c0_17, %c0_18], %21 {strides = array<i32>} : memref<8x32xbf16, #tpu.memory_space<vmem>>, vector<8x32xbf16>,
    } else {
    }
    return
  }
  func.func @transform_0(%arg0: i32, %arg1: i32, %arg2: i32) -> (i32, i32) {
    %c0_i32 = arith.constant 0 : i32
    return %arg0, %arg2 : i32, i32
  }
  func.func @transform_1(%arg0: i32, %arg1: i32, %arg2: i32) -> (i32, i32) {
    %c0_i32 = arith.constant 0 : i32
    return %arg2, %arg1 : i32, i32
  }
  func.func @transform_2(%arg0: i32, %arg1: i32, %arg2: i32) -> (i32, i32) {
    %c0_i32 = arith.constant 0 : i32
    %c0_i32_0 = arith.constant 0 : i32
    return %c0_i32, %arg1 : i32, i32
  }
  func.func @transform_3(%arg0: i32, %arg1: i32, %arg2: i32) -> (i32, i32) {
    %c0_i32 = arith.constant 0 : i32
    return %arg0, %arg1 : i32, i32
  }
  func.func @transform_4(%arg0: i32, %arg1: i32, %arg2: i32) -> (i32, i32) {
    %c0_i32 = arith.constant 0 : i32
    return %arg0, %arg1 : i32, i32
  }
}

module attributes {stable_mosaic.version = 11 : i64} {
  func.func @_ln_mean_pool_kernel(%arg0: i32, %arg1: memref<1x8x32xbf16, #tpu.memory_space<vmem>>, %arg2: memref<1x32xf32, #tpu.memory_space<vmem>>, %arg3: memref<1x32xf32, #tpu.memory_space<vmem>>, %arg4: memref<1x1x32xf32, #tpu.memory_space<vmem>>) attributes {dimension_semantics = [#tpu.dimension_semantics<parallel>], iteration_bounds = array<i64: 2>, scalar_prefetch = 0 : i64, scratch_operands = 0 : i64, tpu.core_type = #tpu.core_type<tc>, window_params = [{transform_indices = @transform_0, window_bounds = array<i64: 1, 8, 32>}, {pipeline_mode = #tpu.pipeline_mode<synchronous>, transform_indices = @transform_1, window_bounds = array<i64: 1, 32>}, {pipeline_mode = #tpu.pipeline_mode<synchronous>, transform_indices = @transform_2, window_bounds = array<i64: 1, 32>}, {transform_indices = @transform_3, window_bounds = array<i64: 1, 1, 32>}]} {
    %c0 = arith.constant 0 : index
    %c0_0 = arith.constant 0 : index
    %c0_1 = arith.constant 0 : index
    %0 = vector.load %arg1[%c0, %c0_0, %c0_1] : memref<1x8x32xbf16, #tpu.memory_space<vmem>>, vector<1x8x32xbf16>
    %1 = vector.shape_cast %0 : vector<1x8x32xbf16> to vector<8x32xbf16>
    %2 = arith.extf %1 : vector<8x32xbf16> to vector<8x32xf32>
    %cst = arith.constant dense<0.000000e+00> : vector<8xf32>
    %3 = vector.multi_reduction <add>, %2, %cst [1] : vector<8x32xf32> to vector<8xf32>
    %4 = vector.shape_cast %3 : vector<8xf32> to vector<8x1xf32>
    %cst_2 = arith.constant 3.200000e+01 : f32
    %5 = vector.broadcast %cst_2 : f32 to vector<8x1xf32>
    %6 = arith.divf %4, %5 : vector<8x1xf32>
    %7 = vector.broadcast %6 : vector<8x1xf32> to vector<8x32xf32>
    %8 = arith.subf %2, %7 : vector<8x32xf32>
    %9 = arith.mulf %8, %8 : vector<8x32xf32>
    %cst_3 = arith.constant dense<0.000000e+00> : vector<8xf32>
    %10 = vector.multi_reduction <add>, %9, %cst_3 [1] : vector<8x32xf32> to vector<8xf32>
    %11 = vector.shape_cast %10 : vector<8xf32> to vector<8x1xf32>
    %cst_4 = arith.constant 3.200000e+01 : f32
    %12 = vector.broadcast %cst_4 : f32 to vector<8x1xf32>
    %13 = arith.divf %11, %12 : vector<8x1xf32>
    %14 = vector.broadcast %6 : vector<8x1xf32> to vector<8x32xf32>
    %15 = arith.subf %2, %14 : vector<8x32xf32>
    %cst_5 = arith.constant 9.99999974E-6 : f32
    %16 = vector.broadcast %cst_5 : f32 to vector<8x1xf32>
    %17 = arith.addf %13, %16 : vector<8x1xf32>
    %18 = math.rsqrt %17 : vector<8x1xf32>
    %19 = vector.broadcast %18 : vector<8x1xf32> to vector<8x32xf32>
    %20 = arith.mulf %15, %19 : vector<8x32xf32>
    %c0_6 = arith.constant 0 : index
    %c0_7 = arith.constant 0 : index
    %21 = vector.load %arg2[%c0_6, %c0_7] : memref<1x32xf32, #tpu.memory_space<vmem>>, vector<1x32xf32>
    %22 = vector.broadcast %21 : vector<1x32xf32> to vector<8x32xf32>
    %23 = arith.mulf %20, %22 : vector<8x32xf32>
    %c0_8 = arith.constant 0 : index
    %c0_9 = arith.constant 0 : index
    %24 = vector.load %arg3[%c0_8, %c0_9] : memref<1x32xf32, #tpu.memory_space<vmem>>, vector<1x32xf32>
    %25 = vector.broadcast %24 : vector<1x32xf32> to vector<8x32xf32>
    %26 = arith.addf %23, %25 : vector<8x32xf32>
    %cst_10 = arith.constant dense<0.000000e+00> : vector<32xf32>
    %27 = vector.multi_reduction <add>, %26, %cst_10 [0] : vector<8x32xf32> to vector<32xf32>
    %28 = vector.shape_cast %27 : vector<32xf32> to vector<1x32xf32>
    %cst_11 = arith.constant 8.000000e+00 : f32
    %29 = vector.broadcast %cst_11 : f32 to vector<1x32xf32>
    %30 = arith.divf %28, %29 : vector<1x32xf32>
    %c0_12 = arith.constant 0 : index
    %c0_13 = arith.constant 0 : index
    %c0_14 = arith.constant 0 : index
    %31 = vector.load %arg4[%c0_12, %c0_13, %c0_14] : memref<1x1x32xf32, #tpu.memory_space<vmem>>, vector<1x1x32xf32>
    %32 = vector.shape_cast %31 : vector<1x1x32xf32> to vector<1x32xf32>
    %33 = vector.shape_cast %30 : vector<1x32xf32> to vector<1x1x32xf32>
    tpu.vector_store %arg4[%c0_12, %c0_13, %c0_14], %33 {strides = array<i32>} : memref<1x1x32xf32, #tpu.memory_space<vmem>>, vector<1x1x32xf32>,
    return
  }
  func.func @transform_0(%arg0: i32) -> (i32, i32, i32) {
    %c0_i32 = arith.constant 0 : i32
    %c0_i32_0 = arith.constant 0 : i32
    %c0_i32_1 = arith.constant 0 : i32
    return %arg0, %c0_i32, %c0_i32_0 : i32, i32, i32
  }
  func.func @transform_1(%arg0: i32) -> (i32, i32) {
    %c0_i32 = arith.constant 0 : i32
    %c0_i32_0 = arith.constant 0 : i32
    %c0_i32_1 = arith.constant 0 : i32
    return %c0_i32, %c0_i32_0 : i32, i32
  }
  func.func @transform_2(%arg0: i32) -> (i32, i32) {
    %c0_i32 = arith.constant 0 : i32
    %c0_i32_0 = arith.constant 0 : i32
    %c0_i32_1 = arith.constant 0 : i32
    return %c0_i32, %c0_i32_0 : i32, i32
  }
  func.func @transform_3(%arg0: i32) -> (i32, i32, i32) {
    %c0_i32 = arith.constant 0 : i32
    %c0_i32_0 = arith.constant 0 : i32
    %c0_i32_1 = arith.constant 0 : i32
    return %arg0, %c0_i32, %c0_i32_0 : i32, i32, i32
  }
}

module attributes {stable_mosaic.version = 11 : i64} {
  func.func @_linear_kernel(%arg0: i32, %arg1: i32, %arg2: i32, %arg3: memref<2x32xf32, #tpu.memory_space<vmem>>, %arg4: memref<32x32xbf16, #tpu.memory_space<vmem>>, %arg5: memref<1x32xf32, #tpu.memory_space<vmem>>, %arg6: memref<2x32xf32, #tpu.memory_space<vmem>>, %arg7: memref<2x32xf32, #tpu.memory_space<vmem>>) attributes {dimension_semantics = [#tpu.dimension_semantics<parallel>, #tpu.dimension_semantics<parallel>, #tpu.dimension_semantics<arbitrary>], iteration_bounds = array<i64: 1, 1, 1>, scalar_prefetch = 0 : i64, scratch_operands = 1 : i64, tpu.core_type = #tpu.core_type<tc>, window_params = [{transform_indices = @transform_0, window_bounds = array<i64: 2, 32>}, {transform_indices = @transform_1, window_bounds = array<i64: 32, 32>}, {transform_indices = @transform_2, window_bounds = array<i64: 1, 32>}, {transform_indices = @transform_3, window_bounds = array<i64: 2, 32>}]} {
    %c0_i32 = arith.constant 0 : i32
    %0 = arith.cmpi eq, %arg2, %c0_i32 : i32
    %1 = arith.extui %0 : i1 to i32
    %c0_i32_0 = arith.constant 0 : i32
    %2 = arith.cmpi ne, %1, %c0_i32_0 : i32
    scf.if %2 {
      %cst_10 = arith.constant 0.000000e+00 : f32
      %13 = vector.broadcast %cst_10 : f32 to vector<2x32xf32>
      %c0_11 = arith.constant 0 : index
      %c0_12 = arith.constant 0 : index
      %14 = vector.load %arg7[%c0_11, %c0_12] : memref<2x32xf32, #tpu.memory_space<vmem>>, vector<2x32xf32>
      tpu.vector_store %arg7[%c0_11, %c0_12], %13 {strides = array<i32>} : memref<2x32xf32, #tpu.memory_space<vmem>>, vector<2x32xf32>,
    } else {
    }
    %c0 = arith.constant 0 : index
    %c0_1 = arith.constant 0 : index
    %3 = vector.load %arg3[%c0, %c0_1] : memref<2x32xf32, #tpu.memory_space<vmem>>, vector<2x32xf32>
    %4 = arith.truncf %3 : vector<2x32xf32> to vector<2x32xbf16>
    %c0_2 = arith.constant 0 : index
    %c0_3 = arith.constant 0 : index
    %5 = vector.load %arg7[%c0_2, %c0_3] : memref<2x32xf32, #tpu.memory_space<vmem>>, vector<2x32xf32>
    %c0_4 = arith.constant 0 : index
    %c0_5 = arith.constant 0 : index
    %6 = vector.load %arg4[%c0_4, %c0_5] : memref<32x32xbf16, #tpu.memory_space<vmem>>, vector<32x32xbf16>
    %cst = arith.constant dense<0.000000e+00> : vector<2x32xf32>
    %7 = tpu.matmul %4, %6, %cst {dimension_numbers = #tpu.dot_dimension_numbers<[1], [0], [0], [1], [0, 0, 1, 1], [], []>} : vector<2x32xbf16>, vector<32x32xbf16>, vector<2x32xf32> -> vector<2x32xf32>
    %8 = arith.addf %5, %7 : vector<2x32xf32>
    %c0_6 = arith.constant 0 : index
    %c0_7 = arith.constant 0 : index
    %9 = vector.load %arg7[%c0_6, %c0_7] : memref<2x32xf32, #tpu.memory_space<vmem>>, vector<2x32xf32>
    tpu.vector_store %arg7[%c0_6, %c0_7], %8 {strides = array<i32>} : memref<2x32xf32, #tpu.memory_space<vmem>>, vector<2x32xf32>,
    %c0_i32_8 = arith.constant 0 : i32
    %10 = arith.cmpi eq, %arg2, %c0_i32_8 : i32
    %11 = arith.extui %10 : i1 to i32
    %c0_i32_9 = arith.constant 0 : i32
    %12 = arith.cmpi ne, %11, %c0_i32_9 : i32
    scf.if %12 {
      %c0_10 = arith.constant 0 : index
      %c0_11 = arith.constant 0 : index
      %13 = vector.load %arg7[%c0_10, %c0_11] : memref<2x32xf32, #tpu.memory_space<vmem>>, vector<2x32xf32>
      %c0_12 = arith.constant 0 : index
      %c0_13 = arith.constant 0 : index
      %14 = vector.load %arg5[%c0_12, %c0_13] : memref<1x32xf32, #tpu.memory_space<vmem>>, vector<1x32xf32>
      %15 = vector.broadcast %14 : vector<1x32xf32> to vector<2x32xf32>
      %16 = arith.addf %13, %15 : vector<2x32xf32>
      %c0_14 = arith.constant 0 : index
      %c0_15 = arith.constant 0 : index
      %17 = vector.load %arg6[%c0_14, %c0_15] : memref<2x32xf32, #tpu.memory_space<vmem>>, vector<2x32xf32>
      tpu.vector_store %arg6[%c0_14, %c0_15], %16 {strides = array<i32>} : memref<2x32xf32, #tpu.memory_space<vmem>>, vector<2x32xf32>,
    } else {
    }
    return
  }
  func.func @transform_0(%arg0: i32, %arg1: i32, %arg2: i32) -> (i32, i32) {
    %c0_i32 = arith.constant 0 : i32
    return %arg0, %arg2 : i32, i32
  }
  func.func @transform_1(%arg0: i32, %arg1: i32, %arg2: i32) -> (i32, i32) {
    %c0_i32 = arith.constant 0 : i32
    return %arg2, %arg1 : i32, i32
  }
  func.func @transform_2(%arg0: i32, %arg1: i32, %arg2: i32) -> (i32, i32) {
    %c0_i32 = arith.constant 0 : i32
    %c0_i32_0 = arith.constant 0 : i32
    return %c0_i32, %arg1 : i32, i32
  }
  func.func @transform_3(%arg0: i32, %arg1: i32, %arg2: i32) -> (i32, i32) {
    %c0_i32 = arith.constant 0 : i32
    return %arg0, %arg1 : i32, i32
  }
}

module attributes {stable_mosaic.version = 11 : i64} {
  func.func @_linear_kernel(%arg0: i32, %arg1: i32, %arg2: i32, %arg3: memref<2x32xf32, #tpu.memory_space<vmem>>, %arg4: memref<32x128xbf16, #tpu.memory_space<vmem>>, %arg5: memref<1x128xf32, #tpu.memory_space<vmem>>, %arg6: memref<2x128xf32, #tpu.memory_space<vmem>>, %arg7: memref<2x128xf32, #tpu.memory_space<vmem>>) attributes {dimension_semantics = [#tpu.dimension_semantics<parallel>, #tpu.dimension_semantics<parallel>, #tpu.dimension_semantics<arbitrary>], iteration_bounds = array<i64: 1, 1, 1>, scalar_prefetch = 0 : i64, scratch_operands = 1 : i64, tpu.core_type = #tpu.core_type<tc>, window_params = [{transform_indices = @transform_0, window_bounds = array<i64: 2, 32>}, {transform_indices = @transform_1, window_bounds = array<i64: 32, 128>}, {transform_indices = @transform_2, window_bounds = array<i64: 1, 128>}, {transform_indices = @transform_3, window_bounds = array<i64: 2, 128>}]} {
    %c0_i32 = arith.constant 0 : i32
    %0 = arith.cmpi eq, %arg2, %c0_i32 : i32
    %1 = arith.extui %0 : i1 to i32
    %c0_i32_0 = arith.constant 0 : i32
    %2 = arith.cmpi ne, %1, %c0_i32_0 : i32
    scf.if %2 {
      %cst_10 = arith.constant 0.000000e+00 : f32
      %13 = vector.broadcast %cst_10 : f32 to vector<2x128xf32>
      %c0_11 = arith.constant 0 : index
      %c0_12 = arith.constant 0 : index
      %14 = vector.load %arg7[%c0_11, %c0_12] : memref<2x128xf32, #tpu.memory_space<vmem>>, vector<2x128xf32>
      tpu.vector_store %arg7[%c0_11, %c0_12], %13 {strides = array<i32>} : memref<2x128xf32, #tpu.memory_space<vmem>>, vector<2x128xf32>,
    } else {
    }
    %c0 = arith.constant 0 : index
    %c0_1 = arith.constant 0 : index
    %3 = vector.load %arg3[%c0, %c0_1] : memref<2x32xf32, #tpu.memory_space<vmem>>, vector<2x32xf32>
    %4 = arith.truncf %3 : vector<2x32xf32> to vector<2x32xbf16>
    %c0_2 = arith.constant 0 : index
    %c0_3 = arith.constant 0 : index
    %5 = vector.load %arg7[%c0_2, %c0_3] : memref<2x128xf32, #tpu.memory_space<vmem>>, vector<2x128xf32>
    %c0_4 = arith.constant 0 : index
    %c0_5 = arith.constant 0 : index
    %6 = vector.load %arg4[%c0_4, %c0_5] : memref<32x128xbf16, #tpu.memory_space<vmem>>, vector<32x128xbf16>
    %cst = arith.constant dense<0.000000e+00> : vector<2x128xf32>
    %7 = tpu.matmul %4, %6, %cst {dimension_numbers = #tpu.dot_dimension_numbers<[1], [0], [0], [1], [0, 0, 1, 1], [], []>} : vector<2x32xbf16>, vector<32x128xbf16>, vector<2x128xf32> -> vector<2x128xf32>
    %8 = arith.addf %5, %7 : vector<2x128xf32>
    %c0_6 = arith.constant 0 : index
    %c0_7 = arith.constant 0 : index
    %9 = vector.load %arg7[%c0_6, %c0_7] : memref<2x128xf32, #tpu.memory_space<vmem>>, vector<2x128xf32>
    tpu.vector_store %arg7[%c0_6, %c0_7], %8 {strides = array<i32>} : memref<2x128xf32, #tpu.memory_space<vmem>>, vector<2x128xf32>,
    %c0_i32_8 = arith.constant 0 : i32
    %10 = arith.cmpi eq, %arg2, %c0_i32_8 : i32
    %11 = arith.extui %10 : i1 to i32
    %c0_i32_9 = arith.constant 0 : i32
    %12 = arith.cmpi ne, %11, %c0_i32_9 : i32
    scf.if %12 {
      %c0_10 = arith.constant 0 : index
      %c0_11 = arith.constant 0 : index
      %13 = vector.load %arg7[%c0_10, %c0_11] : memref<2x128xf32, #tpu.memory_space<vmem>>, vector<2x128xf32>
      %c0_12 = arith.constant 0 : index
      %c0_13 = arith.constant 0 : index
      %14 = vector.load %arg5[%c0_12, %c0_13] : memref<1x128xf32, #tpu.memory_space<vmem>>, vector<1x128xf32>
      %15 = vector.broadcast %14 : vector<1x128xf32> to vector<2x128xf32>
      %16 = arith.addf %13, %15 : vector<2x128xf32>
      %c0_14 = arith.constant 0 : index
      %c0_15 = arith.constant 0 : index
      %17 = vector.load %arg6[%c0_14, %c0_15] : memref<2x128xf32, #tpu.memory_space<vmem>>, vector<2x128xf32>
      tpu.vector_store %arg6[%c0_14, %c0_15], %16 {strides = array<i32>} : memref<2x128xf32, #tpu.memory_space<vmem>>, vector<2x128xf32>,
    } else {
    }
    return
  }
  func.func @transform_0(%arg0: i32, %arg1: i32, %arg2: i32) -> (i32, i32) {
    %c0_i32 = arith.constant 0 : i32
    return %arg0, %arg2 : i32, i32
  }
  func.func @transform_1(%arg0: i32, %arg1: i32, %arg2: i32) -> (i32, i32) {
    %c0_i32 = arith.constant 0 : i32
    return %arg2, %arg1 : i32, i32
  }
  func.func @transform_2(%arg0: i32, %arg1: i32, %arg2: i32) -> (i32, i32) {
    %c0_i32 = arith.constant 0 : i32
    %c0_i32_0 = arith.constant 0 : i32
    return %c0_i32, %arg1 : i32, i32
  }
  func.func @transform_3(%arg0: i32, %arg1: i32, %arg2: i32) -> (i32, i32) {
    %c0_i32 = arith.constant 0 : i32
    return %arg0, %arg1 : i32, i32
  }
}

</mosaic_0001>

<bundles_post_ra>
// kernel: classifier_forward.15
= control target key start
LH: loop header
LB: loop body
LE: loop exit
PB: predicated region body
PF: predicated region fallthrough
CT: control target
= control target key end

     0   :  { %s518_s12 = smov 0   ;;  %s520_s13 = smov 0   ;;  %s565_s0 = inlined_call_operand.vmem [shape: f32[16,40], index: 0, kind: input, shape index: {}]   ;;  %s566_s1 = inlined_call_operand.vmem [shape: bf16[40,32], index: 1, kind: input, shape index: {}]   ;;  %s567_s2 = inlined_call_operand.vmem [shape: f32[1,32], index: 2, kind: input, shape index: {}]   ;;  %s568_s3 = inlined_call_operand.vmem [shape: bf16[16,32], index: 3, kind: output, shape index: {}]  }
   0x1   :  { %s522_s14 = smov 0  }
   0x2 LB: > { %s32_s15 = sadd.s32 1, %s491_s13  ;;  %p431_p0 = scmp.ge.s32.totalorder %s495_s14, 1  ;;  %s495_s14 = sphi %s522_s14, %s13_s14   ;;  %s491_s13 = sphi %s520_s13, %s570_s13   ;;  %s487_s12 = sphi %s518_s12, %s569_s12  }
   0x3   : > { %p34_p1 = scmp.ge.s32.totalorder %s32_s15, 2  ;;  %p186_p2 = scmp.lt.s32.totalorder %s495_s14, 3 }
   0x5   : > { %s572_s15 = smov (%p34_p1, %s32_s15), 0  ;;  %p187_p3 = pnand %p431_p0, %p186_p2 }
   0x6   : > { %p225_p4 = scmp.lt.s32.totalorder (!%p187_p3), %s487_s12, 1 }
   0x7   : > { %190 = sbr.rel (%p187_p3) target bundleno = 170 (0xaa), region = 32 }
   0xc   : > { %v265_v0 = vld [vmem:[%s566_s1 + $0x10] sm:$0xf]  ;;  %vm256_vm0 = vcmask 261120   ;;  %vm285_vm1 = vcmask 1043456   ;;  %s574_s12 = smov (!%p225_p4, %s487_s12), 1  ;;  %v497_v2 = vmov 0.0  }
   0xd   : > { %v275_v1 = vunpack.c.l.b16 %v265_v0  ;;  %257 = vst.msk [vmem:[#allocation2] sm:$0xff] %vm256_vm0, %v497_v2  ;;  %s432_s18 = sshll.u32 %s574_s12, 3  ;;  %v446_v5 = vld [vmem:[%s566_s1 + $0x8] sm:$0xff]  ;;  %v445_v6 = vld [vmem:[%s566_s1] sm:$0xff]  ;;  %vm281_vm2 = vcmask 326656   ;;  %s433_s28 = sshll.u32 %s574_s12, 2 }
   0xe   : > { %s231_s23 = scalar_lea.vmem %s565_s0, %s432_s18  ;;  %v472_v12 = vld [vmem:[%s567_s2] ss:$0 sm:$0xff]  ;;  %s250_s4 = scalar_lea.vmem %s568_s3, %s433_s28  ;;  %vm315_vm3 = vcmask 257024  }
   0xf   : > { %v278_v3 = vpack.c.b16 %v275_v1, %v275_v1  ;;  %v258_v7 = vld [vmem:[%s231_s23] sm:$0xff] }
  0x10   : > { %v259_v8 = vpack.c.bf16 %v258_v7, %v258_v7 }
  0x11   : > { %v287_v4 = vsel %vm285_vm1, %v278_v3, 0 }
  0x12   : > { %294 = vmatpush.bf16.msra.mxu0 %v287_v4 }
  0x14   : > { %v260_v9 = vld [vmem:[#allocation2] sm:$0xff] }
  0x16   : > { %295 = vmatpush.bf16.msra.mxu0 %v446_v5 }
  0x1a   : > { %296 = vmatpush.bf16.msra.mxu0 %v445_v6 }
  0x1d   : > { %442 = vmatmul.msk.bf16.vlgmr.msra.gmra.mxu0 %vm281_vm2, %v259_v8 }
  0x9a   : > { %v298_v10 = vpop.f32.mrf.mxu0 }
  0x9b   : > { %v302_v11 = vadd.f32 %v298_v10, %v260_v9 }
  0x9d   : > { %304 = vst.msk [vmem:[#allocation2] sm:$0xff] %vm256_vm0, %v302_v11 }
  0xa2   : > { %v300_v13 = vpop.f32.mrf.mxu0 }
  0xa4   : > { %v308_v14 = vld [vmem:[#allocation2] sm:$0xff] }
  0xa5   : > { %v313_v15 = vadd.f32 %v472_v12, %v308_v14 }
  0xa7   : > { %v314_v16 = vpack.c.bf16 %v313_v15, %v313_v15 }
  0xa9   : > { %316 = vst.msk [vmem:[%s250_s4] sm:$0xf] %vm315_vm3, %v314_v16 }
  0xaa PF: > { %s13_s14 = sadd.s32 1, %s495_s14   ;;  %s569_s12 = smov %s491_s13 }
  0xab   : > { %p10_p5 = scmp.ge.s32.totalorder %s13_s14, 4   ;;  %s570_s13 = smov %s572_s15 }
  0xad   :  { %12 = sbr.rel (!%p10_p5) target bundleno = 2 (0x2), region = 76 }

// kernel: classifier_forward.16
= control target key start
LH: loop header
LB: loop body
LE: loop exit
PB: predicated region body
PF: predicated region fallthrough
CT: control target
= control target key end

     0   :  { %10 = vsyncpa [#allocation4], 0  ;;  %s751_s18 = smov 0   ;;  %s753_s19 = smov 0   ;;  %s810_s0 = inlined_call_operand.vmem [shape: bf16[16,32], index: 0, kind: input, shape index: {}]   ;;  %s811_s1 = inlined_call_operand.vmem [shape: bf16[32,128], index: 1, kind: input, shape index: {}]   ;;  %s812_s2 = inlined_call_operand.vmem [shape: f32[1,128], index: 2, kind: input, shape index: {}]   ;;  %s813_s3 = inlined_call_operand.vmem [shape: f32[1,32], index: 3, kind: input, shape index: {}]   ;;  %s814_s4 = inlined_call_operand.hbm [shape: f32[1,32], index: 4, kind: input, shape index: {}]   ;;  %s815_s5 = inlined_call_operand.vmem [shape: bf16[16,128], index: 5, kind: output, shape index: {}]  }
   0x1   :  { %s755_s20 = smov 0  }
   0x2 LB: > { %s588_s21 = sadd.s32 4294967295, %s717_s20   ;;  %s35_s22 = sadd.s32 1, %s713_s19  ;;  %s717_s20 = sphi %s755_s20, %s16_s20   ;;  %s713_s19 = sphi %s753_s19, %s817_s19   ;;  %s709_s18 = sphi %s751_s18, %s816_s18  }
   0x3   : > { %p37_p0 = scmp.ge.s32.totalorder %s35_s22, 2  ;;  %p590_p1 = scmp.ge.s32.totalorder %s717_s20, 1 }
   0x4   : > { %p202_p2 = scmp.lt.s32.totalorder %s717_s20, 3  ;;  %p622_p4 = scmp.eq.s32.totalorder %s588_s21, 0 }
   0x5   : > { %s819_s22 = smov (%p37_p0, %s35_s22), 0  ;;  %s239_s25 = sshll.u32 %s814_s4, 4  ;;  %s240_s25 = int_to_ptr.hbm [resolvable:$true] %s239_s25 }
   0x6   : > { %p203_p3 = pnand %p590_p1, %p202_p2  ;;  %s719_s26 = smov [#allocation3]  }
   0x7   : > { %s241_s27 = sshll.u32 %s719_s26, 4  ;;  %s242_s27 = int_to_ptr.vmem [resolvable:$true] %s241_s27 }
   0x8   : > { %p618_p5 = pneg %p203_p3  ;;  %264 = sbr.rel (%p203_p3) target bundleno = 453 (0x1c5), region = 40 }
   0xa   : > { %p619_p6 = pnand %p622_p4, %p618_p5 }
   0xc   : > { %621 = dma.hbm_to_vmem [thread:$0]  (!%p619_p6), %s240_s25, 16, %s242_s27, [#allocation4]  }
   0xd   : > { %704 = dma.done.wait (%p622_p4), [#allocation4], 16  }
   0xe   : > { %706 = vsyncadd (%p622_p4), [#allocation4], 4294967280  ;;  %p311_p7 = scmp.lt.s32.totalorder %s709_s18, 1  ;;  %vm348_vm0 = vcmask 261120   ;;  %v720_v3 = vmov 32.0   ;;  %v613_v15 = vld [vmem:[%s811_s1 + $0x8] sm:$0xff] }
   0xf   : > { %653 = vrcp.f32 %v720_v3  ;;  %415 = vmatpush.bf16.msra.mxu0 %v613_v15  ;;  %v612_v16 = vld [vmem:[%s811_s1] sm:$0xff] }
  0x10   : > { %s821_s18 = smov (!%p311_p7, %s709_s18), 1  ;;  %v650_v26 = vld [vmem:[%s813_s3] ss:$0 sm:$0xff] }
  0x11   : > { %s598_s28 = sshll.u32 %s821_s18, 2  ;;  %v651_v29 = vld [vmem:[#allocation3] ss:$0 sm:$0xff] }
  0x12   : > { %s317_s6 = scalar_lea.vmem %s810_s0, %s598_s28  ;;  %v652_v33 = vld [vmem:[%s812_s2] ss:$0 sm:$0xff]  ;;  %s339_s17 = scalar_lea.vmem %s815_s5, %s598_s28 }
  0x13   : > { %v346_v0 = vld [vmem:[%s317_s6] sm:$0xf]  ;;  %416 = vmatpush.bf16.msra.mxu0 %v612_v16 }
  0x14   : > { %v347_v1 = vunpack.c.l.bf16 %v346_v0 }
  0x15   : > { %v654_v4 = vpop.eup %653 }
  0x16   : > { %v349_v2 = vsel %vm348_vm0, %v347_v1, 0.0  ;;  %v353_v5 = vmul.f32 32.0, %v654_v4  ;;  %vm357_vm1 = vweird.f32 %v654_v4 }
  0x17   : > { %350 = vadd.xlane.f32.xlu0 %v349_v2 }
  0x18   : > { %v354_v6 = vsub.f32 1.0, %v353_v5 }
  0x1a   : > { %v355_v7 = vmul.f32 %v654_v4, %v354_v6 }
  0x1c   : > { %v356_v8 = vadd.f32 %v654_v4, %v355_v7 }
  0x1e   : > { %v358_v9 = vsel %vm357_vm1, %v654_v4, %v356_v8 }
  0x8a   : > { %v351_v10 = vpop.xlane.xlu0 %350 }
  0x8b   : > { %v359_v11 = vmul.f32 %v358_v9, %v351_v10 }
  0x8d   : > { %v360_v12 = vsub.f32 %v347_v1, %v359_v11 }
  0x8f   : > { %v361_v13 = vmul.f32 %v360_v12, %v360_v12 }
  0x91   : > { %v362_v14 = vsel %vm348_vm0, %v361_v13, 0.0 }
  0x92   : > { %363 = vadd.xlane.f32.xlu0 %v362_v14 }
 0x105   : > { %v364_v17 = vpop.xlane.xlu0 %363 }
 0x106   : > { %v365_v18 = vmul.f32 %v364_v17, %v358_v9 }
 0x108   : > { %v366_v19 = vadd.f32 1e-05, %v365_v18 }
 0x10a   : > { %655 = vrsqrt.f32 %v366_v19  ;;  %vm373_vm3 = vweird.f32 %v366_v19 }
 0x110   : > { %v656_v20 = vpop.eup %655 }
 0x111   : > { %v368_v21 = vmul.f32 %v656_v20, %v366_v19  ;;  %vm374_vm2 = vweird.f32 %v656_v20 }
 0x112   : > { %vm375_vm4 = vmor %vm373_vm3, %vm374_vm2 }
 0x113   : > { %v369_v22 = vmul.f32 %v656_v20, %v368_v21 }
 0x115   : > { %v370_v23 = vmul.f32 0.5, %v369_v22 }
 0x117   : > { %v371_v24 = vsub.f32 1.5, %v370_v23 }
 0x119   : > { %v372_v25 = vmul.f32 %v656_v20, %v371_v24 }
 0x11b   : > { %v376_v27 = vsel %vm375_vm4, %v656_v20, %v372_v25 }
 0x11c   : > { %v377_v28 = vmul.f32 %v376_v27, %v360_v12 }
 0x11e   : > { %v382_v30 = vmul.f32 %v650_v26, %v377_v28 }
 0x120   : > { %v387_v31 = vadd.f32 %v651_v29, %v382_v30 }
 0x122   : > { %v388_v32 = vpack.c.bf16 %v387_v31, %v387_v31 }
 0x124   : > { %608 = vmatmul.msk.bf16.vlgmr.msra.gmra.mxu0 %vm348_vm0, %v388_v32 }
 0x1a1   : > { %v418_v34 = vpop.f32.mrf.mxu0 }
 0x1a2   : > { %v432_v35 = vadd.f32 %v652_v33, %v418_v34 }
 0x1a4   : > { %v609_v36 = vmul.f32 -1.442695, %v432_v35 }
 0x1a6   : > { %657 = vpow2.f32 %v609_v36 }
 0x1a9   : > { %v420_v37 = vpop.f32.mrf.mxu0 }
 0x1ac   : > { %v658_v38 = vpop.eup %657 }
 0x1ad   : > { %v436_v39 = vadd.f32 1.0, %v658_v38 }
 0x1af   : > { %659 = vrcp.f32 %v436_v39  ;;  %v448_v43 = vand.u32 2147483648, %v436_v39  ;;  %v446_v45 = vand.u32 2147483647, %v436_v39  ;;  %vm442_vm6 = vweird.f32 %v436_v39 }
 0x1b1   : > { %v449_v47 = vor.u32 1.1754944e-38, %v448_v43  ;;  %vm447_vm8 = vcmp.eq.f32.partialorder %v446_v45, 8.507059e+37 }
 0x1b5   : > { %v660_v40 = vpop.eup %659 }
 0x1b6   : > { %v438_v41 = vmul.f32 %v660_v40, %v436_v39  ;;  %vm443_vm5 = vweird.f32 %v660_v40 }
 0x1b7   : > { %vm444_vm7 = vmor %vm442_vm6, %vm443_vm5 }
 0x1b8   : > { %v439_v42 = vsub.f32 1.0, %v438_v41 }
 0x1ba   : > { %v440_v44 = vmul.f32 %v660_v40, %v439_v42 }
 0x1bc   : > { %v441_v46 = vadd.f32 %v660_v40, %v440_v44 }
 0x1be   : > { %v445_v48 = vsel %vm444_vm7, %v660_v40, %v441_v46 }
 0x1bf   : > { %v450_v49 = vsel %vm447_vm8, %v449_v47, %v445_v48 }
 0x1c0   : > { %v452_v50 = vmul.f32 %v450_v49, %v432_v35 }
 0x1c2   : > { %v453_v51 = vpack.c.bf16 %v452_v50, %v452_v50 }
 0x1c4   : > { %454 = vst [vmem:[%s339_s17] sm:$0xf] %v453_v51 }
 0x1c5 PF: > { %s16_s20 = sadd.s32 1, %s717_s20   ;;  %s816_s18 = smov %s713_s19 }
 0x1c6   : > { %p13_p8 = scmp.ge.s32.totalorder %s16_s20, 4   ;;  %s817_s19 = smov %s819_s22 }
 0x1c8   :  { %15 = sbr.rel (!%p13_p8) target bundleno = 2 (0x2), region = 93 }
 0x1cd   :  { %480 = vsyncpa [#allocation4], 1 }
 0x1ce   :  { %482 = vsyncpa [#allocation4 + $0x1], 1 }

// kernel: classifier_forward.18
= control target key start
LH: loop header
LB: loop body
LE: loop exit
PB: predicated region body
PF: predicated region fallthrough
CT: control target
= control target key end

     0   :  { %10 = vsyncpa [#allocation4], 0  ;;  %s926_s0 = inlined_call_operand.vmem [shape: bf16[16,32], index: 0, kind: input, shape index: {}]   ;;  %s927_s1 = inlined_call_operand.vmem [shape: bf16[32,96], index: 1, kind: input, shape index: {}]   ;;  %s928_s2 = inlined_call_operand.hbm [shape: f32[1,96], index: 2, kind: input, shape index: {}]   ;;  %s929_s3 = inlined_call_operand.hbm [shape: f32[1,32], index: 3, kind: input, shape index: {}]   ;;  %s930_s4 = inlined_call_operand.hbm [shape: f32[1,32], index: 4, kind: input, shape index: {}]   ;;  %s931_s5 = inlined_call_operand.vmem [shape: bf16[16,96], index: 5, kind: output, shape index: {}]  }
   0x1   :  { %11 = vsyncpa [#allocation6], 0  ;;  %s829_s18 = smov 0   ;;  %s831_s19 = smov 0  }
   0x2   :  { %s833_s20 = smov 0  }
   0x3 LB: > { %s241_s23 = sshll.u32 %s929_s3, 4  ;;  %s581_s24 = sadd.s32 4294967295, %s792_s20   ;;  %s792_s20 = sphi %s833_s20, %s17_s20   ;;  %s788_s19 = sphi %s831_s19, %s936_s19   ;;  %s784_s18 = sphi %s829_s18, %s935_s18   ;;  %s242_s23 = int_to_ptr.hbm [resolvable:$true] %s241_s23 }
   0x4   : > { %p583_p0 = scmp.ge.s32.totalorder %s792_s20, 1  ;;  %p203_p1 = scmp.lt.s32.totalorder %s792_s20, 3 }
   0x5   : > { %p850_p2 = scmp.eq.s32.totalorder %s581_s24, 0  ;;  %s794_s27 = smov [#allocation5]  }
   0x6   : > { %p854_p3 = pnand %p583_p0, %p203_p1  ;;  %s243_s28 = sshll.u32 %s794_s27, 4  ;;  %s244_s28 = int_to_ptr.vmem [resolvable:$true] %s243_s28 }
   0x7   : > { %s36_s30 = sadd.s32 1, %s788_s19  ;;  %s228_s8 = sshll.u32 %s928_s2, 4  ;;  %s229_s8 = int_to_ptr.hbm [resolvable:$true] %s228_s8 }
   0x8   : > { %p620_p4 = pneg %p854_p3  ;;  %p38_p6 = scmp.ge.s32.totalorder %s36_s30, 2 }
   0x9   : > { %s254_s11 = sshll.u32 %s930_s4, 4  ;;  %s795_s12 = smov [#allocation3]   ;;  %s255_s11 = int_to_ptr.hbm [resolvable:$true] %s254_s11 }
   0xa   : > { %p862_p5 = pnand %p850_p2, %p620_p4  ;;  %s938_s30 = smov (%p38_p6, %s36_s30), 0 }
   0xb   : > { %s230_s13 = sshll.u32 %s795_s12, 4  ;;  %s796_s14 = smov [#allocation7]   ;;  %s231_s13 = int_to_ptr.vmem [resolvable:$true] %s230_s13 }
   0xc   : > { %626 = dma.hbm_to_vmem [thread:$0]  (!%p862_p5), %s242_s23, 16, %s244_s28, [#allocation6]  }
   0xd   : > { %623 = dma.hbm_to_vmem [thread:$0]  (!%p862_p5), %s229_s8, 16, %s231_s13, [#allocation4]  }
   0xe   : > { %s256_s15 = sshll.u32 %s796_s14, 4  ;;  %279 = sbr.rel (%p854_p3) target bundleno = 441 (0x1b9), region = 40  ;;  %s257_s15 = int_to_ptr.vmem [resolvable:$true] %s256_s15 }
   0xf   : > { %629 = dma.hbm_to_vmem [thread:$0]  (!%p862_p5), %s255_s11, 16, %s257_s15, [#allocation6]  }
  0x13   : > { %775 = dma.done.wait (%p850_p2), [#allocation4], 16  }
  0x14   : > { %777 = vsyncadd (%p850_p2), [#allocation4], 4294967280 }
  0x15   : > { %779 = dma.done.wait (%p850_p2), [#allocation6], 32  }
  0x16   : > { %781 = vsyncadd (%p850_p2), [#allocation6], 4294967264  ;;  %p330_p7 = scmp.lt.s32.totalorder %s784_s18, 1  ;;  %vm362_vm0 = vcmask 261120   ;;  %v797_v3 = vmov 32.0   ;;  %v607_v15 = vld [vmem:[%s927_s1 + $0x8] sm:$0xff] }
  0x17   : > { %668 = vrcp.f32 %v797_v3  ;;  %429 = vmatpush.bf16.msra.mxu0 %v607_v15  ;;  %v606_v16 = vld [vmem:[%s927_s1] sm:$0xff]  ;;  %vm358_vm2 = vcmask 785408   ;;  %v798_v18 = vmov 0.0   ;;  %v665_v27 = vld [vmem:[#allocation5] ss:$0 sm:$0xff]  ;;  %vm449_vm6 = vcmask 781312  }
  0x18   : > { %s940_s18 = smov (!%p330_p7, %s784_s18), 1  ;;  %359 = vst.msk [vmem:[#allocation2] sm:$0xff] %vm358_vm2, %v798_v18  ;;  %v666_v30 = vld [vmem:[#allocation7] ss:$0 sm:$0xff]  ;;  %v667_v37 = vld [vmem:[#allocation3] ss:$0 sm:$0xff] }
  0x19   : > { %s593_s16 = sshll.u32 %s940_s18, 2 }
  0x1a   : > { %s336_s22 = scalar_lea.vmem %s926_s0, %s593_s16  ;;  %s352_s29 = scalar_lea.vmem %s931_s5, %s593_s16 }
  0x1b   : > { %v360_v0 = vld [vmem:[%s336_s22] sm:$0xf]  ;;  %430 = vmatpush.bf16.msra.mxu0 %v606_v16 }
  0x1c   : > { %v361_v1 = vunpack.c.l.bf16 %v360_v0 }
  0x1d   : > { %v669_v4 = vpop.eup %668 }
  0x1e   : > { %v363_v2 = vsel %vm362_vm0, %v361_v1, 0.0  ;;  %v367_v5 = vmul.f32 32.0, %v669_v4  ;;  %vm371_vm1 = vweird.f32 %v669_v4 }
  0x1f   : > { %364 = vadd.xlane.f32.xlu0 %v363_v2  ;;  %v403_v34 = vld [vmem:[#allocation2] sm:$0xff] }
  0x20   : > { %v368_v6 = vsub.f32 1.0, %v367_v5 }
  0x22   : > { %v369_v7 = vmul.f32 %v669_v4, %v368_v6 }
  0x24   : > { %v370_v8 = vadd.f32 %v669_v4, %v369_v7 }
  0x26   : > { %v372_v9 = vsel %vm371_vm1, %v669_v4, %v370_v8 }
  0x92   : > { %v365_v10 = vpop.xlane.xlu0 %364 }
  0x93   : > { %v373_v11 = vmul.f32 %v372_v9, %v365_v10 }
  0x95   : > { %v374_v12 = vsub.f32 %v361_v1, %v373_v11 }
  0x97   : > { %v375_v13 = vmul.f32 %v374_v12, %v374_v12 }
  0x99   : > { %v376_v14 = vsel %vm362_vm0, %v375_v13, 0.0 }
  0x9a   : > { %377 = vadd.xlane.f32.xlu0 %v376_v14 }
 0x10d   : > { %v378_v17 = vpop.xlane.xlu0 %377 }
 0x10e   : > { %v379_v19 = vmul.f32 %v378_v17, %v372_v9 }
 0x110   : > { %v380_v20 = vadd.f32 1e-05, %v379_v19 }
 0x112   : > { %670 = vrsqrt.f32 %v380_v20  ;;  %vm387_vm4 = vweird.f32 %v380_v20 }
 0x118   : > { %v671_v21 = vpop.eup %670 }
 0x119   : > { %v382_v22 = vmul.f32 %v671_v21, %v380_v20  ;;  %vm388_vm3 = vweird.f32 %v671_v21 }
 0x11a   : > { %vm389_vm5 = vmor %vm387_vm4, %vm388_vm3 }
 0x11b   : > { %v383_v23 = vmul.f32 %v671_v21, %v382_v22 }
 0x11d   : > { %v384_v24 = vmul.f32 0.5, %v383_v23 }
 0x11f   : > { %v385_v25 = vsub.f32 1.5, %v384_v24 }
 0x121   : > { %v386_v26 = vmul.f32 %v671_v21, %v385_v25 }
 0x123   : > { %v390_v28 = vsel %vm389_vm5, %v671_v21, %v386_v26 }
 0x124   : > { %v391_v29 = vmul.f32 %v390_v28, %v374_v12 }
 0x126   : > { %v396_v31 = vmul.f32 %v665_v27, %v391_v29 }
 0x128   : > { %v401_v32 = vadd.f32 %v666_v30, %v396_v31 }
 0x12a   : > { %v402_v33 = vpack.c.bf16 %v401_v32, %v401_v32 }
 0x12c   : > { %603 = vmatmul.msk.bf16.vlgmr.msra.gmra.mxu0 %vm362_vm0, %v402_v33 }
 0x1a9   : > { %v432_v35 = vpop.f32.mrf.mxu0 }
 0x1aa   : > { %v436_v36 = vadd.f32 %v432_v35, %v403_v34 }
 0x1ac   : > { %438 = vst.msk [vmem:[#allocation2] sm:$0xff] %vm358_vm2, %v436_v36 }
 0x1b1   : > { %v434_v38 = vpop.f32.mrf.mxu0 }
 0x1b3   : > { %v442_v39 = vld [vmem:[#allocation2] sm:$0xff] }
 0x1b4   : > { %v447_v40 = vadd.f32 %v667_v37, %v442_v39 }
 0x1b6   : > { %v448_v41 = vpack.c.bf16 %v447_v40, %v447_v40 }
 0x1b8   : > { %450 = vst.msk [vmem:[%s352_s29] sm:$0xf] %vm449_vm6, %v448_v41 }
 0x1b9 PF: > { %s17_s20 = sadd.s32 1, %s792_s20   ;;  %s935_s18 = smov %s788_s19 }
 0x1ba   : > { %p14_p8 = scmp.ge.s32.totalorder %s17_s20, 4   ;;  %s936_s19 = smov %s938_s30 }
 0x1bc   :  { %16 = sbr.rel (!%p14_p8) target bundleno = 3 (0x3), region = 97 }
 0x1c1   :  { %476 = vsyncpa [#allocation4], 1 }
 0x1c2   :  { %478 = vsyncpa [#allocation4 + $0x1], 1 }
 0x1c3   :  { %479 = vsyncpa [#allocation6], 1 }

// kernel: classifier_forward.17
= control target key start
LH: loop header
LB: loop body
LE: loop exit
PB: predicated region body
PF: predicated region fallthrough
CT: control target
= control target key end

     0   :  { %9 = vsyncpa [#allocation4], 0  ;;  %s716_s15 = smov 0   ;;  %s718_s16 = smov 0   ;;  %s786_s0 = inlined_call_operand.vmem [shape: bf16[16,128], index: 0, kind: input, shape index: {}]   ;;  %s787_s1 = inlined_call_operand.vmem [shape: bf16[128,32], index: 1, kind: input, shape index: {}]   ;;  %s788_s2 = inlined_call_operand.hbm [shape: f32[1,32], index: 2, kind: input, shape index: {}]   ;;  %s789_s3 = inlined_call_operand.vmem [shape: bf16[16,32], index: 3, kind: input, shape index: {}]   ;;  %s790_s4 = inlined_call_operand.vmem [shape: bf16[16,32], index: 4, kind: output, shape index: {}]  }
   0x1   :  { %s720_s17 = smov 0  }
   0x2 LB: > { %s541_s18 = sadd.s32 4294967295, %s687_s17   ;;  %s34_s19 = sadd.s32 1, %s683_s16  ;;  %s687_s17 = sphi %s720_s17, %s15_s17   ;;  %s683_s16 = sphi %s718_s16, %s792_s16   ;;  %s679_s15 = sphi %s716_s15, %s791_s15  }
   0x3   : > { %p36_p0 = scmp.ge.s32.totalorder %s34_s19, 2  ;;  %p543_p1 = scmp.ge.s32.totalorder %s687_s17, 1 }
   0x4   : > { %p177_p2 = scmp.lt.s32.totalorder %s687_s17, 3  ;;  %p602_p4 = scmp.eq.s32.totalorder %s541_s18, 0 }
   0x5   : > { %s794_s19 = smov (%p36_p0, %s34_s19), 0  ;;  %s202_s22 = sshll.u32 %s788_s2, 4  ;;  %s203_s22 = int_to_ptr.hbm [resolvable:$true] %s202_s22 }
   0x6   : > { %p178_p3 = pnand %p543_p1, %p177_p2  ;;  %s689_s23 = smov [#allocation3]  }
   0x7   : > { %s204_s24 = sshll.u32 %s689_s23, 4  ;;  %s205_s24 = int_to_ptr.vmem [resolvable:$true] %s204_s24 }
   0x8   : > { %p598_p5 = pneg %p178_p3  ;;  %237 = sbr.rel (%p178_p3) target bundleno = 191 (0xbf), region = 36 }
   0xa   : > { %p599_p6 = pnand %p602_p4, %p598_p5 }
   0xc   : > { %601 = dma.hbm_to_vmem [thread:$0]  (!%p599_p6), %s203_s22, 16, %s205_s24, [#allocation4]  }
   0xd   : > { %674 = dma.done.wait (%p602_p4), [#allocation4], 16  }
   0xe   : > { %676 = vsyncadd (%p602_p4), [#allocation4], 4294967280  ;;  %v593_v0 = vld [vmem:[%s787_s1 + $0x38] sm:$0xff]  ;;  %vm317_vm0 = vcmask 261120   ;;  %v592_v1 = vld [vmem:[%s787_s1 + $0x30] sm:$0xff]  ;;  %v690_v2 = vmov 0.0  }
   0xf   : > { %385 = vmatpush.bf16.msra.mxu0 %v593_v0  ;;  %318 = vst.msk [vmem:[#allocation2] sm:$0xff] %vm317_vm0, %v690_v2  ;;  %v591_v3 = vld [vmem:[%s787_s1 + $0x28] sm:$0xff]  ;;  %v590_v4 = vld [vmem:[%s787_s1 + $0x20] sm:$0xff]  ;;  %v589_v5 = vld [vmem:[%s787_s1 + $0x18] sm:$0xff]  ;;  %p283_p7 = scmp.lt.s32.totalorder %s679_s15, 1  ;;  %vm415_vm1 = vcmask 257024  }
  0x10   : > { %v588_v6 = vld [vmem:[%s787_s1 + $0x10] sm:$0xff]  ;;  %v587_v7 = vld [vmem:[%s787_s1 + $0x8] sm:$0xff]  ;;  %v586_v8 = vld [vmem:[%s787_s1] sm:$0xff] }
  0x11   : > { %s796_s15 = smov (!%p283_p7, %s679_s15), 1  ;;  %v630_v13 = vld [vmem:[#allocation3] ss:$0 sm:$0xff] }
  0x12   : > { %s549_s13 = sshll.u32 %s796_s15, 2 }
  0x13   : > { %386 = vmatpush.bf16.msra.mxu0 %v592_v1  ;;  %s289_s22 = scalar_lea.vmem %s786_s0, %s549_s13  ;;  %s305_s15 = scalar_lea.vmem %s789_s3, %s549_s13 }
  0x14   : > { %v319_v9 = vld [vmem:[%s289_s22] sm:$0xf]  ;;  %s312_s27 = scalar_lea.vmem %s790_s4, %s549_s13 }
  0x15   : > { %v410_v14 = vld [vmem:[%s305_s15] sm:$0xf] }
  0x16   : > { %v320_v10 = vld [vmem:[#allocation2] sm:$0xff]  ;;  %v411_v17 = vunpack.c.l.bf16 %v410_v14 }
  0x17   : > { %387 = vmatpush.bf16.msra.mxu0 %v591_v3 }
  0x1b   : > { %388 = vmatpush.bf16.msra.mxu0 %v590_v4 }
  0x1f   : > { %389 = vmatpush.bf16.msra.mxu0 %v589_v5 }
  0x23   : > { %390 = vmatpush.bf16.msra.mxu0 %v588_v6 }
  0x27   : > { %391 = vmatpush.bf16.msra.mxu0 %v587_v7 }
  0x2b   : > { %392 = vmatpush.bf16.msra.mxu0 %v586_v8 }
  0x2e   : > { %393 = vmatmul.bf16.vlgmr.msra.gmra.mxu0 %v319_v9 }
  0xab   : > { %v394_v11 = vpop.f32.mrf.mxu0 }
  0xac   : > { %v398_v12 = vadd.f32 %v394_v11, %v320_v10 }
  0xae   : > { %400 = vst.msk [vmem:[#allocation2] sm:$0xff] %vm317_vm0, %v398_v12 }
  0xb3   : > { %v396_v15 = vpop.f32.mrf.mxu0 }
  0xb5   : > { %v404_v16 = vld [vmem:[#allocation2] sm:$0xff] }
  0xb6   : > { %v409_v18 = vadd.f32 %v630_v13, %v404_v16 }
  0xb8   : > { %v412_v19 = vmul.f32 0.5, %v409_v18 }
  0xba   : > { %v413_v20 = vadd.f32 %v412_v19, %v411_v17 }
  0xbc   : > { %v414_v21 = vpack.c.bf16 %v413_v20, %v413_v20 }
  0xbe   : > { %416 = vst.msk [vmem:[%s312_s27] sm:$0xf] %vm415_vm1, %v414_v21 }
  0xbf PF: > { %s15_s17 = sadd.s32 1, %s687_s17   ;;  %s791_s15 = smov %s683_s16 }
  0xc0   : > { %p12_p8 = scmp.ge.s32.totalorder %s15_s17, 4   ;;  %s792_s16 = smov %s794_s19 }
  0xc2   :  { %14 = sbr.rel (!%p12_p8) target bundleno = 2 (0x2), region = 86 }
  0xc7   :  { %442 = vsyncpa [#allocation4], 1 }
  0xc8   :  { %444 = vsyncpa [#allocation4 + $0x1], 1 }

// kernel: classifier_forward.19
= control target key start
LH: loop header
LB: loop body
LE: loop exit
PB: predicated region body
PF: predicated region fallthrough
CT: control target
= control target key end

     0   :  { %vm19_vm0 = vcmask 261120   ;;  %v88_v1 = vmov 0.0   ;;  %vm69_vm1 = vcmask 257024   ;;  %s124_s1 = inlined_call_operand.vmem [shape: bf16[32,32], index: 1, kind: input, shape index: {}]   ;;  %s125_s0 = inlined_call_operand.vmem [shape: f32[8,32], index: 0, kind: input, shape index: {}]   ;;  %s126_s2 = inlined_call_operand.vmem [shape: f32[1,32], index: 2, kind: input, shape index: {}]   ;;  %s127_s3 = inlined_call_operand.vmem [shape: bf16[8,32], index: 3, kind: output, shape index: {}]  }
   0x1   :  { %v85_v0 = vld [vmem:[%s124_s1 + $0x8] sm:$0xff]  ;;  %20 = vst.msk [vmem:[#allocation2] sm:$0xff] %vm19_vm0, %v88_v1  ;;  %v84_v2 = vld [vmem:[%s124_s1] sm:$0xff] }
   0x2   :  { %50 = vmatpush.bf16.msra.mxu0 %v85_v0  ;;  %v21_v3 = vld [vmem:[%s125_s0] sm:$0xff] }
   0x3   :  { %v22_v4 = vpack.c.bf16 %v21_v3, %v21_v3  ;;  %v87_v8 = vld [vmem:[%s126_s2] ss:$0 sm:$0xff] }
   0x6   :  { %51 = vmatpush.bf16.msra.mxu0 %v84_v2 }
   0x8   :  { %v23_v5 = vld [vmem:[#allocation2] sm:$0xff] }
   0x9   :  { %83 = vmatmul.msk.bf16.vlgmr.msra.gmra.mxu0 %vm19_vm0, %v22_v4 }
  0x86   :  { %v53_v6 = vpop.f32.mrf.mxu0 }
  0x87   :  { %v57_v7 = vadd.f32 %v53_v6, %v23_v5 }
  0x89   :  { %58 = vst.msk [vmem:[#allocation2] sm:$0xff] %vm19_vm0, %v57_v7 }
  0x8e   :  { %v55_v9 = vpop.f32.mrf.mxu0 }
  0x90   :  { %v62_v10 = vld [vmem:[#allocation2] sm:$0xff] }
  0x91   :  { %v67_v11 = vadd.f32 %v87_v8, %v62_v10 }
  0x93   :  { %v68_v12 = vpack.c.bf16 %v67_v11, %v67_v11 }
  0x95   :  { %70 = vst.msk [vmem:[%s127_s3] sm:$0xf] %vm69_vm1, %v68_v12 }

// kernel: classifier_forward.21
= control target key start
LH: loop header
LB: loop body
LE: loop exit
PB: predicated region body
PF: predicated region fallthrough
CT: control target
= control target key end

     0   :  { %9 = vsyncpa [#allocation4], 0  ;;  %s642_s15 = smov 0   ;;  %s644_s16 = smov 0   ;;  %s691_s0 = inlined_call_operand.vmem [shape: bf16[16,32], index: 0, kind: input, shape index: {}]   ;;  %s692_s1 = inlined_call_operand.vmem [shape: bf16[32,32], index: 1, kind: input, shape index: {}]   ;;  %s693_s2 = inlined_call_operand.hbm [shape: f32[1,32], index: 2, kind: input, shape index: {}]   ;;  %s694_s3 = inlined_call_operand.vmem [shape: bf16[16,32], index: 3, kind: input, shape index: {}]   ;;  %s695_s4 = inlined_call_operand.vmem [shape: bf16[16,32], index: 4, kind: output, shape index: {}]  }
   0x1   :  { %s646_s17 = smov 0  }
   0x2 LB: > { %s496_s18 = sadd.s32 4294967295, %s613_s17   ;;  %s34_s19 = sadd.s32 1, %s609_s16  ;;  %s613_s17 = sphi %s646_s17, %s15_s17   ;;  %s609_s16 = sphi %s644_s16, %s697_s16   ;;  %s605_s15 = sphi %s642_s15, %s696_s15  }
   0x3   : > { %p36_p0 = scmp.ge.s32.totalorder %s34_s19, 2  ;;  %p498_p1 = scmp.ge.s32.totalorder %s613_s17, 1 }
   0x4   : > { %p177_p2 = scmp.lt.s32.totalorder %s613_s17, 3  ;;  %p528_p4 = scmp.eq.s32.totalorder %s496_s18, 0 }
   0x5   : > { %s699_s19 = smov (%p36_p0, %s34_s19), 0  ;;  %s202_s22 = sshll.u32 %s693_s2, 4  ;;  %s203_s22 = int_to_ptr.hbm [resolvable:$true] %s202_s22 }
   0x6   : > { %p178_p3 = pnand %p498_p1, %p177_p2  ;;  %s615_s23 = smov [#allocation3]  }
   0x7   : > { %s204_s24 = sshll.u32 %s615_s23, 4  ;;  %s205_s24 = int_to_ptr.vmem [resolvable:$true] %s204_s24 }
   0x8   : > { %p524_p5 = pneg %p178_p3  ;;  %237 = sbr.rel (%p178_p3) target bundleno = 165 (0xa5), region = 36 }
   0xa   : > { %p525_p6 = pnand %p528_p4, %p524_p5 }
   0xc   : > { %527 = dma.hbm_to_vmem [thread:$0]  (!%p525_p6), %s203_s22, 16, %s205_s24, [#allocation4]  }
   0xd   : > { %600 = dma.done.wait (%p528_p4), [#allocation4], 16  }
   0xe   : > { %602 = vsyncadd (%p528_p4), [#allocation4], 4294967280  ;;  %p283_p7 = scmp.lt.s32.totalorder %s605_s15, 1  ;;  %vm318_vm0 = vcmask 261120   ;;  %v616_v0 = vmov 0.0   ;;  %v519_v1 = vld [vmem:[%s692_s1 + $0x8] sm:$0xff] }
   0xf   : > { %319 = vst.msk [vmem:[#allocation2] sm:$0xff] %vm318_vm0, %v616_v0  ;;  %348 = vmatpush.bf16.msra.mxu0 %v519_v1  ;;  %v518_v2 = vld [vmem:[%s692_s1] sm:$0xff]  ;;  %v556_v8 = vld [vmem:[#allocation3] ss:$0 sm:$0xff]  ;;  %vm370_vm1 = vcmask 257024  }
  0x10   : > { %s701_s15 = smov (!%p283_p7, %s605_s15), 1 }
  0x11   : > { %s504_s27 = sshll.u32 %s701_s15, 2 }
  0x12   : > { %s289_s6 = scalar_lea.vmem %s691_s0, %s504_s27  ;;  %s305_s9 = scalar_lea.vmem %s694_s3, %s504_s27 }
  0x13   : > { %349 = vmatpush.bf16.msra.mxu0 %v518_v2  ;;  %v320_v3 = vld [vmem:[%s289_s6] sm:$0xf]  ;;  %s312_s12 = scalar_lea.vmem %s695_s4, %s504_s27 }
  0x14   : > { %v366_v7 = vld [vmem:[%s305_s9] sm:$0xf] }
  0x15   : > { %v367_v10 = vunpack.c.l.bf16 %v366_v7 }
  0x16   : > { %515 = vmatmul.msk.bf16.vlgmr.msra.gmra.mxu0 %vm318_vm0, %v320_v3  ;;  %v321_v4 = vld [vmem:[#allocation2] sm:$0xff] }
  0x93   : > { %v351_v5 = vpop.f32.mrf.mxu0 }
  0x94   : > { %v355_v6 = vadd.f32 %v351_v5, %v321_v4 }
  0x96   : > { %356 = vst.msk [vmem:[#allocation2] sm:$0xff] %vm318_vm0, %v355_v6 }
  0x9b   : > { %v353_v9 = vpop.f32.mrf.mxu0 }
  0x9d   : > { %v360_v11 = vld [vmem:[#allocation2] sm:$0xff] }
  0x9e   : > { %v365_v12 = vadd.f32 %v556_v8, %v360_v11 }
  0xa0   : > { %v368_v13 = vadd.f32 %v367_v10, %v365_v12 }
  0xa2   : > { %v369_v14 = vpack.c.bf16 %v368_v13, %v368_v13 }
  0xa4   : > { %371 = vst.msk [vmem:[%s312_s12] sm:$0xf] %vm370_vm1, %v369_v14 }
  0xa5 PF: > { %s15_s17 = sadd.s32 1, %s613_s17   ;;  %s696_s15 = smov %s609_s16 }
  0xa6   : > { %p12_p8 = scmp.ge.s32.totalorder %s15_s17, 4   ;;  %s697_s16 = smov %s699_s19 }
  0xa8   :  { %14 = sbr.rel (!%p12_p8) target bundleno = 2 (0x2), region = 86 }
  0xad   :  { %397 = vsyncpa [#allocation4], 1 }
  0xae   :  { %399 = vsyncpa [#allocation4 + $0x1], 1 }

// kernel: classifier_forward.22
= control target key start
LH: loop header
LB: loop body
LE: loop exit
PB: predicated region body
PF: predicated region fallthrough
CT: control target
= control target key end

     0   :  { %12 = vsyncpa [#allocation3], 0  ;;  %s977_s0 = inlined_call_operand.vmem [shape: bf16[16,32], index: 0, kind: input, shape index: {}]   ;;  %s978_s1 = inlined_call_operand.vmem [shape: bf16[32,32], index: 1, kind: input, shape index: {}]   ;;  %s979_s2 = inlined_call_operand.hbm [shape: bf16[32,32], index: 2, kind: input, shape index: {}]   ;;  %s980_s3 = inlined_call_operand.vmem [shape: f32[1,32], index: 3, kind: input, shape index: {}]   ;;  %s981_s4 = inlined_call_operand.vmem [shape: f32[1,32], index: 4, kind: input, shape index: {}]   ;;  %s982_s5 = inlined_call_operand.vmem [shape: f32[1,32], index: 5, kind: input, shape index: {}]   ;;  %s983_s6 = inlined_call_operand.hbm [shape: f32[1,32], index: 6, kind: input, shape index: {}]   ;;  %s984_s7 = inlined_call_operand.vmem [shape: bf16[16,32], index: 7, kind: output, shape index: {}]  }
   0x1   :  { %13 = vsyncpa [#allocation5], 0  ;;  %s885_s24 = smov 0   ;;  %s887_s25 = smov 0  }
   0x2   :  { %s889_s26 = smov 0  }
   0x3 LB: > { %s649_s27 = sadd.s32 4294967295, %s838_s26   ;;  %s31_s28 = sadd.s32 1, %s834_s25  ;;  %s838_s26 = sphi %s889_s26, %s19_s26   ;;  %s834_s25 = sphi %s887_s25, %s988_s25   ;;  %s830_s24 = sphi %s885_s24, %s987_s24  }
   0x4   : > { %p33_p0 = scmp.ge.s32.totalorder %s31_s28, 2  ;;  %p651_p1 = scmp.ge.s32.totalorder %s838_s26, 1 }
   0x5   : > { %p236_p2 = scmp.lt.s32.totalorder %s838_s26, 3  ;;  %p910_p4 = scmp.eq.s32.totalorder %s649_s27, 0 }
   0x6   : > { %s990_s28 = smov (%p33_p0, %s31_s28), 0  ;;  %s256_s10 = sshll.u32 %s979_s2, 4  ;;  %s257_s10 = int_to_ptr.hbm [resolvable:$true] %s256_s10 }
   0x7   : > { %p906_p3 = pnand %p651_p1, %p236_p2  ;;  %s840_s11 = smov [#allocation2]  }
   0x8   : > { %s258_s12 = sshll.u32 %s840_s11, 4  ;;  %s286_s15 = sshll.u32 %s983_s6, 4  ;;  %s259_s12 = int_to_ptr.vmem [resolvable:$true] %s258_s12  ;;  %s287_s15 = int_to_ptr.hbm [resolvable:$true] %s286_s15 }
   0x9   : > { %p696_p5 = pneg %p906_p3  ;;  %s841_s16 = smov 64  }
   0xa   : > { %s842_s17 = smov 4   ;;  %s843_s18 = smov [#allocation4]  }
   0xb   : > { %p697_p6 = pnand %p910_p4, %p696_p5  ;;  %s288_s19 = sshll.u32 %s843_s18, 4  ;;  %s289_s19 = int_to_ptr.vmem [resolvable:$true] %s288_s19 }
   0xc   : > { %308 = sbr.rel (%p906_p3) target bundleno = 459 (0x1cb), region = 48 }
   0xd   : > { %699 = dma.hbm_to_vmem [thread:$0]  (!%p697_p6), %s257_s10, 256, %s259_s12, [#allocation3], %s841_s16, %s841_s16, %s842_s17  }
   0xe   : > { %702 = dma.hbm_to_vmem [thread:$0]  (!%p697_p6), %s287_s15, 16, %s289_s19, [#allocation5]  }
  0x11   : > { %821 = dma.done.wait (%p910_p4), [#allocation3], 256  }
  0x12   : > { %823 = vsyncadd (%p910_p4), [#allocation3], 4294967040 }
  0x13   : > { %825 = dma.done.wait (%p910_p4), [#allocation5], 16  }
  0x14   : > { %827 = vsyncadd (%p910_p4), [#allocation5], 4294967280  ;;  %p357_p7 = scmp.lt.s32.totalorder %s830_s24, 1  ;;  %vm381_vm0 = vcmask 261120   ;;  %v844_v3 = vmov 32.0   ;;  %v685_v15 = vld [vmem:[%s978_s1 + $0x8] sm:$0xff] }
  0x15   : > { %740 = vrcp.f32 %v844_v3  ;;  %v687_v16 = vld [vmem:[#allocation2 + $0x8] sm:$0xff]  ;;  %451 = vmatpush.bf16.msra.mxu0 %v685_v15  ;;  %v684_v17 = vld [vmem:[%s978_s1] sm:$0xff]  ;;  %v737_v31 = vld [vmem:[#allocation4] ss:$0 sm:$0xff]  ;;  %vm512_vm9 = vcmask 257024  }
  0x16   : > { %s992_s24 = smov (!%p357_p7, %s830_s24), 1  ;;  %484 = vmatpush.bf16.msra.mxu1 %v687_v16  ;;  %v686_v18 = vld [vmem:[#allocation2] sm:$0xff] }
  0x17   : > { %s661_s20 = sshll.u32 %s992_s24, 2  ;;  %v736_v28 = vld [vmem:[%s982_s5] ss:$0 sm:$0xff] }
  0x18   : > { %s360_s23 = scalar_lea.vmem %s977_s0, %s661_s20  ;;  %v739_v35 = vld [vmem:[%s981_s4] ss:$0 sm:$0xff]  ;;  %s377_s17 = scalar_lea.vmem %s984_s7, %s661_s20 }
  0x19   : > { %v379_v0 = vld [vmem:[%s360_s23] sm:$0xf]  ;;  %452 = vmatpush.bf16.msra.mxu0 %v684_v17 }
  0x1a   : > { %v380_v1 = vunpack.c.l.bf16 %v379_v0  ;;  %485 = vmatpush.bf16.msra.mxu1 %v686_v18  ;;  %v738_v48 = vld [vmem:[%s980_s3] ss:$0 sm:$0xff] }
  0x1b   : > { %v741_v4 = vpop.eup %740 }
  0x1c   : > { %v382_v2 = vsel %vm381_vm0, %v380_v1, 0.0  ;;  %v386_v5 = vmul.f32 32.0, %v741_v4  ;;  %vm390_vm1 = vweird.f32 %v741_v4 }
  0x1d   : > { %383 = vadd.xlane.f32.xlu0 %v382_v2 }
  0x1e   : > { %v387_v6 = vsub.f32 1.0, %v386_v5 }
  0x20   : > { %v388_v7 = vmul.f32 %v741_v4, %v387_v6 }
  0x22   : > { %v389_v8 = vadd.f32 %v741_v4, %v388_v7 }
  0x24   : > { %v391_v9 = vsel %vm390_vm1, %v741_v4, %v389_v8 }
  0x90   : > { %v384_v10 = vpop.xlane.xlu0 %383 }
  0x91   : > { %v392_v11 = vmul.f32 %v391_v9, %v384_v10 }
  0x93   : > { %v393_v12 = vsub.f32 %v380_v1, %v392_v11 }
  0x95   : > { %v394_v13 = vmul.f32 %v393_v12, %v393_v12 }
  0x97   : > { %v395_v14 = vsel %vm381_vm0, %v394_v13, 0.0 }
  0x98   : > { %396 = vadd.xlane.f32.xlu0 %v395_v14 }
 0x10b   : > { %v397_v19 = vpop.xlane.xlu0 %396 }
 0x10c   : > { %v398_v20 = vmul.f32 %v397_v19, %v391_v9 }
 0x10e   : > { %v399_v21 = vadd.f32 1e-05, %v398_v20 }
 0x110   : > { %742 = vrsqrt.f32 %v399_v21  ;;  %vm406_vm3 = vweird.f32 %v399_v21 }
 0x116   : > { %v743_v22 = vpop.eup %742 }
 0x117   : > { %v401_v23 = vmul.f32 %v743_v22, %v399_v21  ;;  %vm407_vm2 = vweird.f32 %v743_v22 }
 0x118   : > { %vm408_vm4 = vmor %vm406_vm3, %vm407_vm2 }
 0x119   : > { %v402_v24 = vmul.f32 %v743_v22, %v401_v23 }
 0x11b   : > { %v403_v25 = vmul.f32 0.5, %v402_v24 }
 0x11d   : > { %v404_v26 = vsub.f32 1.5, %v403_v25 }
 0x11f   : > { %v405_v27 = vmul.f32 %v743_v22, %v404_v26 }
 0x121   : > { %v409_v29 = vsel %vm408_vm4, %v743_v22, %v405_v27 }
 0x122   : > { %v410_v30 = vmul.f32 %v409_v29, %v393_v12 }
 0x124   : > { %v415_v32 = vmul.f32 %v736_v28, %v410_v30 }
 0x126   : > { %v420_v33 = vadd.f32 %v737_v31, %v415_v32 }
 0x128   : > { %v421_v34 = vpack.c.bf16 %v420_v33, %v420_v33 }
 0x12a   : > { %671 = vmatmul.msk.bf16.vlgmr.msra.gmra.mxu0 %vm381_vm0, %v421_v34  ;;  %680 = vmatmul.msk.bf16.vlgmr.msra.gmra.mxu1 %vm381_vm0, %v421_v34 }
 0x1a7   : > { %v454_v36 = vpop.f32.mrf.mxu0  ;;  %v487_v37 = vpop.f32.mrf.mxu1 }
 0x1a8   : > { %v488_v38 = vadd.f32 %v739_v35, %v487_v37  ;;  %v455_v53 = vadd.f32 %v738_v48, %v454_v36 }
 0x1aa   : > { %v681_v39 = vmul.f32 -1.442695, %v488_v38 }
 0x1ac   : > { %744 = vpow2.f32 %v681_v39 }
 0x1af   : > { %v456_v40 = vpop.f32.mrf.mxu0  ;;  %v489_v41 = vpop.f32.mrf.mxu1 }
 0x1b2   : > { %v745_v42 = vpop.eup %744 }
 0x1b3   : > { %v494_v43 = vadd.f32 1.0, %v745_v42 }
 0x1b5   : > { %746 = vrcp.f32 %v494_v43  ;;  %v506_v47 = vand.u32 2147483648, %v494_v43  ;;  %v504_v50 = vand.u32 2147483647, %v494_v43  ;;  %vm500_vm6 = vweird.f32 %v494_v43 }
 0x1b7   : > { %v507_v52 = vor.u32 1.1754944e-38, %v506_v47  ;;  %vm505_vm8 = vcmp.eq.f32.partialorder %v504_v50, 8.507059e+37 }
 0x1bb   : > { %v747_v44 = vpop.eup %746 }
 0x1bc   : > { %v496_v45 = vmul.f32 %v747_v44, %v494_v43  ;;  %vm501_vm5 = vweird.f32 %v747_v44 }
 0x1bd   : > { %vm502_vm7 = vmor %vm500_vm6, %vm501_vm5 }
 0x1be   : > { %v497_v46 = vsub.f32 1.0, %v496_v45 }
 0x1c0   : > { %v498_v49 = vmul.f32 %v747_v44, %v497_v46 }
 0x1c2   : > { %v499_v51 = vadd.f32 %v747_v44, %v498_v49 }
 0x1c4   : > { %v503_v54 = vsel %vm502_vm7, %v747_v44, %v499_v51 }
 0x1c5   : > { %v508_v55 = vsel %vm505_vm8, %v507_v52, %v503_v54 }
 0x1c6   : > { %v510_v56 = vmul.f32 %v508_v55, %v455_v53 }
 0x1c8   : > { %v511_v57 = vpack.c.bf16 %v510_v56, %v510_v56 }
 0x1ca   : > { %513 = vst.msk [vmem:[%s377_s17] sm:$0xf] %vm512_vm9, %v511_v57 }
 0x1cb PF: > { %s19_s26 = sadd.s32 1, %s838_s26   ;;  %s987_s24 = smov %s834_s25 }
 0x1cc   : > { %p16_p8 = scmp.ge.s32.totalorder %s19_s26, 4   ;;  %s988_s25 = smov %s990_s28 }
 0x1ce   :  { %18 = sbr.rel (!%p16_p8) target bundleno = 3 (0x3), region = 97 }
 0x1d3   :  { %539 = vsyncpa [#allocation3], 1 }
 0x1d4   :  { %541 = vsyncpa [#allocation3 + $0x1], 1 }
 0x1d5   :  { %542 = vsyncpa [#allocation5], 1 }

// kernel: classifier_forward.20
= control target key start
LH: loop header
LB: loop body
LE: loop exit
PB: predicated region body
PF: predicated region fallthrough
CT: control target
= control target key end

     0   :  { %9 = vsyncpa [#allocation3], 0  ;;  %s1444_s0 = inlined_call_operand.vmem [shape: bf16[2,8,96], index: 0, kind: input, shape index: {}]   ;;  %s1445_s1 = inlined_call_operand.vmem [shape: bf16[8,32], index: 1, kind: input, shape index: {}]   ;;  %s1446_s2 = inlined_call_operand.hbm [shape: f32[4,8], index: 2, kind: input, shape index: {}]   ;;  %s1447_s3 = inlined_call_operand.hbm [shape: f32[4,8], index: 3, kind: input, shape index: {}]   ;;  %s1448_s4 = inlined_call_operand.vmem [shape: bf16[2,8,32], index: 4, kind: output, shape index: {}]  }
   0x1   :  { %10 = vsyncpa [#allocation5], 0  ;;  %s1148_s15 = smov 0  }
   0x2 LB: > { %s151_s18 = sshll.u32 %s1446_s2, 4  ;;  %s937_s19 = sadd.s32 4294967295, %s1100_s15   ;;  %s1100_s15 = sphi %s1148_s15, %s16_s15   ;;  %s152_s18 = int_to_ptr.hbm [resolvable:$true] %s151_s18 }
   0x3   : > { %p939_p0 = scmp.ge.s32.totalorder %s1100_s15, 1  ;;  %p136_p1 = scmp.lt.s32.totalorder %s1100_s15, 3 }
   0x4   : > { %p977_p2 = scmp.eq.s32.totalorder %s937_s19, 0  ;;  %s1102_s21 = smov [#allocation2]  }
   0x5   : > { %p1159_p3 = pnand %p939_p0, %p136_p1  ;;  %s153_s22 = sshll.u32 %s1102_s21, 4  ;;  %s154_s22 = int_to_ptr.vmem [resolvable:$true] %s153_s22 }
   0x6   : > { %s163_s25 = sshll.u32 %s1447_s3, 4  ;;  %s1103_s26 = smov [#allocation4]   ;;  %s164_s25 = int_to_ptr.hbm [resolvable:$true] %s163_s25 }
   0x7   : > { %p970_p4 = pneg %p1159_p3  ;;  %s165_s27 = sshll.u32 %s1103_s26, 4  ;;  %s166_s27 = int_to_ptr.vmem [resolvable:$true] %s165_s27 }
   0x8   : > { %185 = sbr.rel (%p1159_p3) target bundleno = 4237 (0x108d), region = 36 }
   0x9   : > { %p971_p5 = pnand %p977_p2, %p970_p4 }
   0xb   : > { %973 = dma.hbm_to_vmem [thread:$0]  (!%p971_p5), %s152_s18, 64, %s154_s22, [#allocation3]  }
   0xc   : > { %976 = dma.hbm_to_vmem [thread:$0]  (!%p971_p5), %s164_s25, 64, %s166_s27, [#allocation5]  }
   0xd   : > { %1091 = dma.done.wait (%p977_p2), [#allocation3], 64  }
   0xe   : > { %1093 = vsyncadd (%p977_p2), [#allocation3], 4294967232 }
   0xf   : > { %1095 = dma.done.wait (%p977_p2), [#allocation5], 64  }
  0x10   : > { %1097 = vsyncadd (%p977_p2), [#allocation5], 4294967232  ;;  %p215_p6 = scmp.lt.s32.totalorder %s937_s19, 1  ;;  %vm238_vm0 = vcmask 64512   ;;  %v225_v0 = vld [vmem:[%s1445_s1] sm:$0xf]  ;;  %v258_v32 = vlaneseq }
  0x11   : > { %v230_v2 = vld [vmem:[#allocation4] sm:$0x1]  ;;  %v243_v3 = vsel %vm238_vm0, %v225_v0, 0  ;;  %s1104_s8 = smov 8   ;;  %v385_v12 = vld [vmem:[#allocation4 + $0x1] sm:$0x1]  ;;  %v405_v15 = vunpack.c.l.b16 %v225_v0 }
  0x12   : > { %s1457_s19 = smov (!%p215_p6, %s937_s19), 1  ;;  %v231_v5 = vmul.f32 0.17677669, %v230_v2  ;;  %252 = vmatpush.bf16.xpose.msra.mxu0 %v243_v3  ;;  %v386_v13 = vmul.f32 0.17677669, %v385_v12  ;;  %s1105_s9 = smov 120  }
  0x13   : > { %s946_s28 = sshll.u32 %s1457_s19, 2  ;;  %v1196_v16 = vpack.c.b16 %v405_v15, %v405_v15  ;;  %vm262_vm1 = vcmask 1047616   ;;  %s1106_s10 = smov 121   ;;  %v1213_v33 = vshrl.u32 %v258_v32, 7  ;;  %v228_v62 = vld [vmem:[#allocation2] sm:$0x1] }
  0x14   : > { %s218_s5 = scalar_lea.vmem %s1444_s0, %s946_s28  ;;  %v235_v7 = vperm.slane %v231_v5, 0  ;;  %v394_v14 = vperm.slane %v386_v13, 0  ;;  %s1107_s11 = smov 127   ;;  %v229_v63 = vmul.f32 0.17677669, %v228_v62  ;;  %vm366_vm7 = vcmask 1043456  }
  0x15   : > { %v1186_v1 = vld [vmem:[%s218_s5] sm:$0xf]  ;;  %v269_v34 = vand.u32 1, %v1213_v33  ;;  %s1108_s12 = smov 96   ;;  %v282_v48 = vand.u32 2, %v1213_v33  ;;  %s1109_s13 = smov 122  }
  0x16   : > { %v226_v4 = vunpack.c.l.bf16 %v1186_v1  ;;  %396 = vrot.lane.b32.xlu1 %v394_v14, %s1104_s8  ;;  %v326_v46 = vunpack.c.l.b16 %v1186_v1  ;;  %s1110_s14 = smov 126   ;;  %v232_v0 = vperm.slane %v229_v63, 0  ;;  %s1111_s16 = smov 64   ;;  %vm855_vm8 = vcmask 130048  }
  0x17   : > { %vm1216_vm2 = vcmp.ne.s32.totalorder %v269_v34, 0  ;;  %vm1237_vm3 = vcmp.ne.s32.totalorder %v282_v48, 0  ;;  %s1112_s17 = smov 124   ;;  %s1113_s18 = smov 88   ;;  %vm857_vm9 = vcmask 195584   ;;  %vm860_vm10 = vcmask 257024  }
  0x18   : > { %v1190_v6 = vmul.f32 0.17677669, %v226_v4  ;;  %v1233_v47 = vpack.c.b16 %v326_v46, %v326_v46  ;;  %v383_v4 = vld [vmem:[#allocation2 + $0x1] sm:$0x1]  ;;  %s1114_s20 = smov 16   ;;  %s1115_s21 = smov 56  }
  0x19   : > { %s1116_s22 = smov 112   ;;  %s1117_s23 = smov 24  }
  0x1a   : > { %v236_v8 = vadd.f32 %v235_v7, %v1190_v6  ;;  %v233_v1 = vadd.f32 %v232_v0, %v1190_v6  ;;  %s1118_s24 = smov 104   ;;  %s1119_s25 = smov 80  }
  0x1b   : > { %s1120_s26 = smov 72   ;;  %s1121_s27 = smov 40  }
  0x1c   : > { %v237_v9 = vpack.c.bf16 %v236_v8, %v236_v8  ;;  %v234_v2 = vpack.c.bf16 %v233_v1, %v233_v1  ;;  %v384_v8 = vmul.f32 0.17677669, %v383_v4  ;;  %s1122_s29 = smov 48   ;;  %s222_s6 = scalar_lea.vmem %s1448_s4, %s946_s28 }
  0x1e   : > { %948 = vmatmul.msk.bf16.vlgmr.msra.gmra.mxu0 %vm238_vm0, %v237_v9  ;;  %407 = vrot.lane.b32.xlu1 %v1196_v16, %s1105_s9  ;;  %v387_v9 = vperm.slane %v384_v8, 0 }
  0x88   : > { %v397_v19 = vpop.permute.xlu1 %396 }
  0x89   : > { %v399_v22 = vadd.f32 %v397_v19, %v1190_v6 }
  0x8b   : > { %v400_v23 = vpack.c.bf16 %v399_v22, %v399_v22 }
  0x90   : > { %v408_v24 = vpop.permute.xlu1 %407 }
  0x91   : > { %v413_v25 = vsel %vm238_vm0, %v408_v24, 0  ;;  %v1279_v24 = vadd.s32 2, %v1213_v33 }
  0x92   : > { %422 = vmatpush.bf16.xpose.msra.mxu3 %v413_v25 }
  0x9b   : > { %v254_v10 = vpop.f32.mrf.mxu0 }
  0x9c   : > { %263 = vrot.lane.b32.xlu0 %v254_v10, %s1104_s8 }
  0xa3   : > { %v256_v11 = vpop.f32.mrf.mxu0 }
 0x10e   : > { %v264_v17 = vpop.permute.xlu0 %263 }
 0x10f   : > { %v265_v18 = vsel %vm262_vm1, %v264_v17, %v254_v10 }
 0x110   : > { %266 = vrot.lane.b32.xlu0 %v265_v18, %s1104_s8 }
 0x182   : > { %v267_v20 = vpop.permute.xlu0 %266 }
 0x183   : > { %v268_v21 = vsel %vm262_vm1, %v267_v20, %v254_v10  ;;  %v298_v10 = vand.u32 4, %v1213_v33 }
 0x184   : > { %272 = vrot.lane.b32.xlu2 %v268_v21, %s1106_s10 }
 0x185   : > { %vm1262_vm4 = vcmp.ne.s32.totalorder %v298_v10, 0 }
 0x18c   : > { %402 = vrot.lane.b32.xlu2 %v400_v23, %s1105_s9  ;;  %v1276_v23 = vand.u32 127, %v258_v32 }
 0x18e   : > { %vm319_vm5 = vcmp.le.s32.totalorder %v1276_v23, %v1213_v33  ;;  %vm322_vm6 = vcmp.ge.s32.totalorder %v1276_v23, %v1279_v24 }
 0x1de   : > { %v273_v26 = vpop.permute.xlu2 %272 }
 0x1df   : > { %275 = vrot.lane.b32.xlu0 %v273_v26, %s1104_s8 }
 0x1e6   : > { %v403_v27 = vpop.permute.xlu2 %402 }
 0x1e7   : > { %951 = vmatmul.msk.bf16.vlgmr.msra.gmra.mxu3 %vm238_vm0, %v403_v27 }
 0x251   : > { %v276_v28 = vpop.permute.xlu0 %275 }
 0x252   : > { %v277_v29 = vsel %vm262_vm1, %v276_v28, %v273_v26 }
 0x253   : > { %278 = vrot.lane.b32.xlu1 %v277_v29, %s1104_s8 }
 0x26a   : > { %v424_v30 = vpop.f32.mrf.mxu3 }
 0x26b   : > { %428 = vrot.lane.b32.xlu1 %v424_v30, %s1104_s8 }
 0x272   : > { %v426_v31 = vpop.f32.mrf.mxu3 }
 0x2c5   : > { %v279_v36 = vpop.permute.xlu1 %278 }
 0x2c6   : > { %v280_v37 = vsel %vm262_vm1, %v279_v36, %v273_v26 }
 0x2c7   : > { %v281_v38 = vsel %vm1216_vm2, %v280_v37, %v268_v21 }
 0x2c8   : > { %285 = vrot.lane.b32.xlu2 %v281_v38, %s1106_s10 }
 0x2dd   : > { %v429_v39 = vpop.permute.xlu1 %428 }
 0x2de   : > { %v430_v40 = vsel %vm262_vm1, %v429_v39, %v424_v30 }
 0x2df   : > { %431 = vrot.lane.b32.xlu1 %v430_v40, %s1104_s8 }
 0x322   : > { %v286_v41 = vpop.permute.xlu2 %285 }
 0x323   : > { %288 = vrot.lane.b32.xlu0 %v286_v41, %s1104_s8 }
 0x32b   : > { %294 = vrot.lane.b32.xlu0 %v281_v38, %s1107_s11 }
 0x351   : > { %v432_v42 = vpop.permute.xlu1 %431 }
 0x352   : > { %v433_v43 = vsel %vm262_vm1, %v432_v42, %v424_v30 }
 0x353   : > { %435 = vrot.lane.b32.xlu1 %v433_v43, %s1106_s10 }
 0x395   : > { %v289_v44 = vpop.permute.xlu0 %288 }
 0x396   : > { %v290_v45 = vsel %vm262_vm1, %v289_v44, %v286_v41 }
 0x397   : > { %291 = vrot.lane.b32.xlu2 %v290_v45, %s1104_s8 }
 0x39d   : > { %v295_v51 = vpop.permute.xlu0 %294 }
 0x39f   : > { %328 = vrot.lane.b32.xlu2 %v1233_v47, %s1108_s12 }
 0x3c5   : > { %v436_v54 = vpop.permute.xlu1 %435 }
 0x3f1   : > { %v292_v50 = vpop.permute.xlu2 %291 }
 0x3f2   : > { %v293_v52 = vsel %vm262_vm1, %v292_v50, %v286_v41 }
 0x3f3   : > { %v297_v53 = vsel %vm1237_vm3, %v293_v52, %v295_v51 }
 0x3f4   : > { %301 = vrot.lane.b32.xlu0 %v297_v53, %s1109_s13 }
 0x3f9   : > { %v329_v55 = vpop.permute.xlu2 %328 }
 0x3fa   : > { %v334_v56 = vsel %vm238_vm0, %v329_v55, 0 }
 0x3fb   : > { %343 = vmatpush.bf16.xpose.msra.mxu1 %v334_v56 }
 0x3fc   : > { %438 = vrot.lane.b32.xlu0 %v436_v54, %s1104_s8 }
 0x402   : > { %949 = vmatmul.msk.bf16.vlgmr.msra.gmra.mxu1 %vm238_vm0, %v234_v2 }
 0x466   : > { %v302_v57 = vpop.permute.xlu0 %301 }
 0x467   : > { %304 = vrot.lane.b32.xlu2 %v302_v57, %s1104_s8 }
 0x46e   : > { %v439_v58 = vpop.permute.xlu0 %438 }
 0x46f   : > { %310 = vrot.lane.b32.xlu2 %v297_v53, %s1110_s14  ;;  %v440_v59 = vsel %vm262_vm1, %v439_v58, %v436_v54 }
 0x470   : > { %441 = vrot.lane.b32.xlu0 %v440_v59, %s1104_s8 }
 0x47f   : > { %v345_v21 = vpop.f32.mrf.mxu1 }
 0x487   : > { %v347_v22 = vpop.f32.mrf.mxu1 }
 0x4c1   : > { %v305_v60 = vpop.permute.xlu2 %304 }
 0x4c2   : > { %v306_v61 = vsel %vm262_vm1, %v305_v60, %v302_v57  ;;  %v540_v60 = vld [vmem:[#allocation4 + $0x2] sm:$0x1] }
 0x4c3   : > { %307 = vrot.lane.b32.xlu1 %v306_v61, %s1104_s8  ;;  %v541_v62 = vmul.f32 0.17677669, %v540_v60 }
 0x4c5   : > { %v549_v63 = vperm.slane %v541_v62, 0 }
 0x4c9   : > { %v311_v13 = vpop.permute.xlu2 %310 }
 0x4e2   : > { %v442_v3 = vpop.permute.xlu0 %441 }
 0x4e3   : > { %v443_v5 = vsel %vm262_vm1, %v442_v3, %v436_v54 }
 0x4e4   : > { %v444_v7 = vsel %vm1216_vm2, %v443_v5, %v433_v43 }
 0x4e5   : > { %446 = vrot.lane.b32.xlu2 %v444_v7, %s1106_s10 }
 0x4ed   : > { %389 = vrot.lane.b32.xlu2 %v387_v9, %s1104_s8 }
 0x4f5   : > { %455 = vrot.lane.b32.xlu2 %v444_v7, %s1107_s11  ;;  %v692_v7 = vld [vmem:[#allocation4 + $0x3] sm:$0x1] }
 0x4f6   : > { %v693_v8 = vmul.f32 0.17677669, %v692_v7 }
 0x4f8   : > { %v701_v10 = vperm.slane %v693_v8, 0 }
 0x4fd   : > { %361 = vrot.lane.b32.xlu2 %v1233_v47, %s1111_s16 }
 0x505   : > { %484 = vrot.lane.b32.xlu2 %v1233_v47, %s1113_s18 }
 0x535   : > { %v308_v12 = vpop.permute.xlu1 %307 }
 0x536   : > { %v309_v14 = vsel %vm262_vm1, %v308_v12, %v302_v57 }
 0x537   : > { %v313_v15 = vsel %vm1262_vm4, %v309_v14, %v311_v13 }
 0x538   : > { %315 = vrot.lane.b32.xlu1 %v313_v15, %s1112_s17 }
 0x53f   : > { %v447_v17 = vpop.permute.xlu2 %446 }
 0x540   : > { %449 = vrot.lane.b32.xlu1 %v447_v17, %s1104_s8 }
 0x547   : > { %v390_v18 = vpop.permute.xlu2 %389 }
 0x548   : > { %v392_v19 = vadd.f32 %v390_v18, %v1190_v6 }
 0x54a   : > { %v393_v20 = vpack.c.bf16 %v392_v19, %v392_v19 }
 0x54c   : > { %482 = vrot.lane.b32.xlu2 %v393_v20, %s1105_s9 }
 0x54f   : > { %v456_v36 = vpop.permute.xlu2 %455 }
 0x557   : > { %v362_v37 = vpop.permute.xlu2 %361 }
 0x558   : > { %v368_v38 = vsel %vm366_vm7, %v362_v37, 0 }
 0x559   : > { %377 = vmatpush.bf16.msra.mxu2 %v368_v38 }
 0x55f   : > { %v485_v39 = vpop.permute.xlu2 %484 }
 0x560   : > { %v490_v40 = vsel %vm238_vm0, %v485_v39, 0 }
 0x561   : > { %499 = vmatpush.bf16.xpose.msrb.mxu2 %v490_v40 }
 0x5a6   : > { %v483_v51 = vpop.permute.xlu2 %482 }
 0x5aa   : > { %v316_v25 = vpop.permute.xlu1 %315 }
 0x5ab   : > { %v318_v26 = vrot.slane %v316_v25, 1  ;;  %v320_v27 = vsel %vm319_vm5, %v316_v25, 0.0 }
 0x5ad   : > { %v323_v28 = vsel %vm322_vm6, %v318_v26, 0.0 }
 0x5ae   : > { %v324_v29 = vadd.f32 %v323_v28, %v320_v27 }
 0x5b0   : > { %v346_v30 = vadd.f32 %v345_v21, %v324_v29 }
 0x5b2   : > { %v450_v31 = vpop.permute.xlu1 %449  ;;  %v349_v32 = vsel %vm238_vm0, %v346_v30, -inf }
 0x5b3   : > { %350 = vmax.xlane.f32.xlu0 %v349_v32  ;;  %v451_v34 = vsel %vm262_vm1, %v450_v31, %v447_v17 }
 0x5b4   : > { %452 = vrot.lane.b32.xlu1 %v451_v34, %s1104_s8 }
 0x626   : > { %v453_v41 = vpop.permute.xlu1 %452  ;;  %v351_v42 = vpop.xlane.xlu0 %350 }
 0x627   : > { %v454_v43 = vsel %vm262_vm1, %v453_v41, %v447_v17  ;;  %v352_v44 = vsub.f32 %v346_v30, %v351_v42 }
 0x628   : > { %v458_v45 = vsel %vm1237_vm3, %v454_v43, %v456_v36 }
 0x629   : > { %v353_v46 = vmul.f32 1.442695, %v352_v44  ;;  %460 = vrot.lane.b32.xlu2 %v458_v45, %s1109_s13 }
 0x62b   : > { %1010 = vpow2.f32 %v353_v46 }
 0x631   : > { %v1011_v48 = vpop.eup %1010 }
 0x632   : > { %v355_v50 = vsel %vm238_vm0, %v1011_v48, 0.0 }
 0x633   : > { %356 = vadd.xlane.f32.xlu1 %v355_v50 }
 0x683   : > { %v461_v52 = vpop.permute.xlu2 %460 }
 0x684   : > { %463 = vrot.lane.b32.xlu0 %v461_v52, %s1104_s8 }
 0x6a6   : > { %v357_v53 = vpop.xlane.xlu1 %356 }
 0x6a7   : > { %1012 = vrcp.f32 %v357_v53 }
 0x6ad   : > { %v1013_v54 = vpop.eup %1012 }
 0x6ae   : > { %v359_v55 = vmul.f32 %v1013_v54, %v1011_v48 }
 0x6b0   : > { %v360_v56 = vpack.c.bf16 %v359_v55, %v359_v55 }
 0x6b2   : > { %950 = vmatmul.msk.bf16.vlgmr.msra.gmra.mxu2 %vm238_vm0, %v360_v56 }
 0x6c2   : > { %952 = vmatmul.msk.bf16.vlgmr.msrb.gmra.mxu2 %vm238_vm0, %v483_v51 }
 0x6f6   : > { %v464_v57 = vpop.permute.xlu0 %463 }
 0x6f7   : > { %v465_v58 = vsel %vm262_vm1, %v464_v57, %v461_v52 }
 0x6f8   : > { %466 = vrot.lane.b32.xlu2 %v465_v58, %s1104_s8 }
 0x700   : > { %469 = vrot.lane.b32.xlu2 %v458_v45, %s1110_s14 }
 0x708   : > { %551 = vrot.lane.b32.xlu2 %v549_v63, %s1114_s20 }
 0x710   : > { %703 = vrot.lane.b32.xlu2 %v701_v10, %s1117_s23  ;;  %v538_v10 = vld [vmem:[#allocation2 + $0x2] sm:$0x1] }
 0x735   : > { %v1307_v59 = vpop.f32.mrf.mxu2 }
 0x73d   : > { %v381_v61 = vpop.f32.mrf.mxu2 }
 0x745   : > { %v501_v0 = vpop.f32.mrf.mxu2 }
 0x74d   : > { %v503_v1 = vpop.f32.mrf.mxu2 }
 0x752   : > { %v467_v2 = vpop.permute.xlu2 %466 }
 0x753   : > { %v468_v3 = vsel %vm262_vm1, %v467_v2, %v461_v52 }
 0x75a   : > { %v470_v4 = vpop.permute.xlu2 %469 }
 0x75b   : > { %v472_v5 = vsel %vm1262_vm4, %v468_v3, %v470_v4 }
 0x75c   : > { %474 = vrot.lane.b32.xlu1 %v472_v5, %s1112_s17 }
 0x762   : > { %v552_v19 = vpop.permute.xlu2 %551 }
 0x763   : > { %v554_v20 = vadd.f32 %v552_v19, %v1190_v6 }
 0x764   : > { %517 = vrot.lane.b32.xlu1 %v1233_v47, %s1115_s21 }
 0x765   : > { %v555_v21 = vpack.c.bf16 %v554_v20, %v554_v20 }
 0x76a   : > { %v704_v27 = vpop.permute.xlu2 %703 }
 0x76b   : > { %v706_v29 = vadd.f32 %v704_v27, %v1190_v6 }
 0x76c   : > { %559 = vrot.lane.b32.xlu1 %v1196_v16, %s1116_s22 }
 0x76d   : > { %v707_v30 = vpack.c.bf16 %v706_v29, %v706_v29 }
 0x774   : > { %711 = vrot.lane.b32.xlu1 %v1196_v16, %s1118_s24 }
 0x77c   : > { %709 = vrot.lane.b32.xlu1 %v707_v30, %s1118_s24 }
 0x7ce   : > { %v475_v9 = vpop.permute.xlu1 %474 }
 0x7cf   : > { %v477_v12 = vrot.slane %v475_v9, 1  ;;  %v478_v13 = vsel %vm319_vm5, %v475_v9, 0.0 }
 0x7d1   : > { %v479_v14 = vsel %vm322_vm6, %v477_v12, 0.0 }
 0x7d2   : > { %v480_v15 = vadd.f32 %v479_v14, %v478_v13  ;;  %v539_v14 = vmul.f32 0.17677669, %v538_v10 }
 0x7d4   : > { %v502_v17 = vadd.f32 %v501_v0, %v480_v15  ;;  %v542_v15 = vperm.slane %v539_v14, 0 }
 0x7d6   : > { %v505_v18 = vsel %vm238_vm0, %v502_v17, -inf  ;;  %v518_v22 = vpop.permute.xlu1 %517 }
 0x7d7   : > { %506 = vmax.xlane.f32.xlu0 %v505_v18  ;;  %v523_v28 = vsel %vm366_vm7, %v518_v22, 0 }
 0x7d8   : > { %532 = vmatpush.bf16.msrb.mxu0 %v523_v28 }
 0x7de   : > { %v560_v25 = vpop.permute.xlu1 %559 }
 0x7df   : > { %v565_v26 = vsel %vm238_vm0, %v560_v25, 0 }
 0x7e0   : > { %574 = vmatpush.bf16.xpose.msrb.mxu1 %v565_v26 }
 0x7e6   : > { %v712_v38 = vpop.permute.xlu1 %711 }
 0x7e7   : > { %v717_v39 = vsel %vm238_vm0, %v712_v38, 0 }
 0x7e8   : > { %726 = vmatpush.bf16.xpose.msra.mxu0 %v717_v39 }
 0x7eb   : > { %557 = vrot.lane.b32.xlu0 %v555_v21, %s1116_s22 }
 0x7ee   : > { %v710_v45 = vpop.permute.xlu1 %709 }
 0x84a   : > { %v507_v16 = vpop.xlane.xlu0 %506 }
 0x84b   : > { %v508_v31 = vsub.f32 %v502_v17, %v507_v16  ;;  %v690_v17 = vld [vmem:[#allocation2 + $0x3] sm:$0x1] }
 0x84c   : > { %v691_v18 = vmul.f32 0.17677669, %v690_v17 }
 0x84d   : > { %v509_v32 = vmul.f32 1.442695, %v508_v31 }
 0x84e   : > { %v694_v19 = vperm.slane %v691_v18, 0 }
 0x84f   : > { %1014 = vpow2.f32 %v509_v32 }
 0x855   : > { %v1015_v34 = vpop.eup %1014 }
 0x856   : > { %v511_v36 = vsel %vm238_vm0, %v1015_v34, 0.0 }
 0x857   : > { %512 = vadd.xlane.f32.xlu2 %v511_v36 }
 0x85d   : > { %v558_v37 = vpop.permute.xlu0 %557 }
 0x85e   : > { %954 = vmatmul.msk.bf16.vlgmr.msrb.gmra.mxu1 %vm238_vm0, %v558_v37 }
 0x8ca   : > { %v513_v40 = vpop.xlane.xlu2 %512 }
 0x8cb   : > { %1016 = vrcp.f32 %v513_v40 }
 0x8d1   : > { %v1017_v41 = vpop.eup %1016 }
 0x8d2   : > { %v515_v42 = vmul.f32 %v1017_v41, %v1015_v34 }
 0x8d4   : > { %v516_v43 = vpack.c.bf16 %v515_v42, %v515_v42 }
 0x8d6   : > { %953 = vmatmul.msk.bf16.vlgmr.msrb.gmra.mxu0 %vm238_vm0, %v516_v43 }
 0x8db   : > { %v576_v44 = vpop.f32.mrf.mxu1 }
 0x8dc   : > { %580 = vrot.lane.b32.xlu1 %v576_v44, %s1104_s8 }
 0x8e3   : > { %v578_v46 = vpop.f32.mrf.mxu1 }
 0x8e6   : > { %957 = vmatmul.msk.bf16.vlgmr.msra.gmra.mxu0 %vm238_vm0, %v710_v45 }
 0x94e   : > { %v581_v48 = vpop.permute.xlu1 %580 }
 0x94f   : > { %v582_v50 = vsel %vm262_vm1, %v581_v48, %v576_v44 }
 0x950   : > { %583 = vrot.lane.b32.xlu1 %v582_v50, %s1104_s8 }
 0x953   : > { %v1341_v51 = vpop.f32.mrf.mxu0 }
 0x95b   : > { %v536_v52 = vpop.f32.mrf.mxu0 }
 0x963   : > { %v728_v53 = vpop.f32.mrf.mxu0 }
 0x964   : > { %732 = vrot.lane.b32.xlu2 %v728_v53, %s1104_s8 }
 0x96b   : > { %v730_v54 = vpop.f32.mrf.mxu0 }
 0x9be   : > { %v733_v55 = vpop.permute.xlu2 %732 }
 0x9bf   : > { %v734_v56 = vsel %vm262_vm1, %v733_v55, %v728_v53 }
 0x9c0   : > { %735 = vrot.lane.b32.xlu0 %v734_v56, %s1104_s8 }
 0x9c2   : > { %v584_v57 = vpop.permute.xlu1 %583 }
 0x9c3   : > { %v585_v58 = vsel %vm262_vm1, %v584_v57, %v576_v44 }
 0x9c4   : > { %587 = vrot.lane.b32.xlu1 %v585_v58, %s1106_s10 }
 0xa32   : > { %v736_v60 = vpop.permute.xlu0 %735 }
 0xa33   : > { %v737_v61 = vsel %vm262_vm1, %v736_v60, %v728_v53 }
 0xa34   : > { %739 = vrot.lane.b32.xlu0 %v737_v61, %s1106_s10 }
 0xa36   : > { %v588_v62 = vpop.permute.xlu1 %587 }
 0xa37   : > { %590 = vrot.lane.b32.xlu1 %v588_v62, %s1104_s8 }
 0xaa6   : > { %v740_v63 = vpop.permute.xlu0 %739 }
 0xaa7   : > { %742 = vrot.lane.b32.xlu0 %v740_v63, %s1104_s8 }
 0xaa9   : > { %v591_v0 = vpop.permute.xlu1 %590 }
 0xaaa   : > { %v592_v1 = vsel %vm262_vm1, %v591_v0, %v588_v62 }
 0xaab   : > { %593 = vrot.lane.b32.xlu2 %v592_v1, %s1104_s8 }
 0xb05   : > { %v594_v2 = vpop.permute.xlu2 %593 }
 0xb06   : > { %v595_v3 = vsel %vm262_vm1, %v594_v2, %v588_v62 }
 0xb07   : > { %v596_v4 = vsel %vm1216_vm2, %v595_v3, %v585_v58 }
 0xb08   : > { %598 = vrot.lane.b32.xlu0 %v596_v4, %s1106_s10 }
 0xb19   : > { %v743_v5 = vpop.permute.xlu0 %742 }
 0xb1a   : > { %v744_v7 = vsel %vm262_vm1, %v743_v5, %v740_v63 }
 0xb1b   : > { %745 = vrot.lane.b32.xlu1 %v744_v7, %s1104_s8 }
 0xb7a   : > { %v599_v8 = vpop.permute.xlu0 %598 }
 0xb7b   : > { %601 = vrot.lane.b32.xlu1 %v599_v8, %s1104_s8 }
 0xb83   : > { %696 = vrot.lane.b32.xlu1 %v694_v19, %s1117_s23 }
 0xb8d   : > { %v746_v9 = vpop.permute.xlu1 %745 }
 0xb8e   : > { %v747_v12 = vsel %vm262_vm1, %v746_v9, %v740_v63 }
 0xb8f   : > { %v748_v13 = vsel %vm1216_vm2, %v747_v12, %v737_v61 }
 0xb90   : > { %750 = vrot.lane.b32.xlu2 %v748_v13, %s1106_s10 }
 0xb98   : > { %544 = vrot.lane.b32.xlu2 %v542_v15, %s1114_s20 }
 0xba0   : > { %607 = vrot.lane.b32.xlu2 %v596_v4, %s1107_s11 }
 0xba8   : > { %636 = vrot.lane.b32.xlu2 %v1233_v47, %s1119_s25 }
 0xbea   : > { %v751_v20 = vpop.permute.xlu2 %750 }
 0xbeb   : > { %753 = vrot.lane.b32.xlu0 %v751_v20, %s1104_s8 }
 0xbed   : > { %v602_v35 = vpop.permute.xlu1 %601 }
 0xbee   : > { %v603_v21 = vsel %vm262_vm1, %v602_v35, %v599_v8 }
 0xbf2   : > { %v545_v22 = vpop.permute.xlu2 %544 }
 0xbf3   : > { %604 = vrot.lane.b32.xlu0 %v603_v21, %s1104_s8  ;;  %v547_v25 = vadd.f32 %v545_v22, %v1190_v6 }
 0xbf5   : > { %v548_v26 = vpack.c.bf16 %v547_v25, %v547_v25  ;;  %v697_v29 = vpop.permute.xlu1 %696 }
 0xbf6   : > { %v699_v34 = vadd.f32 %v697_v29, %v1190_v6 }
 0xbf8   : > { %v700_v36 = vpack.c.bf16 %v699_v34, %v699_v34 }
 0xbfa   : > { %v608_v16 = vpop.permute.xlu2 %607 }
 0xbfb   : > { %759 = vrot.lane.b32.xlu0 %v748_v13, %s1107_s11 }
 0xc02   : > { %v637_v37 = vpop.permute.xlu2 %636 }
 0xc03   : > { %634 = vrot.lane.b32.xlu0 %v548_v26, %s1116_s22  ;;  %v642_v6 = vsel %vm238_vm0, %v637_v37, 0 }
 0xc04   : > { %651 = vmatpush.bf16.xpose.msrb.mxu3 %v642_v6 }
 0xc5d   : > { %v754_v27 = vpop.permute.xlu0 %753 }
 0xc5e   : > { %v755_v28 = vsel %vm262_vm1, %v754_v27, %v751_v20 }
 0xc5f   : > { %756 = vrot.lane.b32.xlu1 %v755_v28, %s1104_s8 }
 0xc65   : > { %v605_v30 = vpop.permute.xlu0 %604 }
 0xc66   : > { %v606_v31 = vsel %vm262_vm1, %v605_v30, %v599_v8 }
 0xc67   : > { %v610_v32 = vsel %vm1237_vm3, %v606_v31, %v608_v16  ;;  %788 = vrot.lane.b32.xlu1 %v1233_v47, %s1120_s26 }
 0xc68   : > { %612 = vrot.lane.b32.xlu2 %v610_v32, %s1109_s13 }
 0xc6d   : > { %v760_v40 = vpop.permute.xlu0 %759 }
 0xc6f   : > { %786 = vrot.lane.b32.xlu1 %v700_v36, %s1118_s24 }
 0xc75   : > { %v635_v45 = vpop.permute.xlu0 %634 }
 0xc76   : > { %955 = vmatmul.msk.bf16.vlgmr.msrb.gmra.mxu3 %vm238_vm0, %v635_v45 }
 0xcc2   : > { %v613_v38 = vpop.permute.xlu2 %612 }
 0xcc3   : > { %615 = vrot.lane.b32.xlu2 %v613_v38, %s1104_s8 }
 0xccb   : > { %621 = vrot.lane.b32.xlu2 %v610_v32, %s1110_s14 }
 0xcd1   : > { %v757_v39 = vpop.permute.xlu1 %756 }
 0xcd2   : > { %v758_v41 = vsel %vm262_vm1, %v757_v39, %v751_v20 }
 0xcd3   : > { %v762_v42 = vsel %vm1237_vm3, %v758_v41, %v760_v40 }
 0xcd4   : > { %764 = vrot.lane.b32.xlu0 %v762_v42, %s1109_s13 }
 0xcd9   : > { %v789_v43 = vpop.permute.xlu1 %788 }
 0xcda   : > { %v794_v44 = vsel %vm238_vm0, %v789_v43, 0 }
 0xcdb   : > { %803 = vmatpush.bf16.xpose.msra.mxu1 %v794_v44 }
 0xce1   : > { %v787_v46 = vpop.permute.xlu1 %786 }
 0xce2   : > { %958 = vmatmul.msk.bf16.vlgmr.msra.gmra.mxu1 %vm238_vm0, %v787_v46 }
 0xcf9   : > { %v653_v58 = vpop.f32.mrf.mxu3 }
 0xd01   : > { %v655_v60 = vpop.f32.mrf.mxu3 }
 0xd1d   : > { %v616_v48 = vpop.permute.xlu2 %615 }
 0xd1e   : > { %v617_v50 = vsel %vm262_vm1, %v616_v48, %v613_v38 }
 0xd1f   : > { %618 = vrot.lane.b32.xlu0 %v617_v50, %s1104_s8 }
 0xd25   : > { %v622_v54 = vpop.permute.xlu2 %621 }
 0xd27   : > { %773 = vrot.lane.b32.xlu0 %v762_v42, %s1110_s14 }
 0xd46   : > { %v765_v49 = vpop.permute.xlu0 %764 }
 0xd47   : > { %767 = vrot.lane.b32.xlu1 %v765_v49, %s1104_s8 }
 0xd5f   : > { %v805_v52 = vpop.f32.mrf.mxu1 }
 0xd67   : > { %v807_v57 = vpop.f32.mrf.mxu1 }
 0xd91   : > { %v619_v53 = vpop.permute.xlu0 %618 }
 0xd92   : > { %v620_v55 = vsel %vm262_vm1, %v619_v53, %v613_v38 }
 0xd93   : > { %v624_v56 = vsel %vm1262_vm4, %v620_v55, %v622_v54 }
 0xd94   : > { %626 = vrot.lane.b32.xlu2 %v624_v56, %s1112_s17 }
 0xd99   : > { %v774_v8 = vpop.permute.xlu0 %773 }
 0xdb9   : > { %v768_v61 = vpop.permute.xlu1 %767 }
 0xdba   : > { %v769_v62 = vsel %vm262_vm1, %v768_v61, %v765_v49 }
 0xdbb   : > { %770 = vrot.lane.b32.xlu1 %v769_v62, %s1104_s8 }
 0xdee   : > { %v627_v63 = vpop.permute.xlu2 %626 }
 0xdef   : > { %v629_v0 = vrot.slane %v627_v63, 1  ;;  %v630_v1 = vsel %vm319_vm5, %v627_v63, 0.0 }
 0xdf1   : > { %v631_v2 = vsel %vm322_vm6, %v629_v0, 0.0 }
 0xdf2   : > { %v632_v3 = vadd.f32 %v631_v2, %v630_v1 }
 0xdf4   : > { %v654_v4 = vadd.f32 %v653_v58, %v632_v3 }
 0xdf6   : > { %v657_v5 = vsel %vm238_vm0, %v654_v4, -inf }
 0xdf7   : > { %658 = vmax.xlane.f32.xlu0 %v657_v5 }
 0xe2d   : > { %v771_v7 = vpop.permute.xlu1 %770 }
 0xe2e   : > { %v772_v9 = vsel %vm262_vm1, %v771_v7, %v765_v49 }
 0xe2f   : > { %v776_v10 = vsel %vm1262_vm4, %v772_v9, %v774_v8 }
 0xe30   : > { %778 = vrot.lane.b32.xlu1 %v776_v10, %s1112_s17 }
 0xe6a   : > { %v659_v12 = vpop.xlane.xlu0 %658 }
 0xe6b   : > { %v660_v13 = vsub.f32 %v654_v4, %v659_v12 }
 0xe6d   : > { %v661_v14 = vmul.f32 1.442695, %v660_v13 }
 0xe6f   : > { %1018 = vpow2.f32 %v661_v14 }
 0xe75   : > { %v1019_v15 = vpop.eup %1018 }
 0xe76   : > { %v663_v17 = vsel %vm238_vm0, %v1019_v15, 0.0 }
 0xe77   : > { %664 = vadd.xlane.f32.xlu1 %v663_v17 }
 0xe90   : > { %821 = vrot.lane.b32.xlu1 %v1233_v47, %s1121_s27 }
 0xea2   : > { %v779_v18 = vpop.permute.xlu1 %778 }
 0xea3   : > { %v781_v19 = vrot.slane %v779_v18, 1  ;;  %v782_v11 = vsel %vm319_vm5, %v779_v18, 0.0 }
 0xea5   : > { %v783_v20 = vsel %vm322_vm6, %v781_v19, 0.0 }
 0xea6   : > { %v784_v35 = vadd.f32 %v783_v20, %v782_v11 }
 0xea8   : > { %v806_v21 = vadd.f32 %v805_v52, %v784_v35 }
 0xeaa   : > { %v809_v22 = vsel %vm238_vm0, %v806_v21, -inf }
 0xeab   : > { %810 = vmax.xlane.f32.xlu2 %v809_v22 }
 0xec3   : > { %669 = vrot.lane.b32.xlu2 %v1233_v47, %s1122_s29 }
 0xeea   : > { %v665_v25 = vpop.xlane.xlu1 %664 }
 0xeeb   : > { %1020 = vrcp.f32 %v665_v25 }
 0xef1   : > { %v1021_v30 = vpop.eup %1020 }
 0xef2   : > { %v667_v23 = vmul.f32 %v1021_v30, %v1019_v15 }
 0xef4   : > { %v668_v32 = vpack.c.bf16 %v667_v23, %v667_v23 }
 0xf02   : > { %v822_v28 = vpop.permute.xlu1 %821 }
 0xf03   : > { %v827_v33 = vsel %vm366_vm7, %v822_v28, 0 }
 0xf04   : > { %836 = vmatpush.bf16.msra.mxu3 %v827_v33 }
 0xf1e   : > { %v811_v26 = vpop.xlane.xlu2 %810 }
 0xf1f   : > { %v812_v27 = vsub.f32 %v806_v21, %v811_v26 }
 0xf21   : > { %v813_v29 = vmul.f32 1.442695, %v812_v27 }
 0xf23   : > { %1022 = vpow2.f32 %v813_v29 }
 0xf26   : > { %v670_v24 = vpop.permute.xlu2 %669 }
 0xf27   : > { %v675_v16 = vsel %vm366_vm7, %v670_v24, 0 }
 0xf28   : > { %684 = vmatpush.bf16.msra.mxu2 %v675_v16 }
 0xf29   : > { %v1023_v31 = vpop.eup %1022 }
 0xf2a   : > { %v815_v47 = vsel %vm238_vm0, %v1023_v31, 0.0 }
 0xf2b   : > { %816 = vadd.xlane.f32.xlu0 %v815_v47  ;;  %956 = vmatmul.msk.bf16.vlgmr.msra.gmra.mxu2 %vm238_vm0, %v668_v32 }
 0xf3f   : > { %843 = vrot.lane.b32.xlu0 %v1341_v51, %s1104_s8 }
 0xf9e   : > { %v817_v34 = vpop.xlane.xlu0 %816 }
 0xf9f   : > { %1024 = vrcp.f32 %v817_v34 }
 0xfa5   : > { %v1025_v36 = vpop.eup %1024 }
 0xfa6   : > { %v819_v37 = vmul.f32 %v1025_v36, %v1023_v31 }
 0xfa8   : > { %v820_v38 = vpack.c.bf16 %v819_v37, %v819_v37 }
 0xfaa   : > { %959 = vmatmul.msk.bf16.vlgmr.msra.gmra.mxu3 %vm238_vm0, %v820_v38 }
 0xfae   : > { %v686_v39 = vpop.f32.mrf.mxu2 }
 0xfaf   : > { %847 = vrot.lane.b32.xlu0 %v686_v39, %s1114_s20 }
 0xfb1   : > { %v844_v6 = vpop.permute.xlu0 %843 }
 0xfb2   : > { %v854_v51 = vsel %vm238_vm0, %v1307_v59, %v844_v6 }
 0xfb6   : > { %v688_v40 = vpop.f32.mrf.mxu2 }
0x1021   : > { %v848_v43 = vpop.permute.xlu0 %847 }
0x1022   : > { %v856_v44 = vsel %vm855_vm8, %v854_v51, %v848_v43 }
0x102d   : > { %v838_v41 = vpop.f32.mrf.mxu3 }
0x102e   : > { %851 = vrot.lane.b32.xlu2 %v838_v41, %s1117_s23 }
0x1035   : > { %v840_v42 = vpop.f32.mrf.mxu3 }
0x1088   : > { %v852_v45 = vpop.permute.xlu2 %851 }
0x1089   : > { %v858_v46 = vsel %vm857_vm9, %v856_v44, %v852_v45 }
0x108a   : > { %v859_v48 = vpack.c.bf16 %v858_v46, %v858_v46 }
0x108c   : > { %861 = vst.msk [vmem:[%s222_s6] sm:$0xf] %vm860_vm10, %v859_v48 }
0x108d PF: > { %s16_s15 = sadd.s32 1, %s1100_s15  }
0x108e   : > { %p13_p7 = scmp.ge.s32.totalorder %s16_s15, 4  }
0x1090   :  { %15 = sbr.rel (!%p13_p7) target bundleno = 2 (0x2), region = 75 }
0x1095   :  { %881 = vsyncpa [#allocation3], 1 }
0x1096   :  { %883 = vsyncpa [#allocation3 + $0x1], 1 }
0x1097   :  { %884 = vsyncpa [#allocation5], 1 }

// kernel: classifier_forward.24
= control target key start
LH: loop header
LB: loop body
LE: loop exit
PB: predicated region body
PF: predicated region fallthrough
CT: control target
= control target key end

     0   :  { %s587_s15 = smov 0   ;;  %s589_s16 = smov 0   ;;  %s632_s0 = inlined_call_operand.vmem [shape: bf16[16,32], index: 0, kind: input, shape index: {}]   ;;  %s633_s1 = inlined_call_operand.vmem [shape: bf16[32,32], index: 1, kind: input, shape index: {}]   ;;  %s634_s2 = inlined_call_operand.vmem [shape: f32[1,32], index: 2, kind: input, shape index: {}]   ;;  %s635_s3 = inlined_call_operand.vmem [shape: bf16[16,32], index: 3, kind: input, shape index: {}]   ;;  %s636_s4 = inlined_call_operand.vmem [shape: bf16[16,32], index: 4, kind: output, shape index: {}]  }
   0x1   :  { %s591_s17 = smov 0  }
   0x2 LB: > { %s33_s18 = sadd.s32 1, %s555_s16  ;;  %p494_p0 = scmp.ge.s32.totalorder %s559_s17, 1  ;;  %s559_s17 = sphi %s591_s17, %s14_s17   ;;  %s555_s16 = sphi %s589_s16, %s638_s16   ;;  %s551_s15 = sphi %s587_s15, %s637_s15  }
   0x3   : > { %p35_p1 = scmp.ge.s32.totalorder %s33_s18, 2  ;;  %p225_p2 = scmp.lt.s32.totalorder %s559_s17, 3 }
   0x5   : > { %s640_s18 = smov (%p35_p1, %s33_s18), 0  ;;  %p226_p3 = pnand %p494_p0, %p225_p2 }
   0x6   : > { %p273_p4 = scmp.lt.s32.totalorder (!%p226_p3), %s551_s15, 1 }
   0x7   : > { %229 = sbr.rel (%p226_p3) target bundleno = 163 (0xa3), region = 36 }
   0xc   : > { %v510_v0 = vld [vmem:[%s633_s1 + $0x8] sm:$0xff]  ;;  %vm311_vm0 = vcmask 261120   ;;  %v561_v1 = vmov 0.0   ;;  %v509_v2 = vld [vmem:[%s633_s1] sm:$0xff]  ;;  %s642_s15 = smov (!%p273_p4, %s551_s15), 1  ;;  %vm363_vm1 = vcmask 257024  }
   0xd   : > { %312 = vst.msk [vmem:[#allocation2] sm:$0xff] %vm311_vm0, %v561_v1  ;;  %341 = vmatpush.bf16.msra.mxu0 %v510_v0  ;;  %s495_s23 = sshll.u32 %s642_s15, 2  ;;  %v536_v8 = vld [vmem:[%s634_s2] ss:$0 sm:$0xff] }
   0xe   : > { %s279_s26 = scalar_lea.vmem %s632_s0, %s495_s23  ;;  %s298_s29 = scalar_lea.vmem %s635_s3, %s495_s23 }
   0xf   : > { %v313_v3 = vld [vmem:[%s279_s26] sm:$0xf]  ;;  %s305_s8 = scalar_lea.vmem %s636_s4, %s495_s23 }
  0x10   : > { %v359_v7 = vld [vmem:[%s298_s29] sm:$0xf] }
  0x11   : > { %342 = vmatpush.bf16.msra.mxu0 %v509_v2  ;;  %v360_v10 = vunpack.c.l.bf16 %v359_v7 }
  0x14   : > { %506 = vmatmul.msk.bf16.vlgmr.msra.gmra.mxu0 %vm311_vm0, %v313_v3  ;;  %v314_v4 = vld [vmem:[#allocation2] sm:$0xff] }
  0x91   : > { %v344_v5 = vpop.f32.mrf.mxu0 }
  0x92   : > { %v348_v6 = vadd.f32 %v344_v5, %v314_v4 }
  0x94   : > { %349 = vst.msk [vmem:[#allocation2] sm:$0xff] %vm311_vm0, %v348_v6 }
  0x99   : > { %v346_v9 = vpop.f32.mrf.mxu0 }
  0x9b   : > { %v353_v11 = vld [vmem:[#allocation2] sm:$0xff] }
  0x9c   : > { %v358_v12 = vadd.f32 %v536_v8, %v353_v11 }
  0x9e   : > { %v361_v13 = vadd.f32 %v360_v10, %v358_v12 }
  0xa0   : > { %v362_v14 = vpack.c.bf16 %v361_v13, %v361_v13 }
  0xa2   : > { %364 = vst.msk [vmem:[%s305_s8] sm:$0xf] %vm363_vm1, %v362_v14 }
  0xa3 PF: > { %s14_s17 = sadd.s32 1, %s559_s17   ;;  %s637_s15 = smov %s555_s16 }
  0xa4   : > { %p11_p5 = scmp.ge.s32.totalorder %s14_s17, 4   ;;  %s638_s16 = smov %s640_s18 }
  0xa6   :  { %13 = sbr.rel (!%p11_p5) target bundleno = 2 (0x2), region = 83 }

// kernel: classifier_forward.23
= control target key start
LH: loop header
LB: loop body
LE: loop exit
PB: predicated region body
PF: predicated region fallthrough
CT: control target
= control target key end

     0   :  { %s641_s12 = smov 0   ;;  %s643_s13 = smov 0   ;;  %s782_s0 = inlined_call_operand.vmem [shape: bf16[2,8,32], index: 0, kind: input, shape index: {}]   ;;  %s783_s1 = inlined_call_operand.vmem [shape: f32[31,32], index: 1, kind: input, shape index: {}]   ;;  %s784_s2 = inlined_call_operand.vmem [shape: f32[1,32], index: 2, kind: input, shape index: {}]   ;;  %s785_s3 = inlined_call_operand.vmem [shape: bf16[2,8,32], index: 3, kind: output, shape index: {}]  }
   0x1   :  { %s645_s14 = smov 0  }
   0x2 LB: > { %s25_s15 = sadd.s32 1, %s614_s13  ;;  %p529_p0 = scmp.ge.s32.totalorder %s618_s14, 1  ;;  %s618_s14 = sphi %s645_s14, %s13_s14   ;;  %s614_s13 = sphi %s643_s13, %s787_s13   ;;  %s610_s12 = sphi %s641_s12, %s786_s12  }
   0x3   : > { %p27_p1 = scmp.ge.s32.totalorder %s25_s15, 2  ;;  %p172_p2 = scmp.lt.s32.totalorder %s618_s14, 3 }
   0x5   : > { %s789_s15 = smov (%p27_p1, %s25_s15), 0  ;;  %p173_p3 = pnand %p529_p0, %p172_p2 }
   0x6   : > { %p207_p4 = scmp.lt.s32.totalorder (!%p173_p3), %s610_s12, 1 }
   0x7   : > { %176 = sbr.rel (%p173_p3) target bundleno = 119 (0x77), region = 32 }
   0xc   : > { %vm228_vm0 = vcmask 261120   ;;  %v620_v0 = vmov 0.0   ;;  %s791_s12 = smov (!%p207_p4, %s610_s12), 1  ;;  %v560_v1 = vld [vmem:[%s783_s1] ss:$0 sm:$0xff]  ;;  %vm233_vm1 = vcmask 259072  }
   0xd   : > { %229 = vst.msk [vmem:[#allocation2] sm:$0xff] %vm228_vm0, %v620_v0  ;;  %v561_v2 = vld [vmem:[%s783_s1 + $0x1] ss:$0 sm:$0xff]  ;;  %v562_v4 = vld [vmem:[%s783_s1 + $0x2] ss:$0 sm:$0xff]  ;;  %s530_s22 = sshll.u32 %s791_s12, 2 }
   0xe   : > { %230 = vst.msk [vmem:[#allocation2 + $0x8] sm:$0xff] %vm228_vm0, %v620_v0  ;;  %s213_s25 = scalar_lea.vmem %s782_s0, %s530_s22  ;;  %v563_v9 = vld [vmem:[%s783_s1 + $0x3] ss:$0 sm:$0xff]  ;;  %v564_v14 = vld [vmem:[%s783_s1 + $0x4] ss:$0 sm:$0xff]  ;;  %s227_s19 = scalar_lea.vmem %s785_s3, %s530_s22  ;;  %vm419_vm6 = vcmask 257024  }
   0xf   : > { %231 = vst.msk [vmem:[#allocation2 + $0x10] sm:$0xff] %vm228_vm0, %v620_v0  ;;  %v235_v11 = vld [vmem:[%s213_s25] sm:$0xf]  ;;  %v565_v19 = vld [vmem:[%s783_s1 + $0x5] ss:$0 sm:$0xff] }
  0x10   : > { %232 = vst.msk [vmem:[#allocation2 + $0x18] sm:$0xff] %vm228_vm0, %v620_v0  ;;  %v236_v15 = vunpack.c.l.bf16 %v235_v11  ;;  %v566_v23 = vld [vmem:[%s783_s1 + $0x6] ss:$0 sm:$0xff]  ;;  %v567_v27 = vld [vmem:[%s783_s1 + $0x7] ss:$0 sm:$0xff] }
  0x11   : > { %234 = vst.msk [vmem:[#allocation2 + $0x20] sm:$0x3f] %vm233_vm1, %v620_v0  ;;  %v570_v31 = vld [vmem:[%s783_s1 + $0x8] ss:$0 sm:$0xff]  ;;  %v571_v35 = vld [vmem:[%s783_s1 + $0x9] ss:$0 sm:$0xff] }
  0x12   : > { %237 = vst.msk [vmem:[#allocation2 + $0xf] sm:$0xff] %vm228_vm0, %v236_v15  ;;  %v572_v39 = vld [vmem:[%s783_s1 + $0xa] ss:$0 sm:$0xff]  ;;  %v573_v43 = vld [vmem:[%s783_s1 + $0xb] ss:$0 sm:$0xff] }
  0x13   : > { %v574_v47 = vld [vmem:[%s783_s1 + $0xc] ss:$0 sm:$0xff]  ;;  %v575_v51 = vld [vmem:[%s783_s1 + $0xd] ss:$0 sm:$0xff]  ;;  %v576_v55 = vld [vmem:[%s783_s1 + $0xe] ss:$0 sm:$0xff] }
  0x14   : > { %v238_v3 = vld [vmem:[#allocation2] sm:$0xff]  ;;  %v577_v59 = vld [vmem:[%s783_s1 + $0xf] ss:$0 sm:$0xff]  ;;  %v578_v63 = vld [vmem:[%s783_s1 + $0x10] ss:$0 sm:$0xff] }
  0x15   : > { %v241_v5 = vmul.f32 %v560_v1, %v238_v3  ;;  %v243_v6 = vld [vmem:[#allocation2 + $0x1] sm:$0xff]  ;;  %v568_v1 = vld [vmem:[%s783_s1 + $0x11] ss:$0 sm:$0xff]  ;;  %v579_v11 = vld [vmem:[%s783_s1 + $0x13] ss:$0 sm:$0xff] }
  0x16   : > { %v248_v7 = vld [vmem:[#allocation2 + $0x2] sm:$0xff]  ;;  %v246_v8 = vmul.f32 %v561_v2, %v243_v6  ;;  %v580_v15 = vld [vmem:[%s783_s1 + $0x14] ss:$0 sm:$0xff] }
  0x17   : > { %v253_v10 = vld [vmem:[#allocation2 + $0x3] sm:$0xff]  ;;  %v251_v13 = vmul.f32 %v562_v4, %v248_v7 }
  0x18   : > { %v247_v12 = vadd.f32 %v246_v8, %v241_v5  ;;  %v258_v16 = vld [vmem:[#allocation2 + $0x4] sm:$0xff]  ;;  %v256_v18 = vmul.f32 %v563_v9, %v253_v10  ;;  %v569_v5 = vld [vmem:[%s783_s1 + $0x12] ss:$0 sm:$0xff] }
  0x19   : > { %v263_v20 = vld [vmem:[#allocation2 + $0x5] sm:$0xff]  ;;  %v261_v22 = vmul.f32 %v564_v14, %v258_v16  ;;  %v303_v52 = vld [vmem:[#allocation2 + $0xd] sm:$0xff] }
  0x1a   : > { %v252_v17 = vadd.f32 %v251_v13, %v247_v12  ;;  %v268_v24 = vld [vmem:[#allocation2 + $0x6] sm:$0xff]  ;;  %v266_v26 = vmul.f32 %v565_v19, %v263_v20  ;;  %v308_v56 = vld [vmem:[#allocation2 + $0xe] sm:$0xff]  ;;  %v306_v58 = vmul.f32 %v575_v51, %v303_v52  ;;  %v589_v51 = vld [vmem:[%s783_s1 + $0x1d] ss:$0 sm:$0xff] }
  0x1b   : > { %v273_v28 = vld [vmem:[#allocation2 + $0x7] sm:$0xff]  ;;  %v271_v30 = vmul.f32 %v566_v23, %v268_v24  ;;  %v313_v60 = vld [vmem:[#allocation2 + $0xf] sm:$0xff]  ;;  %v311_v62 = vmul.f32 %v576_v55, %v308_v56  ;;  %v383_v52 = vld [vmem:[#allocation2 + $0x1d] sm:$0xff] }
  0x1c   : > { %v257_v21 = vadd.f32 %v256_v18, %v252_v17  ;;  %v278_v32 = vld [vmem:[#allocation2 + $0x8] sm:$0xff]  ;;  %v276_v34 = vmul.f32 %v567_v27, %v273_v28  ;;  %v318_v0 = vld [vmem:[#allocation2 + $0x10] sm:$0xff]  ;;  %v316_v3 = vmul.f32 %v577_v59, %v313_v60  ;;  %v590_v55 = vld [vmem:[%s783_s1 + $0x1e] ss:$0 sm:$0xff] }
  0x1d   : > { %v283_v36 = vld [vmem:[#allocation2 + $0x9] sm:$0xff]  ;;  %v281_v38 = vmul.f32 %v570_v31, %v278_v32  ;;  %v323_v4 = vld [vmem:[#allocation2 + $0x11] sm:$0xff]  ;;  %v321_v7 = vmul.f32 %v578_v63, %v318_v0  ;;  %v388_v56 = vld [vmem:[#allocation2 + $0x1e] sm:$0xff] }
  0x1e   : > { %v262_v25 = vadd.f32 %v261_v22, %v257_v21  ;;  %v288_v40 = vld [vmem:[#allocation2 + $0xa] sm:$0xff]  ;;  %v286_v42 = vmul.f32 %v571_v35, %v283_v36  ;;  %v328_v8 = vld [vmem:[#allocation2 + $0x12] sm:$0xff]  ;;  %v326_v10 = vmul.f32 %v568_v1, %v323_v4  ;;  %v391_v60 = vmul.f32 %v590_v55, %v388_v56 }
  0x1f   : > { %v293_v44 = vld [vmem:[#allocation2 + $0xb] sm:$0xff]  ;;  %v291_v46 = vmul.f32 %v572_v39, %v288_v40  ;;  %v333_v12 = vld [vmem:[#allocation2 + $0x13] sm:$0xff]  ;;  %v331_v13 = vmul.f32 %v569_v5, %v328_v8 }
  0x20   : > { %v267_v29 = vadd.f32 %v266_v26, %v262_v25  ;;  %v298_v48 = vld [vmem:[#allocation2 + $0xc] sm:$0xff]  ;;  %v296_v50 = vmul.f32 %v573_v43, %v293_v44  ;;  %v338_v16 = vld [vmem:[#allocation2 + $0x14] sm:$0xff]  ;;  %v336_v18 = vmul.f32 %v579_v11, %v333_v12 }
  0x21   : > { %v301_v54 = vmul.f32 %v574_v47, %v298_v48  ;;  %v581_v19 = vld [vmem:[%s783_s1 + $0x15] ss:$0 sm:$0xff]  ;;  %v341_v22 = vmul.f32 %v580_v15, %v338_v16  ;;  %v582_v23 = vld [vmem:[%s783_s1 + $0x16] ss:$0 sm:$0xff]  ;;  %v583_v27 = vld [vmem:[%s783_s1 + $0x17] ss:$0 sm:$0xff] }
  0x22   : > { %v272_v33 = vadd.f32 %v271_v30, %v267_v29  ;;  %v343_v20 = vld [vmem:[#allocation2 + $0x15] sm:$0xff] }
  0x23   : > { %v348_v24 = vld [vmem:[#allocation2 + $0x16] sm:$0xff]  ;;  %v346_v26 = vmul.f32 %v581_v19, %v343_v20 }
  0x24   : > { %v277_v37 = vadd.f32 %v276_v34, %v272_v33  ;;  %v353_v28 = vld [vmem:[#allocation2 + $0x17] sm:$0xff]  ;;  %v351_v30 = vmul.f32 %v582_v23, %v348_v24 }
  0x25   : > { %v584_v31 = vld [vmem:[%s783_s1 + $0x18] ss:$0 sm:$0xff]  ;;  %v356_v34 = vmul.f32 %v583_v27, %v353_v28  ;;  %v585_v35 = vld [vmem:[%s783_s1 + $0x19] ss:$0 sm:$0xff]  ;;  %v586_v39 = vld [vmem:[%s783_s1 + $0x1a] ss:$0 sm:$0xff] }
  0x26   : > { %v282_v41 = vadd.f32 %v281_v38, %v277_v37  ;;  %v358_v32 = vld [vmem:[#allocation2 + $0x18] sm:$0xff] }
  0x27   : > { %v363_v36 = vld [vmem:[#allocation2 + $0x19] sm:$0xff]  ;;  %v361_v38 = vmul.f32 %v584_v31, %v358_v32 }
  0x28   : > { %v287_v45 = vadd.f32 %v286_v42, %v282_v41  ;;  %v368_v40 = vld [vmem:[#allocation2 + $0x1a] sm:$0xff]  ;;  %v366_v42 = vmul.f32 %v585_v35, %v363_v36 }
  0x29   : > { %v587_v43 = vld [vmem:[%s783_s1 + $0x1b] ss:$0 sm:$0xff]  ;;  %v588_v47 = vld [vmem:[%s783_s1 + $0x1c] ss:$0 sm:$0xff] }
  0x2a   : > { %v292_v49 = vadd.f32 %v291_v46, %v287_v45  ;;  %v373_v44 = vld [vmem:[#allocation2 + $0x1b] sm:$0xff]  ;;  %v371_v46 = vmul.f32 %v586_v39, %v368_v40 }
  0x2b   : > { %v378_v48 = vld [vmem:[#allocation2 + $0x1c] sm:$0xff] }
  0x2c   : > { %v297_v53 = vadd.f32 %v296_v50, %v292_v49  ;;  %v376_v50 = vmul.f32 %v587_v43, %v373_v44 }
  0x2e   : > { %v302_v57 = vadd.f32 %v301_v54, %v297_v53  ;;  %v381_v54 = vmul.f32 %v588_v47, %v378_v48 }
  0x30   : > { %v307_v61 = vadd.f32 %v306_v58, %v302_v57  ;;  %v386_v58 = vmul.f32 %v589_v51, %v383_v52 }
  0x32   : > { %v312_v2 = vadd.f32 %v311_v62, %v307_v61  ;;  %v591_v61 = vld [vmem:[%s784_s2] ss:$0 sm:$0xff] }
  0x34   : > { %v317_v6 = vadd.f32 %v316_v3, %v312_v2 }
  0x36   : > { %v322_v9 = vadd.f32 %v321_v7, %v317_v6 }
  0x38   : > { %v327_v14 = vadd.f32 %v326_v10, %v322_v9 }
  0x3a   : > { %v332_v17 = vadd.f32 %v331_v13, %v327_v14 }
  0x3c   : > { %v337_v21 = vadd.f32 %v336_v18, %v332_v17 }
  0x3e   : > { %v342_v25 = vadd.f32 %v341_v22, %v337_v21 }
  0x40   : > { %v347_v29 = vadd.f32 %v346_v26, %v342_v25 }
  0x42   : > { %v352_v33 = vadd.f32 %v351_v30, %v347_v29 }
  0x44   : > { %v357_v37 = vadd.f32 %v356_v34, %v352_v33 }
  0x46   : > { %v362_v41 = vadd.f32 %v361_v38, %v357_v37 }
  0x48   : > { %v367_v45 = vadd.f32 %v366_v42, %v362_v41 }
  0x4a   : > { %v372_v49 = vadd.f32 %v371_v46, %v367_v45 }
  0x4c   : > { %v377_v53 = vadd.f32 %v376_v50, %v372_v49 }
  0x4e   : > { %v382_v57 = vadd.f32 %v381_v54, %v377_v53 }
  0x50   : > { %v387_v59 = vadd.f32 %v386_v58, %v382_v57 }
  0x52   : > { %v392_v62 = vadd.f32 %v391_v60, %v387_v59 }
  0x54   : > { %v397_v63 = vadd.f32 %v591_v61, %v392_v62 }
  0x56   : > { %v532_v0 = vmul.f32 -1.442695, %v397_v63 }
  0x58   : > { %592 = vpow2.f32 %v532_v0 }
  0x5e   : > { %v593_v1 = vpop.eup %592 }
  0x5f   : > { %v401_v2 = vadd.f32 1.0, %v593_v1 }
  0x61   : > { %594 = vrcp.f32 %v401_v2  ;;  %v413_v6 = vand.u32 2147483648, %v401_v2  ;;  %v411_v8 = vand.u32 2147483647, %v401_v2  ;;  %vm407_vm3 = vweird.f32 %v401_v2 }
  0x63   : > { %v414_v10 = vor.u32 1.1754944e-38, %v413_v6  ;;  %vm412_vm5 = vcmp.eq.f32.partialorder %v411_v8, 8.507059e+37 }
  0x67   : > { %v595_v3 = vpop.eup %594 }
  0x68   : > { %v403_v4 = vmul.f32 %v595_v3, %v401_v2  ;;  %vm408_vm2 = vweird.f32 %v595_v3 }
  0x69   : > { %vm409_vm4 = vmor %vm407_vm3, %vm408_vm2 }
  0x6a   : > { %v404_v5 = vsub.f32 1.0, %v403_v4 }
  0x6c   : > { %v405_v7 = vmul.f32 %v595_v3, %v404_v5 }
  0x6e   : > { %v406_v9 = vadd.f32 %v595_v3, %v405_v7 }
  0x70   : > { %v410_v11 = vsel %vm409_vm4, %v595_v3, %v406_v9 }
  0x71   : > { %v415_v12 = vsel %vm412_vm5, %v414_v10, %v410_v11 }
  0x72   : > { %v417_v13 = vmul.f32 %v415_v12, %v397_v63 }
  0x74   : > { %v418_v14 = vpack.c.bf16 %v417_v13, %v417_v13 }
  0x76   : > { %420 = vst.msk [vmem:[%s227_s19] sm:$0xf] %vm419_vm6, %v418_v14 }
  0x77 PF: > { %s13_s14 = sadd.s32 1, %s618_s14   ;;  %s786_s12 = smov %s614_s13 }
  0x78   : > { %p10_p5 = scmp.ge.s32.totalorder %s13_s14, 4   ;;  %s787_s13 = smov %s789_s15 }
  0x7a   :  { %12 = sbr.rel (!%p10_p5) target bundleno = 2 (0x2), region = 68 }

// kernel: classifier_forward.27
= control target key start
LH: loop header
LB: loop body
LE: loop exit
PB: predicated region body
PF: predicated region fallthrough
CT: control target
= control target key end

     0   :  { %s326_s12 = smov 0   ;;  %s356_s0 = inlined_call_operand.vmem [shape: bf16[2,8,32], index: 0, kind: input, shape index: {}]   ;;  %s357_s1 = inlined_call_operand.vmem [shape: f32[1,32], index: 1, kind: input, shape index: {}]   ;;  %s358_s2 = inlined_call_operand.vmem [shape: f32[1,32], index: 2, kind: input, shape index: {}]   ;;  %s359_s3 = inlined_call_operand.vmem [shape: f32[2,1,32], index: 3, kind: output, shape index: {}]  }
   0x1 LB: > { %s270_s13 = sadd.s32 4294967295, %s302_s12   ;;  %p274_p0 = scmp.ge.s32.totalorder %s302_s12, 1  ;;  %s302_s12 = sphi %s326_s12, %s13_s12  }
   0x2   : > { %p136_p1 = scmp.lt.s32.totalorder %s302_s12, 3 }
   0x4   : > { %p137_p2 = pnand %p274_p0, %p136_p1 }
   0x5   : > { %p157_p3 = scmp.lt.s32.totalorder (!%p137_p2), %s270_s13, 1 }
   0x6   : > { %140 = sbr.rel (%p137_p2) target bundleno = 301 (0x12d), region = 32 }
   0xb   : > { %s361_s13 = smov (!%p157_p3, %s270_s13), 1  ;;  %vm166_vm0 = vcmask 261120   ;;  %v304_v3 = vmov 32.0   ;;  %v305_v20 = vmov 8.0   ;;  %v288_v26 = vld [vmem:[%s357_s1] ss:$0 sm:$0xff] }
   0xc   : > { %s275_s14 = sshll.u32 %s361_s13, 2  ;;  %290 = vrcp.f32 %v304_v3  ;;  %v289_v28 = vld [vmem:[%s358_s2] ss:$0 sm:$0xff]  ;;  %s163_s24 = scalar_lea.vmem %s359_s3, %s361_s13  ;;  %vm221_vm6 = vcmask 253952  }
   0xd   : > { %s160_s17 = scalar_lea.vmem %s356_s0, %s275_s14 }
   0xe   : > { %v164_v0 = vld [vmem:[%s160_s17] sm:$0xf] }
   0xf   : > { %v165_v1 = vunpack.c.l.bf16 %v164_v0 }
  0x11   : > { %v167_v2 = vsel %vm166_vm0, %v165_v1, 0.0 }
  0x12   : > { %168 = vadd.xlane.f32.xlu0 %v167_v2  ;;  %v291_v4 = vpop.eup %290 }
  0x13   : > { %v171_v5 = vmul.f32 32.0, %v291_v4  ;;  %vm175_vm1 = vweird.f32 %v291_v4 }
  0x15   : > { %v172_v6 = vsub.f32 1.0, %v171_v5 }
  0x17   : > { %v173_v7 = vmul.f32 %v291_v4, %v172_v6 }
  0x19   : > { %v174_v8 = vadd.f32 %v291_v4, %v173_v7 }
  0x1b   : > { %v176_v9 = vsel %vm175_vm1, %v291_v4, %v174_v8 }
  0x85   : > { %v169_v10 = vpop.xlane.xlu0 %168 }
  0x86   : > { %v177_v11 = vmul.f32 %v176_v9, %v169_v10 }
  0x88   : > { %v178_v12 = vsub.f32 %v165_v1, %v177_v11 }
  0x8a   : > { %v179_v13 = vmul.f32 %v178_v12, %v178_v12 }
  0x8c   : > { %v180_v14 = vsel %vm166_vm0, %v179_v13, 0.0 }
  0x8d   : > { %181 = vadd.xlane.f32.xlu0 %v180_v14 }
 0x100   : > { %v182_v15 = vpop.xlane.xlu0 %181 }
 0x101   : > { %v183_v16 = vmul.f32 %v182_v15, %v176_v9 }
 0x103   : > { %v184_v17 = vadd.f32 1e-05, %v183_v16 }
 0x105   : > { %292 = vrsqrt.f32 %v184_v17  ;;  %vm191_vm3 = vweird.f32 %v184_v17 }
 0x106   : > { %294 = vrcp.f32 %v305_v20 }
 0x10b   : > { %v293_v18 = vpop.eup %292 }
 0x10c   : > { %v186_v19 = vmul.f32 %v293_v18, %v184_v17  ;;  %vm192_vm2 = vweird.f32 %v293_v18  ;;  %v295_v24 = vpop.eup %294 }
 0x10d   : > { %vm193_vm4 = vmor %vm191_vm3, %vm192_vm2  ;;  %v214_v29 = vmul.f32 8.0, %v295_v24  ;;  %vm218_vm5 = vweird.f32 %v295_v24 }
 0x10e   : > { %v187_v21 = vmul.f32 %v293_v18, %v186_v19 }
 0x10f   : > { %v215_v32 = vsub.f32 1.0, %v214_v29 }
 0x110   : > { %v188_v22 = vmul.f32 0.5, %v187_v21 }
 0x111   : > { %v216_v36 = vmul.f32 %v295_v24, %v215_v32 }
 0x112   : > { %v189_v23 = vsub.f32 1.5, %v188_v22 }
 0x113   : > { %v217_v39 = vadd.f32 %v295_v24, %v216_v36 }
 0x114   : > { %v190_v25 = vmul.f32 %v293_v18, %v189_v23 }
 0x115   : > { %v219_v42 = vsel %vm218_vm5, %v295_v24, %v217_v39 }
 0x116   : > { %v194_v27 = vsel %vm193_vm4, %v293_v18, %v190_v25 }
 0x117   : > { %v195_v30 = vmul.f32 %v194_v27, %v178_v12 }
 0x119   : > { %v200_v31 = vmul.f32 %v288_v26, %v195_v30 }
 0x11b   : > { %v205_v33 = vadd.f32 %v289_v28, %v200_v31 }
 0x11d   : > { %v206_v34 = vsel %vm166_vm0, %v205_v33, 0.0 }
 0x11e   : > { %v207_v35 = vrot.slane %v206_v34, 4 }
 0x120   : > { %v208_v37 = vadd.f32 %v207_v35, %v206_v34 }
 0x122   : > { %v209_v38 = vrot.slane %v208_v37, 2 }
 0x124   : > { %v210_v40 = vadd.f32 %v209_v38, %v208_v37 }
 0x126   : > { %v211_v41 = vrot.slane %v210_v40, 1 }
 0x128   : > { %v212_v43 = vadd.f32 %v211_v41, %v210_v40 }
 0x12a   : > { %v220_v44 = vmul.f32 %v219_v42, %v212_v43 }
 0x12c   : > { %222 = vst.msk [vmem:[%s163_s24] sm:$0x1] %vm221_vm6, %v220_v44 }
 0x12d PF: > { %s13_s12 = sadd.s32 1, %s302_s12  }
 0x12e   : > { %p10_p4 = scmp.ge.s32.totalorder %s13_s12, 4  }
 0x130   :  { %12 = sbr.rel (!%p10_p4) target bundleno = 1 (0x1), region = 62 }

// kernel: classifier_forward.26
= control target key start
LH: loop header
LB: loop body
LE: loop exit
PB: predicated region body
PF: predicated region fallthrough
CT: control target
= control target key end

     0   :  { %s661_s15 = smov 0   ;;  %s663_s16 = smov 0   ;;  %s726_s0 = inlined_call_operand.vmem [shape: bf16[16,128], index: 0, kind: input, shape index: {}]   ;;  %s727_s1 = inlined_call_operand.vmem [shape: bf16[128,32], index: 1, kind: input, shape index: {}]   ;;  %s728_s2 = inlined_call_operand.vmem [shape: f32[1,32], index: 2, kind: input, shape index: {}]   ;;  %s729_s3 = inlined_call_operand.vmem [shape: bf16[16,32], index: 3, kind: input, shape index: {}]   ;;  %s730_s4 = inlined_call_operand.vmem [shape: bf16[16,32], index: 4, kind: output, shape index: {}]  }
   0x1   :  { %s665_s17 = smov 0  }
   0x2 LB: > { %s33_s18 = sadd.s32 1, %s629_s16  ;;  %p539_p0 = scmp.ge.s32.totalorder %s633_s17, 1  ;;  %s633_s17 = sphi %s665_s17, %s14_s17   ;;  %s629_s16 = sphi %s663_s16, %s732_s16   ;;  %s625_s15 = sphi %s661_s15, %s731_s15  }
   0x3   : > { %p35_p1 = scmp.ge.s32.totalorder %s33_s18, 2  ;;  %p225_p2 = scmp.lt.s32.totalorder %s633_s17, 3 }
   0x5   : > { %s734_s18 = smov (%p35_p1, %s33_s18), 0  ;;  %p226_p3 = pnand %p539_p0, %p225_p2 }
   0x6   : > { %p273_p4 = scmp.lt.s32.totalorder (!%p226_p3), %s625_s15, 1 }
   0x7   : > { %229 = sbr.rel (%p226_p3) target bundleno = 189 (0xbd), region = 36 }
   0xc   : > { %v584_v0 = vld [vmem:[%s727_s1 + $0x38] sm:$0xff]  ;;  %vm310_vm0 = vcmask 261120   ;;  %v583_v1 = vld [vmem:[%s727_s1 + $0x30] sm:$0xff]  ;;  %v635_v2 = vmov 0.0   ;;  %v582_v3 = vld [vmem:[%s727_s1 + $0x28] sm:$0xff]  ;;  %s736_s15 = smov (!%p273_p4, %s625_s15), 1 }
   0xd   : > { %378 = vmatpush.bf16.msra.mxu0 %v584_v0  ;;  %311 = vst.msk [vmem:[#allocation2] sm:$0xff] %vm310_vm0, %v635_v2  ;;  %v581_v4 = vld [vmem:[%s727_s1 + $0x20] sm:$0xff]  ;;  %v580_v5 = vld [vmem:[%s727_s1 + $0x18] sm:$0xff]  ;;  %v579_v6 = vld [vmem:[%s727_s1 + $0x10] sm:$0xff]  ;;  %s540_s7 = sshll.u32 %s736_s15, 2  ;;  %vm408_vm1 = vcmask 257024  }
   0xe   : > { %v578_v7 = vld [vmem:[%s727_s1 + $0x8] sm:$0xff]  ;;  %v577_v8 = vld [vmem:[%s727_s1] sm:$0xff]  ;;  %s279_s12 = scalar_lea.vmem %s726_s0, %s540_s7  ;;  %s298_s15 = scalar_lea.vmem %s729_s3, %s540_s7 }
   0xf   : > { %v312_v9 = vld [vmem:[%s279_s12] sm:$0xf]  ;;  %s305_s23 = scalar_lea.vmem %s730_s4, %s540_s7 }
  0x10   : > { %v610_v13 = vld [vmem:[%s728_s2] ss:$0 sm:$0xff] }
  0x11   : > { %379 = vmatpush.bf16.msra.mxu0 %v583_v1  ;;  %v403_v14 = vld [vmem:[%s298_s15] sm:$0xf] }
  0x12   : > { %v404_v17 = vunpack.c.l.bf16 %v403_v14 }
  0x14   : > { %v313_v10 = vld [vmem:[#allocation2] sm:$0xff] }
  0x15   : > { %380 = vmatpush.bf16.msra.mxu0 %v582_v3 }
  0x19   : > { %381 = vmatpush.bf16.msra.mxu0 %v581_v4 }
  0x1d   : > { %382 = vmatpush.bf16.msra.mxu0 %v580_v5 }
  0x21   : > { %383 = vmatpush.bf16.msra.mxu0 %v579_v6 }
  0x25   : > { %384 = vmatpush.bf16.msra.mxu0 %v578_v7 }
  0x29   : > { %385 = vmatpush.bf16.msra.mxu0 %v577_v8 }
  0x2c   : > { %386 = vmatmul.bf16.vlgmr.msra.gmra.mxu0 %v312_v9 }
  0xa9   : > { %v387_v11 = vpop.f32.mrf.mxu0 }
  0xaa   : > { %v391_v12 = vadd.f32 %v387_v11, %v313_v10 }
  0xac   : > { %393 = vst.msk [vmem:[#allocation2] sm:$0xff] %vm310_vm0, %v391_v12 }
  0xb1   : > { %v389_v15 = vpop.f32.mrf.mxu0 }
  0xb3   : > { %v397_v16 = vld [vmem:[#allocation2] sm:$0xff] }
  0xb4   : > { %v402_v18 = vadd.f32 %v610_v13, %v397_v16 }
  0xb6   : > { %v405_v19 = vmul.f32 0.5, %v402_v18 }
  0xb8   : > { %v406_v20 = vadd.f32 %v405_v19, %v404_v17 }
  0xba   : > { %v407_v21 = vpack.c.bf16 %v406_v20, %v406_v20 }
  0xbc   : > { %409 = vst.msk [vmem:[%s305_s23] sm:$0xf] %vm408_vm1, %v407_v21 }
  0xbd PF: > { %s14_s17 = sadd.s32 1, %s633_s17   ;;  %s731_s15 = smov %s629_s16 }
  0xbe   : > { %p11_p5 = scmp.ge.s32.totalorder %s14_s17, 4   ;;  %s732_s16 = smov %s734_s18 }
  0xc0   :  { %13 = sbr.rel (!%p11_p5) target bundleno = 2 (0x2), region = 83 }

// kernel: classifier_forward.25
= control target key start
LH: loop header
LB: loop body
LE: loop exit
PB: predicated region body
PF: predicated region fallthrough
CT: control target
= control target key end

     0   :  { %s696_s18 = smov 0   ;;  %s698_s19 = smov 0   ;;  %s754_s0 = inlined_call_operand.vmem [shape: bf16[16,32], index: 0, kind: input, shape index: {}]   ;;  %s755_s1 = inlined_call_operand.vmem [shape: bf16[32,128], index: 1, kind: input, shape index: {}]   ;;  %s756_s2 = inlined_call_operand.vmem [shape: f32[1,128], index: 2, kind: input, shape index: {}]   ;;  %s757_s3 = inlined_call_operand.vmem [shape: f32[1,32], index: 3, kind: input, shape index: {}]   ;;  %s758_s4 = inlined_call_operand.vmem [shape: f32[1,32], index: 4, kind: input, shape index: {}]   ;;  %s759_s5 = inlined_call_operand.vmem [shape: bf16[16,128], index: 5, kind: output, shape index: {}]  }
   0x1   :  { %s700_s20 = smov 0  }
   0x2 LB: > { %s34_s21 = sadd.s32 1, %s659_s19  ;;  %p588_p0 = scmp.ge.s32.totalorder %s663_s20, 1  ;;  %s663_s20 = sphi %s700_s20, %s15_s20   ;;  %s659_s19 = sphi %s698_s19, %s761_s19   ;;  %s655_s18 = sphi %s696_s18, %s760_s18  }
   0x3   : > { %p36_p1 = scmp.ge.s32.totalorder %s34_s21, 2  ;;  %p252_p2 = scmp.lt.s32.totalorder %s663_s20, 3 }
   0x5   : > { %s763_s21 = smov (%p36_p1, %s34_s21), 0  ;;  %p253_p3 = pnand %p588_p0, %p252_p2 }
   0x6   : > { %p301_p4 = scmp.lt.s32.totalorder (!%p253_p3), %s655_s18, 1 }
   0x7   : > { %256 = sbr.rel (%p253_p3) target bundleno = 449 (0x1c1), region = 40 }
   0xc   : > { %s765_s18 = smov (!%p301_p4, %s655_s18), 1  ;;  %vm341_vm0 = vcmask 261120   ;;  %v665_v3 = vmov 32.0   ;;  %v604_v15 = vld [vmem:[%s755_s1 + $0x8] sm:$0xff]  ;;  %v603_v16 = vld [vmem:[%s755_s1] sm:$0xff] }
   0xd   : > { %s589_s22 = sshll.u32 %s765_s18, 2  ;;  %633 = vrcp.f32 %v665_v3  ;;  %408 = vmatpush.bf16.msra.mxu0 %v604_v15  ;;  %v630_v26 = vld [vmem:[%s757_s3] ss:$0 sm:$0xff] }
   0xe   : > { %s307_s25 = scalar_lea.vmem %s754_s0, %s589_s22  ;;  %v631_v29 = vld [vmem:[%s758_s4] ss:$0 sm:$0xff]  ;;  %s332_s13 = scalar_lea.vmem %s759_s5, %s589_s22 }
   0xf   : > { %v339_v0 = vld [vmem:[%s307_s25] sm:$0xf] }
  0x10   : > { %v340_v1 = vunpack.c.l.bf16 %v339_v0  ;;  %v632_v33 = vld [vmem:[%s756_s2] ss:$0 sm:$0xff] }
  0x11   : > { %409 = vmatpush.bf16.msra.mxu0 %v603_v16 }
  0x12   : > { %v342_v2 = vsel %vm341_vm0, %v340_v1, 0.0 }
  0x13   : > { %343 = vadd.xlane.f32.xlu0 %v342_v2  ;;  %v634_v4 = vpop.eup %633 }
  0x14   : > { %v346_v5 = vmul.f32 32.0, %v634_v4  ;;  %vm350_vm1 = vweird.f32 %v634_v4 }
  0x16   : > { %v347_v6 = vsub.f32 1.0, %v346_v5 }
  0x18   : > { %v348_v7 = vmul.f32 %v634_v4, %v347_v6 }
  0x1a   : > { %v349_v8 = vadd.f32 %v634_v4, %v348_v7 }
  0x1c   : > { %v351_v9 = vsel %vm350_vm1, %v634_v4, %v349_v8 }
  0x86   : > { %v344_v10 = vpop.xlane.xlu0 %343 }
  0x87   : > { %v352_v11 = vmul.f32 %v351_v9, %v344_v10 }
  0x89   : > { %v353_v12 = vsub.f32 %v340_v1, %v352_v11 }
  0x8b   : > { %v354_v13 = vmul.f32 %v353_v12, %v353_v12 }
  0x8d   : > { %v355_v14 = vsel %vm341_vm0, %v354_v13, 0.0 }
  0x8e   : > { %356 = vadd.xlane.f32.xlu0 %v355_v14 }
 0x101   : > { %v357_v17 = vpop.xlane.xlu0 %356 }
 0x102   : > { %v358_v18 = vmul.f32 %v357_v17, %v351_v9 }
 0x104   : > { %v359_v19 = vadd.f32 1e-05, %v358_v18 }
 0x106   : > { %635 = vrsqrt.f32 %v359_v19  ;;  %vm366_vm3 = vweird.f32 %v359_v19 }
 0x10c   : > { %v636_v20 = vpop.eup %635 }
 0x10d   : > { %v361_v21 = vmul.f32 %v636_v20, %v359_v19  ;;  %vm367_vm2 = vweird.f32 %v636_v20 }
 0x10e   : > { %vm368_vm4 = vmor %vm366_vm3, %vm367_vm2 }
 0x10f   : > { %v362_v22 = vmul.f32 %v636_v20, %v361_v21 }
 0x111   : > { %v363_v23 = vmul.f32 0.5, %v362_v22 }
 0x113   : > { %v364_v24 = vsub.f32 1.5, %v363_v23 }
 0x115   : > { %v365_v25 = vmul.f32 %v636_v20, %v364_v24 }
 0x117   : > { %v369_v27 = vsel %vm368_vm4, %v636_v20, %v365_v25 }
 0x118   : > { %v370_v28 = vmul.f32 %v369_v27, %v353_v12 }
 0x11a   : > { %v375_v30 = vmul.f32 %v630_v26, %v370_v28 }
 0x11c   : > { %v380_v31 = vadd.f32 %v631_v29, %v375_v30 }
 0x11e   : > { %v381_v32 = vpack.c.bf16 %v380_v31, %v380_v31 }
 0x120   : > { %599 = vmatmul.msk.bf16.vlgmr.msra.gmra.mxu0 %vm341_vm0, %v381_v32 }
 0x19d   : > { %v411_v34 = vpop.f32.mrf.mxu0 }
 0x19e   : > { %v425_v35 = vadd.f32 %v632_v33, %v411_v34 }
 0x1a0   : > { %v600_v36 = vmul.f32 -1.442695, %v425_v35 }
 0x1a2   : > { %637 = vpow2.f32 %v600_v36 }
 0x1a5   : > { %v413_v37 = vpop.f32.mrf.mxu0 }
 0x1a8   : > { %v638_v38 = vpop.eup %637 }
 0x1a9   : > { %v429_v39 = vadd.f32 1.0, %v638_v38 }
 0x1ab   : > { %639 = vrcp.f32 %v429_v39  ;;  %v441_v43 = vand.u32 2147483648, %v429_v39  ;;  %v439_v45 = vand.u32 2147483647, %v429_v39  ;;  %vm435_vm6 = vweird.f32 %v429_v39 }
 0x1ad   : > { %v442_v47 = vor.u32 1.1754944e-38, %v441_v43  ;;  %vm440_vm8 = vcmp.eq.f32.partialorder %v439_v45, 8.507059e+37 }
 0x1b1   : > { %v640_v40 = vpop.eup %639 }
 0x1b2   : > { %v431_v41 = vmul.f32 %v640_v40, %v429_v39  ;;  %vm436_vm5 = vweird.f32 %v640_v40 }
 0x1b3   : > { %vm437_vm7 = vmor %vm435_vm6, %vm436_vm5 }
 0x1b4   : > { %v432_v42 = vsub.f32 1.0, %v431_v41 }
 0x1b6   : > { %v433_v44 = vmul.f32 %v640_v40, %v432_v42 }
 0x1b8   : > { %v434_v46 = vadd.f32 %v640_v40, %v433_v44 }
 0x1ba   : > { %v438_v48 = vsel %vm437_vm7, %v640_v40, %v434_v46 }
 0x1bb   : > { %v443_v49 = vsel %vm440_vm8, %v442_v47, %v438_v48 }
 0x1bc   : > { %v445_v50 = vmul.f32 %v443_v49, %v425_v35 }
 0x1be   : > { %v446_v51 = vpack.c.bf16 %v445_v50, %v445_v50 }
 0x1c0   : > { %447 = vst [vmem:[%s332_s13] sm:$0xf] %v446_v51 }
 0x1c1 PF: > { %s15_s20 = sadd.s32 1, %s663_s20   ;;  %s760_s18 = smov %s659_s19 }
 0x1c2   : > { %p12_p5 = scmp.ge.s32.totalorder %s15_s20, 4   ;;  %s761_s19 = smov %s763_s21 }
 0x1c4   :  { %14 = sbr.rel (!%p12_p5) target bundleno = 2 (0x2), region = 90 }

// kernel: classifier_forward.28
= control target key start
LH: loop header
LB: loop body
LE: loop exit
PB: predicated region body
PF: predicated region fallthrough
CT: control target
= control target key end

     0   :  { %vm19_vm0 = vcmask 254976   ;;  %v87_v1 = vmov 0.0   ;;  %vm40_vm1 = vcmask 261120   ;;  %s126_s1 = inlined_call_operand.vmem [shape: bf16[32,32], index: 1, kind: input, shape index: {}]   ;;  %s127_s0 = inlined_call_operand.vmem [shape: f32[2,32], index: 0, kind: input, shape index: {}]   ;;  %s128_s2 = inlined_call_operand.vmem [shape: f32[1,32], index: 2, kind: input, shape index: {}]   ;;  %s129_s3 = inlined_call_operand.vmem [shape: f32[2,32], index: 3, kind: output, shape index: {}]  }
   0x1   :  { %v84_v0 = vld [vmem:[%s126_s1 + $0x8] sm:$0xff]  ;;  %20 = vst.msk [vmem:[#allocation2] sm:$0x3] %vm19_vm0, %v87_v1  ;;  %v83_v2 = vld [vmem:[%s126_s1] sm:$0xff] }
   0x2   :  { %50 = vmatpush.bf16.msra.mxu0 %v84_v0  ;;  %v21_v3 = vld [vmem:[%s127_s0] sm:$0x3] }
   0x3   :  { %v22_v4 = vpack.c.bf16 %v21_v3, %v21_v3  ;;  %v86_v8 = vld [vmem:[%s128_s2] ss:$0 sm:$0xff] }
   0x6   :  { %51 = vmatpush.bf16.msra.mxu0 %v83_v2 }
   0x8   :  { %v23_v5 = vld [vmem:[#allocation2] sm:$0x3] }
   0x9   :  { %82 = vmatmul.msk.bf16.vlgmr.msra.gmra.mxu0 %vm40_vm1, %v22_v4 }
  0x86   :  { %v53_v6 = vpop.f32.mrf.mxu0 }
  0x87   :  { %v57_v7 = vadd.f32 %v53_v6, %v23_v5 }
  0x89   :  { %59 = vst.msk [vmem:[#allocation2] sm:$0x3] %vm19_vm0, %v57_v7 }
  0x8e   :  { %v55_v9 = vpop.f32.mrf.mxu0 }
  0x90   :  { %v63_v10 = vld [vmem:[#allocation2] sm:$0x3] }
  0x91   :  { %v68_v11 = vadd.f32 %v86_v8, %v63_v10 }
  0x93   :  { %69 = vst.msk [vmem:[%s129_s3] sm:$0x3] %vm19_vm0, %v68_v11 }

// kernel: classifier_forward.29
= control target key start
LH: loop header
LB: loop body
LE: loop exit
PB: predicated region body
PF: predicated region fallthrough
CT: control target
= control target key end

     0   :  { %v125_v1 = vmov 0.0   ;;  %s162_s0 = inlined_call_operand.vmem [shape: f32[2,32], index: 0, kind: input, shape index: {}]   ;;  %s163_s1 = inlined_call_operand.vmem [shape: bf16[32,128], index: 1, kind: input, shape index: {}]   ;;  %s164_s2 = inlined_call_operand.vmem [shape: f32[1,128], index: 2, kind: input, shape index: {}]   ;;  %s165_s3 = inlined_call_operand.hbm [shape: f32[2,128], index: 3, kind: output, shape index: {}]  }
   0x1   :  { %v95_v0 = vld [vmem:[%s163_s1 + $0x8] sm:$0xff]  ;;  %20 = vst [vmem:[#allocation2] sm:$0x3] %v125_v1 }
   0x2   :  { %8 = vsyncpa [#allocation4], 0  ;;  %50 = vmatpush.bf16.msra.mxu0 %v95_v0  ;;  %v94_v2 = vld [vmem:[%s163_s1] sm:$0xff]  ;;  %vm40_vm0 = vcmask 261120   ;;  %s126_s20 = smov [#allocation3]   ;;  %s76_s23 = sshll.u32 %s165_s3, 4  ;;  %s77_s23 = int_to_ptr.hbm [resolvable:$true] %s76_s23 }
   0x3   :  { %v21_v3 = vld [vmem:[%s162_s0] sm:$0x3]  ;;  %s74_s21 = sshll.u32 %s126_s20, 4  ;;  %s75_s21 = int_to_ptr.vmem [resolvable:$true] %s74_s21 }
   0x4   :  { %v22_v4 = vpack.c.bf16 %v21_v3, %v21_v3  ;;  %v98_v8 = vld [vmem:[%s164_s2] ss:$0 sm:$0xff] }
   0x6   :  { %51 = vmatpush.bf16.msra.mxu0 %v94_v2 }
   0x8   :  { %v23_v5 = vld [vmem:[#allocation2] sm:$0x3] }
   0x9   :  { %93 = vmatmul.msk.bf16.vlgmr.msra.gmra.mxu0 %vm40_vm0, %v22_v4 }
  0x86   :  { %v53_v6 = vpop.f32.mrf.mxu0 }
  0x87   :  { %v57_v7 = vadd.f32 %v53_v6, %v23_v5 }
  0x89   :  { %58 = vst [vmem:[#allocation2] sm:$0x3] %v57_v7 }
  0x8e   :  { %v55_v9 = vpop.f32.mrf.mxu0 }
  0x90   :  { %v62_v10 = vld [vmem:[#allocation2] sm:$0x3] }
  0x91   :  { %v67_v11 = vadd.f32 %v98_v8, %v62_v10 }
  0x93   :  { %68 = vst [vmem:[#allocation3] sm:$0x3] %v67_v11 }
  0x94   :  { %79 = dma.vmem_to_hbm [thread:$0]  %s75_s21, 32, %s77_s23, [#allocation4]  }
  0x95   :  { %123 = dma.done.wait [#allocation4], 32  }
  0x96   :  { %124 = vsyncadd [#allocation4], 4294967264 }
  0x97   :  { %84 = vsyncpa [#allocation4], 1 }

</bundles_post_ra>
